<compile_context>
chip_gen: v7x
topology: tpu7x:2x2x1
jax: 0.10.0
libtpu: 0.0.40
codegen_flags: <defaults>
</compile_context>

<pallas_src>
import functools

import jax
import jax.numpy as jnp
from jax.experimental import pallas as pl
from jax.experimental.pallas import tpu as pltpu

# ---------------- model hyper-params (tiny, synthetic) ----------------
D_MODEL = 64
N_HEADS = 2
HEAD_DIM = D_MODEL // N_HEADS
FFN_DIM = 128
N_ENC_LAYERS = 2
N_DEC_LAYERS = 2
VOCAB = 256
MAX_POS = 64
PAD_ID = 0
BOS_ID = 1
NEG_INF = -1e9
VMEM_LIMIT = 32 * 1024 * 1024


# ---------------- in-kernel helpers (traced inside Pallas kernels) ----------------
def _layernorm(x, g, b, eps=1e-5):
    mu = jnp.mean(x, axis=-1, keepdims=True)
    var = jnp.mean(jnp.square(x - mu), axis=-1, keepdims=True)
    return (x - mu) * jax.lax.rsqrt(var + eps) * g + b


def _gelu(x):
    # tanh-approx GELU, stays in f32 on the EUP/VPU slots
    c = 0.7978845608028654
    return 0.5 * x * (1.0 + jnp.tanh(c * (x + 0.044715 * x * x * x)))


def _attention(q, k, v, wo, bo, bias):
    """q: (Sq, D), k/v: (Sk, D), bias broadcastable to (Sq, Sk). Returns (Sq, D)."""
    scale = 1.0 / (HEAD_DIM ** 0.5)
    outs = []
    for h in range(N_HEADS):  # static loop over heads, lane-dense (S, D) layout
        sl = slice(h * HEAD_DIM, (h + 1) * HEAD_DIM)
        qh = q[:, sl] * scale
        kh = k[:, sl]
        vh = v[:, sl]
        # contract on the last axis of both (no in-kernel k.T transpose)
        s = jax.lax.dot_general(qh, kh, (((1,), (1,)), ((), ())),
                                preferred_element_type=jnp.float32)
        s = s + bias
        s = s - jnp.max(s, axis=-1, keepdims=True)
        p = jnp.exp(s)
        p = p * pl.reciprocal(jnp.sum(p, axis=-1, keepdims=True), approx=True)
        outs.append(jnp.dot(p, vh, preferred_element_type=jnp.float32))
    attn = jnp.concatenate(outs, axis=-1)                       # (Sq, D)
    return jnp.dot(attn, wo, preferred_element_type=jnp.float32) + bo


# ---------------- fused Pallas kernels ----------------
def _enc_layer_kernel(x_ref, mask_ref,
                      ln1_g, ln1_b, wqkv, bqkv, wo, bo,
                      ln2_g, ln2_b, w1, b1, w2, b2,
                      fln_g, fln_b, o_ref, *, apply_final_ln):
    x = x_ref[...].astype(jnp.float32)                          # (S_enc, D)
    bias = (1.0 - mask_ref[...]) * NEG_INF                      # (1, S_enc)

    # pre-LN self-attention (fused QKV) + residual
    h = _layernorm(x, ln1_g[...], ln1_b[...])
    qkv = jnp.dot(h, wqkv[...], preferred_element_type=jnp.float32) + bqkv[...]
    q = qkv[:, :D_MODEL]
    k = qkv[:, D_MODEL:2 * D_MODEL]
    v = qkv[:, 2 * D_MODEL:]
    x = x + _attention(q, k, v, wo[...], bo[...], bias)

    # pre-LN FFN + residual
    h = _layernorm(x, ln2_g[...], ln2_b[...])
    ff = _gelu(jnp.dot(h, w1[...], preferred_element_type=jnp.float32) + b1[...])
    ff = jnp.dot(ff, w2[...], preferred_element_type=jnp.float32) + b2[...]
    x = x + ff

    if apply_final_ln:  # encoder final LayerNorm folded into the last layer
        x = _layernorm(x, fln_g[...], fln_b[...])
    o_ref[...] = x.astype(o_ref.dtype)


def _dec_layer_kernel(x_ref, enc_ref, mask_ref,
                      ln1_g, ln1_b, wqkv, bqkv, wo_s, bo_s,
                      ln2_g, ln2_b, wq_c, bq_c, wkv_c, bkv_c, wo_c, bo_c,
                      ln3_g, ln3_b, w1, b1, w2, b2, o_ref):
    x = x_ref[...].astype(jnp.float32)                          # (S_dec, D)
    enc = enc_ref[...].astype(jnp.float32)                      # (S_enc, D)
    s_dec = x.shape[0]

    # masks computed in-kernel (no HBM bias tensors)
    row = jax.lax.broadcasted_iota(jnp.int32, (s_dec, s_dec), 0)
    col = jax.lax.broadcasted_iota(jnp.int32, (s_dec, s_dec), 1)
    causal_bias = jnp.where(row >= col, 0.0, NEG_INF).astype(jnp.float32)
    cross_bias = (1.0 - mask_ref[...]) * NEG_INF                # (1, S_enc)

    # causal self-attention (fused QKV) + residual
    h = _layernorm(x, ln1_g[...], ln1_b[...])
    qkv = jnp.dot(h, wqkv[...], preferred_element_type=jnp.float32) + bqkv[...]
    q = qkv[:, :D_MODEL]
    k = qkv[:, D_MODEL:2 * D_MODEL]
    v = qkv[:, 2 * D_MODEL:]
    x = x + _attention(q, k, v, wo_s[...], bo_s[...], causal_bias)

    # cross-attention over encoder output (fused K/V) + residual
    h = _layernorm(x, ln2_g[...], ln2_b[...])
    qc = jnp.dot(h, wq_c[...], preferred_element_type=jnp.float32) + bq_c[...]
    kvc = jnp.dot(enc, wkv_c[...], preferred_element_type=jnp.float32) + bkv_c[...]
    kc = kvc[:, :D_MODEL]
    vc = kvc[:, D_MODEL:]
    x = x + _attention(qc, kc, vc, wo_c[...], bo_c[...], cross_bias)

    # FFN + residual
    h = _layernorm(x, ln3_g[...], ln3_b[...])
    ff = _gelu(jnp.dot(h, w1[...], preferred_element_type=jnp.float32) + b1[...])
    ff = jnp.dot(ff, w2[...], preferred_element_type=jnp.float32) + b2[...]
    x = x + ff
    o_ref[...] = x.astype(o_ref.dtype)


def _lm_head_ce_kernel(x_ref, labels_ref, ln_g, ln_b, emb_ref, lm_b,
                       logits_ref, loss_ref):
    h = _layernorm(x_ref[...].astype(jnp.float32), ln_g[...], ln_b[...])
    # tied LM head: contract (S, D) with embed (V, D) over D -- no embed.T buffer
    z = jax.lax.dot_general(h, emb_ref[...], (((1,), (1,)), ((), ())),
                            preferred_element_type=jnp.float32) + lm_b[...]
    logits_ref[...] = z.astype(logits_ref.dtype)
    # per-token cross-entropy without a one-hot matrix
    m = jnp.max(z, axis=-1, keepdims=True)
    lse = m + jnp.log(jnp.sum(jnp.exp(z - m), axis=-1, keepdims=True))
    lab = labels_ref[...]                                       # (S, 1) int32
    iota = jax.lax.broadcasted_iota(jnp.int32, z.shape, 1)
    tgt = jnp.sum(jnp.where(iota == lab, z, 0.0), axis=-1, keepdims=True)
    loss_ref[...] = (lse - tgt).astype(loss_ref.dtype)


# ---------------- pallas_call wrappers ----------------
def _rep_spec(shape):
    """BlockSpec for a grid-invariant operand (weights): full block, index 0."""
    nd = len(shape)
    return pl.BlockSpec(tuple(shape), lambda b: (0,) * nd)


def encoder_layer(x, maskf, p, final_ln, apply_final_ln):
    B, S, D = x.shape
    weights = (p["ln1"]["g"], p["ln1"]["b"], p["wqkv"], p["bqkv"],
               p["wo"], p["bo"], p["ln2"]["g"], p["ln2"]["b"],
               p["w1"], p["b1"], p["w2"], p["b2"],
               final_ln["g"], final_ln["b"])
    in_specs = [pl.BlockSpec((None, S, D), lambda b: (b, 0, 0)),
                pl.BlockSpec((None, 1, S), lambda b: (b, 0, 0))]
    in_specs += [_rep_spec(w.shape) for w in weights]
    return pl.pallas_call(
        functools.partial(_enc_layer_kernel, apply_final_ln=apply_final_ln),
        out_shape=jax.ShapeDtypeStruct((B, S, D), jnp.float32),
        grid=(B,),
        in_specs=in_specs,
        out_specs=pl.BlockSpec((None, S, D), lambda b: (b, 0, 0)),
        compiler_params=pltpu.CompilerParams(
            dimension_semantics=("parallel",),
            vmem_limit_bytes=VMEM_LIMIT),
    )(x, maskf, *weights)


def decoder_layer(x, enc_x, maskf, p):
    B, S_dec, D = x.shape
    S_enc = enc_x.shape[1]
    weights = (p["ln1"]["g"], p["ln1"]["b"], p["wqkv"], p["bqkv"],
               p["wo_s"], p["bo_s"], p["ln2"]["g"], p["ln2"]["b"],
               p["wq_c"], p["bq_c"], p["wkv_c"], p["bkv_c"],
               p["wo_c"], p["bo_c"], p["ln3"]["g"], p["ln3"]["b"],
               p["w1"], p["b1"], p["w2"], p["b2"])
    in_specs = [pl.BlockSpec((None, S_dec, D), lambda b: (b, 0, 0)),
                pl.BlockSpec((None, S_enc, D), lambda b: (b, 0, 0)),
                pl.BlockSpec((None, 1, S_enc), lambda b: (b, 0, 0))]
    in_specs += [_rep_spec(w.shape) for w in weights]
    return pl.pallas_call(
        _dec_layer_kernel,
        out_shape=jax.ShapeDtypeStruct((B, S_dec, D), jnp.float32),
        grid=(B,),
        in_specs=in_specs,
        out_specs=pl.BlockSpec((None, S_dec, D), lambda b: (b, 0, 0)),
        compiler_params=pltpu.CompilerParams(
            dimension_semantics=("parallel",),
            vmem_limit_bytes=VMEM_LIMIT),
    )(x, enc_x, maskf, *weights)


def lm_head_ce(dec_x, labels, dec_ln, embed, lm_bias):
    B, S, D = dec_x.shape
    V = embed.shape[0]
    labels3 = labels.reshape(B, S, 1).astype(jnp.int32)
    weights = (dec_ln["g"], dec_ln["b"], embed, lm_bias)
    in_specs = [pl.BlockSpec((None, S, D), lambda b: (b, 0, 0)),
                pl.BlockSpec((None, S, 1), lambda b: (b, 0, 0))]
    in_specs += [_rep_spec(w.shape) for w in weights]
    logits, per_tok = pl.pallas_call(
        _lm_head_ce_kernel,
        out_shape=(jax.ShapeDtypeStruct((B, S, V), jnp.float32),
                   jax.ShapeDtypeStruct((B, S, 1), jnp.float32)),
        grid=(B,),
        in_specs=in_specs,
        out_specs=(pl.BlockSpec((None, S, V), lambda b: (b, 0, 0)),
                   pl.BlockSpec((None, S, 1), lambda b: (b, 0, 0))),
        compiler_params=pltpu.CompilerParams(
            dimension_semantics=("parallel",),
            vmem_limit_bytes=VMEM_LIMIT),
    )(dec_x, labels3, *weights)
    return logits, per_tok


# ---------------- forward (5 fused pallas_calls per step) ----------------
def forward(params, prompt_tokens, prompt_mask, labels):
    B, S_enc = prompt_tokens.shape
    S_dec = labels.shape[1]
    emb_scale = jnp.sqrt(jnp.float32(D_MODEL))
    maskf = prompt_mask.astype(jnp.float32).reshape(B, 1, S_enc)

    # ---- encoder ----
    enc_x = (params["embed"][prompt_tokens] * emb_scale
             + params["enc_pos"][:S_enc][None])                 # (B, S_enc, D)
    n_enc = len(params["enc_layers"])
    for i, p in enumerate(params["enc_layers"]):
        enc_x = encoder_layer(enc_x, maskf, p, params["enc_ln"],
                              apply_final_ln=(i == n_enc - 1))

    # ---- decoder (labels shifted right, BOS prepended, Blenderbot-style) ----
    dec_tokens = jnp.concatenate(
        [jnp.full((B, 1), BOS_ID, labels.dtype), labels[:, :-1]], axis=1)
    dec_x = (params["embed"][dec_tokens] * emb_scale
             + params["dec_pos"][:S_dec][None])                 # (B, S_dec, D)
    for p in params["dec_layers"]:
        dec_x = decoder_layer(dec_x, enc_x, maskf, p)

    # ---- tied LM head + per-token cross-entropy (fused) ----
    logits, per_tok = lm_head_ce(dec_x, labels, params["dec_ln"],
                                 params["embed"], params["lm_bias"])
    # HF-style CE: positions with label == -100 are ignored (none in this test)
    valid = (labels != -100).astype(jnp.float32).reshape(B, S_dec, 1)
    loss = jnp.sum(per_tok * valid) / jnp.maximum(jnp.sum(valid), 1.0)
    return loss, logits


# ---------------- deterministic parameter init (fused-weight layout) ----------------
def init_params(key):
    keys = iter(jax.random.split(key, 256))

    def dense(fan_in, fan_out):
        w = jax.random.normal(next(keys), (fan_in, fan_out), jnp.float32)
        w = w * (1.0 / jnp.sqrt(jnp.float32(fan_in)))
        b = jnp.zeros((1, fan_out), jnp.float32)
        return w, b

    def ln():
        return {"g": jnp.ones((1, D_MODEL), jnp.float32),
                "b": jnp.zeros((1, D_MODEL), jnp.float32)}

    def enc_layer():
        wqkv, bqkv = dense(D_MODEL, 3 * D_MODEL)
        wo, bo = dense(D_MODEL, D_MODEL)
        w1, b1 = dense(D_MODEL, FFN_DIM)
        w2, b2 = dense(FFN_DIM, D_MODEL)
        return {"ln1": ln(), "wqkv": wqkv, "bqkv": bqkv, "wo": wo, "bo": bo,
                "ln2": ln(), "w1": w1, "b1": b1, "w2": w2, "b2": b2}

    def dec_layer():
        wqkv, bqkv = dense(D_MODEL, 3 * D_MODEL)
        wo_s, bo_s = dense(D_MODEL, D_MODEL)
        wq_c, bq_c = dense(D_MODEL, D_MODEL)
        wkv_c, bkv_c = dense(D_MODEL, 2 * D_MODEL)
        wo_c, bo_c = dense(D_MODEL, D_MODEL)
        w1, b1 = dense(D_MODEL, FFN_DIM)
        w2, b2 = dense(FFN_DIM, D_MODEL)
        return {"ln1": ln(), "wqkv": wqkv, "bqkv": bqkv, "wo_s": wo_s, "bo_s": bo_s,
                "ln2": ln(), "wq_c": wq_c, "bq_c": bq_c,
                "wkv_c": wkv_c, "bkv_c": bkv_c, "wo_c": wo_c, "bo_c": bo_c,
                "ln3": ln(), "w1": w1, "b1": b1, "w2": w2, "b2": b2}

    return {
        "embed": jax.random.normal(next(keys), (VOCAB, D_MODEL), jnp.float32) * 0.02,
        "enc_pos": jax.random.normal(next(keys), (MAX_POS, D_MODEL), jnp.float32) * 0.02,
        "dec_pos": jax.random.normal(next(keys), (MAX_POS, D_MODEL), jnp.float32) * 0.02,
        "enc_layers": [enc_layer() for _ in range(N_ENC_LAYERS)],
        "dec_layers": [dec_layer() for _ in range(N_DEC_LAYERS)],
        "enc_ln": ln(),
        "dec_ln": ln(),
        "lm_bias": jnp.zeros((1, VOCAB), jnp.float32),
    }


# TODO(synk): tokenizer.encode/decode and autoregressive generate() operate on
# Python strings / dynamic-length loops and have no Pallas equivalent; only the
# dense forward pass is implemented here.

if __name__ == "__main__":
    key = jax.random.PRNGKey(0)
    pk, lk, wk = jax.random.split(key, 3)

    B, S_ENC, S_DEC = 2, 16, 8
    prompt_tokens = jax.random.randint(pk, (B, S_ENC), 2, VOCAB, dtype=jnp.int32)
    # pad the tail of the second example to exercise the attention mask
    prompt_mask = jnp.ones((B, S_ENC), jnp.int32).at[1, 12:].set(0)
    prompt_tokens = jnp.where(prompt_mask == 1, prompt_tokens, PAD_ID)
    labels = jax.random.randint(lk, (B, S_DEC), 2, VOCAB, dtype=jnp.int32)

    params = init_params(wk)
    loss, logits = jax.jit(forward)(params, prompt_tokens, prompt_mask, labels)
    jax.block_until_ready((loss, logits))

    assert logits.shape == (B, S_DEC, VOCAB)
    assert jnp.isfinite(loss)
    print("KERNEL_OK")
</pallas_src>

<mosaic_0001>
module attributes {stable_mosaic.version = 11 : i64} {
  func.func @_enc_layer_kernel(%arg0: i32, %arg1: memref<1x16x64xf32, #tpu.memory_space<vmem>>, %arg2: memref<1x1x16xf32, #tpu.memory_space<vmem>>, %arg3: memref<1x64xf32, #tpu.memory_space<vmem>>, %arg4: memref<1x64xf32, #tpu.memory_space<vmem>>, %arg5: memref<64x192xf32, #tpu.memory_space<vmem>>, %arg6: memref<1x192xf32, #tpu.memory_space<vmem>>, %arg7: memref<64x64xf32, #tpu.memory_space<vmem>>, %arg8: memref<1x64xf32, #tpu.memory_space<vmem>>, %arg9: memref<1x64xf32, #tpu.memory_space<vmem>>, %arg10: memref<1x64xf32, #tpu.memory_space<vmem>>, %arg11: memref<64x128xf32, #tpu.memory_space<vmem>>, %arg12: memref<1x128xf32, #tpu.memory_space<vmem>>, %arg13: memref<128x64xf32, #tpu.memory_space<vmem>>, %arg14: memref<1x64xf32, #tpu.memory_space<vmem>>, %arg15: memref<1x64xf32, #tpu.memory_space<vmem>>, %arg16: memref<1x64xf32, #tpu.memory_space<vmem>>, %arg17: memref<1x16x64xf32, #tpu.memory_space<vmem>>) attributes {dimension_semantics = [#tpu.dimension_semantics<parallel>], iteration_bounds = array<i64: 2>, scalar_prefetch = 0 : i64, scratch_operands = 0 : i64, tpu.core_type = #tpu.core_type<tc>, window_params = [{transform_indices = @transform_0, window_bounds = array<i64: 1, 16, 64>}, {transform_indices = @transform_1, window_bounds = array<i64: 1, 1, 16>}, {pipeline_mode = #tpu.pipeline_mode<synchronous>, transform_indices = @transform_2, window_bounds = array<i64: 1, 64>}, {pipeline_mode = #tpu.pipeline_mode<synchronous>, transform_indices = @transform_3, window_bounds = array<i64: 1, 64>}, {pipeline_mode = #tpu.pipeline_mode<synchronous>, transform_indices = @transform_4, window_bounds = array<i64: 64, 192>}, {pipeline_mode = #tpu.pipeline_mode<synchronous>, transform_indices = @transform_5, window_bounds = array<i64: 1, 192>}, {pipeline_mode = #tpu.pipeline_mode<synchronous>, transform_indices = @transform_6, window_bounds = array<i64: 64, 64>}, {pipeline_mode = #tpu.pipeline_mode<synchronous>, transform_indices = @transform_7, window_bounds = array<i64: 1, 64>}, {pipeline_mode = #tpu.pipeline_mode<synchronous>, transform_indices = @transform_8, window_bounds = array<i64: 1, 64>}, {pipeline_mode = #tpu.pipeline_mode<synchronous>, transform_indices = @transform_9, window_bounds = array<i64: 1, 64>}, {pipeline_mode = #tpu.pipeline_mode<synchronous>, transform_indices = @transform_10, window_bounds = array<i64: 64, 128>}, {pipeline_mode = #tpu.pipeline_mode<synchronous>, transform_indices = @transform_11, window_bounds = array<i64: 1, 128>}, {pipeline_mode = #tpu.pipeline_mode<synchronous>, transform_indices = @transform_12, window_bounds = array<i64: 128, 64>}, {pipeline_mode = #tpu.pipeline_mode<synchronous>, transform_indices = @transform_13, window_bounds = array<i64: 1, 64>}, {pipeline_mode = #tpu.pipeline_mode<synchronous>, transform_indices = @transform_14, window_bounds = array<i64: 1, 64>}, {pipeline_mode = #tpu.pipeline_mode<synchronous>, transform_indices = @transform_15, window_bounds = array<i64: 1, 64>}, {transform_indices = @transform_16, window_bounds = array<i64: 1, 16, 64>}]} {
    %c0 = arith.constant 0 : index
    %c0_0 = arith.constant 0 : index
    %c0_1 = arith.constant 0 : index
    %0 = vector.load %arg1[%c0, %c0_0, %c0_1] : memref<1x16x64xf32, #tpu.memory_space<vmem>>, vector<1x16x64xf32>
    %1 = vector.shape_cast %0 : vector<1x16x64xf32> to vector<16x64xf32>
    %c0_2 = arith.constant 0 : index
    %c0_3 = arith.constant 0 : index
    %c0_4 = arith.constant 0 : index
    %2 = vector.load %arg2[%c0_2, %c0_3, %c0_4] : memref<1x1x16xf32, #tpu.memory_space<vmem>>, vector<1x1x16xf32>
    %3 = vector.shape_cast %2 : vector<1x1x16xf32> to vector<1x16xf32>
    %cst = arith.constant 1.000000e+00 : f32
    %4 = vector.broadcast %cst : f32 to vector<1x16xf32>
    %5 = arith.subf %4, %3 : vector<1x16xf32>
    %cst_5 = arith.constant -1.000000e+09 : f32
    %6 = vector.broadcast %cst_5 : f32 to vector<1x16xf32>
    %7 = arith.mulf %5, %6 : vector<1x16xf32>
    %c0_6 = arith.constant 0 : index
    %c0_7 = arith.constant 0 : index
    %8 = vector.load %arg3[%c0_6, %c0_7] : memref<1x64xf32, #tpu.memory_space<vmem>>, vector<1x64xf32>
    %c0_8 = arith.constant 0 : index
    %c0_9 = arith.constant 0 : index
    %9 = vector.load %arg4[%c0_8, %c0_9] : memref<1x64xf32, #tpu.memory_space<vmem>>, vector<1x64xf32>
    %cst_10 = arith.constant dense<0.000000e+00> : vector<16xf32>
    %10 = vector.multi_reduction <add>, %1, %cst_10 [1] : vector<16x64xf32> to vector<16xf32>
    %11 = vector.shape_cast %10 : vector<16xf32> to vector<16x1xf32>
    %cst_11 = arith.constant 6.400000e+01 : f32
    %12 = vector.broadcast %cst_11 : f32 to vector<16x1xf32>
    %13 = arith.divf %11, %12 : vector<16x1xf32>
    %14 = vector.broadcast %13 : vector<16x1xf32> to vector<16x64xf32>
    %15 = arith.subf %1, %14 : vector<16x64xf32>
    %16 = arith.mulf %15, %15 : vector<16x64xf32>
    %cst_12 = arith.constant dense<0.000000e+00> : vector<16xf32>
    %17 = vector.multi_reduction <add>, %16, %cst_12 [1] : vector<16x64xf32> to vector<16xf32>
    %18 = vector.shape_cast %17 : vector<16xf32> to vector<16x1xf32>
    %cst_13 = arith.constant 6.400000e+01 : f32
    %19 = vector.broadcast %cst_13 : f32 to vector<16x1xf32>
    %20 = arith.divf %18, %19 : vector<16x1xf32>
    %21 = vector.broadcast %13 : vector<16x1xf32> to vector<16x64xf32>
    %22 = arith.subf %1, %21 : vector<16x64xf32>
    %cst_14 = arith.constant 9.99999974E-6 : f32
    %23 = vector.broadcast %cst_14 : f32 to vector<16x1xf32>
    %24 = arith.addf %20, %23 : vector<16x1xf32>
    %25 = math.rsqrt %24 : vector<16x1xf32>
    %26 = vector.broadcast %25 : vector<16x1xf32> to vector<16x64xf32>
    %27 = arith.mulf %22, %26 : vector<16x64xf32>
    %28 = vector.broadcast %8 : vector<1x64xf32> to vector<16x64xf32>
    %29 = arith.mulf %27, %28 : vector<16x64xf32>
    %30 = vector.broadcast %9 : vector<1x64xf32> to vector<16x64xf32>
    %31 = arith.addf %29, %30 : vector<16x64xf32>
    %c0_15 = arith.constant 0 : index
    %c0_16 = arith.constant 0 : index
    %32 = vector.load %arg5[%c0_15, %c0_16] : memref<64x192xf32, #tpu.memory_space<vmem>>, vector<64x192xf32>
    %cst_17 = arith.constant dense<0.000000e+00> : vector<16x192xf32>
    %33 = tpu.matmul %31, %32, %cst_17 {dimension_numbers = #tpu.dot_dimension_numbers<[1], [0], [0], [1], [0, 0, 1, 1], [], []>} : vector<16x64xf32>, vector<64x192xf32>, vector<16x192xf32> -> vector<16x192xf32>
    %c0_18 = arith.constant 0 : index
    %c0_19 = arith.constant 0 : index
    %34 = vector.load %arg6[%c0_18, %c0_19] : memref<1x192xf32, #tpu.memory_space<vmem>>, vector<1x192xf32>
    %35 = vector.broadcast %34 : vector<1x192xf32> to vector<16x192xf32>
    %36 = arith.addf %33, %35 : vector<16x192xf32>
    %37 = vector.extract_strided_slice %36 {offsets = [0, 0], sizes = [16, 64], strides = [1, 1]} : vector<16x192xf32> to vector<16x64xf32>
    %38 = vector.extract_strided_slice %36 {offsets = [0, 64], sizes = [16, 64], strides = [1, 1]} : vector<16x192xf32> to vector<16x64xf32>
    %39 = vector.extract_strided_slice %36 {offsets = [0, 128], sizes = [16, 64], strides = [1, 1]} : vector<16x192xf32> to vector<16x64xf32>
    %c0_20 = arith.constant 0 : index
    %c0_21 = arith.constant 0 : index
    %40 = vector.load %arg7[%c0_20, %c0_21] : memref<64x64xf32, #tpu.memory_space<vmem>>, vector<64x64xf32>
    %c0_22 = arith.constant 0 : index
    %c0_23 = arith.constant 0 : index
    %41 = vector.load %arg8[%c0_22, %c0_23] : memref<1x64xf32, #tpu.memory_space<vmem>>, vector<1x64xf32>
    %42 = vector.extract_strided_slice %37 {offsets = [0, 0], sizes = [16, 32], strides = [1, 1]} : vector<16x64xf32> to vector<16x32xf32>
    %cst_24 = arith.constant 0.176776692 : f32
    %43 = vector.broadcast %cst_24 : f32 to vector<16x32xf32>
    %44 = arith.mulf %42, %43 : vector<16x32xf32>
    %45 = vector.extract_strided_slice %38 {offsets = [0, 0], sizes = [16, 32], strides = [1, 1]} : vector<16x64xf32> to vector<16x32xf32>
    %46 = vector.extract_strided_slice %39 {offsets = [0, 0], sizes = [16, 32], strides = [1, 1]} : vector<16x64xf32> to vector<16x32xf32>
    %cst_25 = arith.constant dense<0.000000e+00> : vector<16x16xf32>
    %47 = tpu.matmul %44, %45, %cst_25 {dimension_numbers = #tpu.dot_dimension_numbers<[1], [1], [0], [0], [0, 0, 1, 0], [], []>} : vector<16x32xf32>, vector<16x32xf32>, vector<16x16xf32> -> vector<16x16xf32>
    %48 = vector.broadcast %7 : vector<1x16xf32> to vector<16x16xf32>
    %49 = arith.addf %47, %48 : vector<16x16xf32>
    %cst_26 = arith.constant dense<0xFF800000> : vector<16xf32>
    %50 = vector.multi_reduction <maximumf>, %49, %cst_26 [1] : vector<16x16xf32> to vector<16xf32>
    %51 = vector.shape_cast %50 : vector<16xf32> to vector<16x1xf32>
    %52 = vector.broadcast %51 : vector<16x1xf32> to vector<16x16xf32>
    %53 = arith.subf %49, %52 : vector<16x16xf32>
    %54 = math.exp %53 : vector<16x16xf32>
    %cst_27 = arith.constant dense<0.000000e+00> : vector<16xf32>
    %55 = vector.multi_reduction <add>, %54, %cst_27 [1] : vector<16x16xf32> to vector<16xf32>
    %56 = vector.shape_cast %55 : vector<16xf32> to vector<16x1xf32>
    %57 = tpu.reciprocal %56 {approx = true} : vector<16x1xf32> -> vector<16x1xf32>
    %58 = vector.broadcast %57 : vector<16x1xf32> to vector<16x16xf32>
    %59 = arith.mulf %54, %58 : vector<16x16xf32>
    %cst_28 = arith.constant dense<0.000000e+00> : vector<16x32xf32>
    %60 = tpu.matmul %59, %46, %cst_28 {dimension_numbers = #tpu.dot_dimension_numbers<[1], [0], [0], [1], [0, 0, 1, 1], [], []>} : vector<16x16xf32>, vector<16x32xf32>, vector<16x32xf32> -> vector<16x32xf32>
    %61 = vector.extract_strided_slice %37 {offsets = [0, 32], sizes = [16, 32], strides = [1, 1]} : vector<16x64xf32> to vector<16x32xf32>
    %cst_29 = arith.constant 0.176776692 : f32
    %62 = vector.broadcast %cst_29 : f32 to vector<16x32xf32>
    %63 = arith.mulf %61, %62 : vector<16x32xf32>
    %64 = vector.extract_strided_slice %38 {offsets = [0, 32], sizes = [16, 32], strides = [1, 1]} : vector<16x64xf32> to vector<16x32xf32>
    %65 = vector.extract_strided_slice %39 {offsets = [0, 32], sizes = [16, 32], strides = [1, 1]} : vector<16x64xf32> to vector<16x32xf32>
    %cst_30 = arith.constant dense<0.000000e+00> : vector<16x16xf32>
    %66 = tpu.matmul %63, %64, %cst_30 {dimension_numbers = #tpu.dot_dimension_numbers<[1], [1], [0], [0], [0, 0, 1, 0], [], []>} : vector<16x32xf32>, vector<16x32xf32>, vector<16x16xf32> -> vector<16x16xf32>
    %67 = vector.broadcast %7 : vector<1x16xf32> to vector<16x16xf32>
    %68 = arith.addf %66, %67 : vector<16x16xf32>
    %cst_31 = arith.constant dense<0xFF800000> : vector<16xf32>
    %69 = vector.multi_reduction <maximumf>, %68, %cst_31 [1] : vector<16x16xf32> to vector<16xf32>
    %70 = vector.shape_cast %69 : vector<16xf32> to vector<16x1xf32>
    %71 = vector.broadcast %70 : vector<16x1xf32> to vector<16x16xf32>
    %72 = arith.subf %68, %71 : vector<16x16xf32>
    %73 = math.exp %72 : vector<16x16xf32>
    %cst_32 = arith.constant dense<0.000000e+00> : vector<16xf32>
    %74 = vector.multi_reduction <add>, %73, %cst_32 [1] : vector<16x16xf32> to vector<16xf32>
    %75 = vector.shape_cast %74 : vector<16xf32> to vector<16x1xf32>
    %76 = tpu.reciprocal %75 {approx = true} : vector<16x1xf32> -> vector<16x1xf32>
    %77 = vector.broadcast %76 : vector<16x1xf32> to vector<16x16xf32>
    %78 = arith.mulf %73, %77 : vector<16x16xf32>
    %cst_33 = arith.constant dense<0.000000e+00> : vector<16x32xf32>
    %79 = tpu.matmul %78, %65, %cst_33 {dimension_numbers = #tpu.dot_dimension_numbers<[1], [0], [0], [1], [0, 0, 1, 1], [], []>} : vector<16x16xf32>, vector<16x32xf32>, vector<16x32xf32> -> vector<16x32xf32>
    %80 = tpu.concatenate %60, %79 in 1 : vector<16x32xf32>, vector<16x32xf32> -> vector<16x64xf32>
    %cst_34 = arith.constant dense<0.000000e+00> : vector<16x64xf32>
    %81 = tpu.matmul %80, %40, %cst_34 {dimension_numbers = #tpu.dot_dimension_numbers<[1], [0], [0], [1], [0, 0, 1, 1], [], []>} : vector<16x64xf32>, vector<64x64xf32>, vector<16x64xf32> -> vector<16x64xf32>
    %82 = vector.broadcast %41 : vector<1x64xf32> to vector<16x64xf32>
    %83 = arith.addf %81, %82 : vector<16x64xf32>
    %84 = arith.addf %1, %83 : vector<16x64xf32>
    %c0_35 = arith.constant 0 : index
    %c0_36 = arith.constant 0 : index
    %85 = vector.load %arg9[%c0_35, %c0_36] : memref<1x64xf32, #tpu.memory_space<vmem>>, vector<1x64xf32>
    %c0_37 = arith.constant 0 : index
    %c0_38 = arith.constant 0 : index
    %86 = vector.load %arg10[%c0_37, %c0_38] : memref<1x64xf32, #tpu.memory_space<vmem>>, vector<1x64xf32>
    %cst_39 = arith.constant dense<0.000000e+00> : vector<16xf32>
    %87 = vector.multi_reduction <add>, %84, %cst_39 [1] : vector<16x64xf32> to vector<16xf32>
    %88 = vector.shape_cast %87 : vector<16xf32> to vector<16x1xf32>
    %cst_40 = arith.constant 6.400000e+01 : f32
    %89 = vector.broadcast %cst_40 : f32 to vector<16x1xf32>
    %90 = arith.divf %88, %89 : vector<16x1xf32>
    %91 = vector.broadcast %90 : vector<16x1xf32> to vector<16x64xf32>
    %92 = arith.subf %84, %91 : vector<16x64xf32>
    %93 = arith.mulf %92, %92 : vector<16x64xf32>
    %cst_41 = arith.constant dense<0.000000e+00> : vector<16xf32>
    %94 = vector.multi_reduction <add>, %93, %cst_41 [1] : vector<16x64xf32> to vector<16xf32>
    %95 = vector.shape_cast %94 : vector<16xf32> to vector<16x1xf32>
    %cst_42 = arith.constant 6.400000e+01 : f32
    %96 = vector.broadcast %cst_42 : f32 to vector<16x1xf32>
    %97 = arith.divf %95, %96 : vector<16x1xf32>
    %98 = vector.broadcast %90 : vector<16x1xf32> to vector<16x64xf32>
    %99 = arith.subf %84, %98 : vector<16x64xf32>
    %cst_43 = arith.constant 9.99999974E-6 : f32
    %100 = vector.broadcast %cst_43 : f32 to vector<16x1xf32>
    %101 = arith.addf %97, %100 : vector<16x1xf32>
    %102 = math.rsqrt %101 : vector<16x1xf32>
    %103 = vector.broadcast %102 : vector<16x1xf32> to vector<16x64xf32>
    %104 = arith.mulf %99, %103 : vector<16x64xf32>
    %105 = vector.broadcast %85 : vector<1x64xf32> to vector<16x64xf32>
    %106 = arith.mulf %104, %105 : vector<16x64xf32>
    %107 = vector.broadcast %86 : vector<1x64xf32> to vector<16x64xf32>
    %108 = arith.addf %106, %107 : vector<16x64xf32>
    %c0_44 = arith.constant 0 : index
    %c0_45 = arith.constant 0 : index
    %109 = vector.load %arg11[%c0_44, %c0_45] : memref<64x128xf32, #tpu.memory_space<vmem>>, vector<64x128xf32>
    %cst_46 = arith.constant dense<0.000000e+00> : vector<16x128xf32>
    %110 = tpu.matmul %108, %109, %cst_46 {dimension_numbers = #tpu.dot_dimension_numbers<[1], [0], [0], [1], [0, 0, 1, 1], [], []>} : vector<16x64xf32>, vector<64x128xf32>, vector<16x128xf32> -> vector<16x128xf32>
    %c0_47 = arith.constant 0 : index
    %c0_48 = arith.constant 0 : index
    %111 = vector.load %arg12[%c0_47, %c0_48] : memref<1x128xf32, #tpu.memory_space<vmem>>, vector<1x128xf32>
    %112 = vector.broadcast %111 : vector<1x128xf32> to vector<16x128xf32>
    %113 = arith.addf %110, %112 : vector<16x128xf32>
    %cst_49 = arith.constant 5.000000e-01 : f32
    %114 = vector.broadcast %cst_49 : f32 to vector<16x128xf32>
    %115 = arith.mulf %114, %113 : vector<16x128xf32>
    %cst_50 = arith.constant 4.471500e-02 : f32
    %116 = vector.broadcast %cst_50 : f32 to vector<16x128xf32>
    %117 = arith.mulf %116, %113 : vector<16x128xf32>
    %118 = arith.mulf %117, %113 : vector<16x128xf32>
    %119 = arith.mulf %118, %113 : vector<16x128xf32>
    %120 = arith.addf %113, %119 : vector<16x128xf32>
    %cst_51 = arith.constant 0.797884583 : f32
    %121 = vector.broadcast %cst_51 : f32 to vector<16x128xf32>
    %122 = arith.mulf %121, %120 : vector<16x128xf32>
    %123 = math.tanh %122 : vector<16x128xf32>
    %cst_52 = arith.constant 1.000000e+00 : f32
    %124 = vector.broadcast %cst_52 : f32 to vector<16x128xf32>
    %125 = arith.addf %124, %123 : vector<16x128xf32>
    %126 = arith.mulf %115, %125 : vector<16x128xf32>
    %c0_53 = arith.constant 0 : index
    %c0_54 = arith.constant 0 : index
    %127 = vector.load %arg13[%c0_53, %c0_54] : memref<128x64xf32, #tpu.memory_space<vmem>>, vector<128x64xf32>
    %cst_55 = arith.constant dense<0.000000e+00> : vector<16x64xf32>
    %128 = tpu.matmul %126, %127, %cst_55 {dimension_numbers = #tpu.dot_dimension_numbers<[1], [0], [0], [1], [0, 0, 1, 1], [], []>} : vector<16x128xf32>, vector<128x64xf32>, vector<16x64xf32> -> vector<16x64xf32>
    %c0_56 = arith.constant 0 : index
    %c0_57 = arith.constant 0 : index
    %129 = vector.load %arg14[%c0_56, %c0_57] : memref<1x64xf32, #tpu.memory_space<vmem>>, vector<1x64xf32>
    %130 = vector.broadcast %129 : vector<1x64xf32> to vector<16x64xf32>
    %131 = arith.addf %128, %130 : vector<16x64xf32>
    %132 = arith.addf %84, %131 : vector<16x64xf32>
    %c0_58 = arith.constant 0 : index
    %c0_59 = arith.constant 0 : index
    %c0_60 = arith.constant 0 : index
    %133 = vector.load %arg17[%c0_58, %c0_59, %c0_60] : memref<1x16x64xf32, #tpu.memory_space<vmem>>, vector<1x16x64xf32>
    %134 = vector.shape_cast %133 : vector<1x16x64xf32> to vector<16x64xf32>
    %135 = vector.shape_cast %132 : vector<16x64xf32> to vector<1x16x64xf32>
    tpu.vector_store %arg17[%c0_58, %c0_59, %c0_60], %135 {strides = array<i32>} : memref<1x16x64xf32, #tpu.memory_space<vmem>>, vector<1x16x64xf32>,
    return
  }
  func.func @transform_0(%arg0: i32) -> (i32, i32, i32) {
    %c0_i32 = arith.constant 0 : i32
    %c0_i32_0 = arith.constant 0 : i32
    %c0_i32_1 = arith.constant 0 : i32
    return %arg0, %c0_i32, %c0_i32_0 : i32, i32, i32
  }
  func.func @transform_1(%arg0: i32) -> (i32, i32, i32) {
    %c0_i32 = arith.constant 0 : i32
    %c0_i32_0 = arith.constant 0 : i32
    %c0_i32_1 = arith.constant 0 : i32
    return %arg0, %c0_i32, %c0_i32_0 : i32, i32, i32
  }
  func.func @transform_2(%arg0: i32) -> (i32, i32) {
    %c0_i32 = arith.constant 0 : i32
    %c0_i32_0 = arith.constant 0 : i32
    %c0_i32_1 = arith.constant 0 : i32
    return %c0_i32, %c0_i32_0 : i32, i32
  }
  func.func @transform_3(%arg0: i32) -> (i32, i32) {
    %c0_i32 = arith.constant 0 : i32
    %c0_i32_0 = arith.constant 0 : i32
    %c0_i32_1 = arith.constant 0 : i32
    return %c0_i32, %c0_i32_0 : i32, i32
  }
  func.func @transform_4(%arg0: i32) -> (i32, i32) {
    %c0_i32 = arith.constant 0 : i32
    %c0_i32_0 = arith.constant 0 : i32
    %c0_i32_1 = arith.constant 0 : i32
    return %c0_i32, %c0_i32_0 : i32, i32
  }
  func.func @transform_5(%arg0: i32) -> (i32, i32) {
    %c0_i32 = arith.constant 0 : i32
    %c0_i32_0 = arith.constant 0 : i32
    %c0_i32_1 = arith.constant 0 : i32
    return %c0_i32, %c0_i32_0 : i32, i32
  }
  func.func @transform_6(%arg0: i32) -> (i32, i32) {
    %c0_i32 = arith.constant 0 : i32
    %c0_i32_0 = arith.constant 0 : i32
    %c0_i32_1 = arith.constant 0 : i32
    return %c0_i32, %c0_i32_0 : i32, i32
  }
  func.func @transform_7(%arg0: i32) -> (i32, i32) {
    %c0_i32 = arith.constant 0 : i32
    %c0_i32_0 = arith.constant 0 : i32
    %c0_i32_1 = arith.constant 0 : i32
    return %c0_i32, %c0_i32_0 : i32, i32
  }
  func.func @transform_8(%arg0: i32) -> (i32, i32) {
    %c0_i32 = arith.constant 0 : i32
    %c0_i32_0 = arith.constant 0 : i32
    %c0_i32_1 = arith.constant 0 : i32
    return %c0_i32, %c0_i32_0 : i32, i32
  }
  func.func @transform_9(%arg0: i32) -> (i32, i32) {
    %c0_i32 = arith.constant 0 : i32
    %c0_i32_0 = arith.constant 0 : i32
    %c0_i32_1 = arith.constant 0 : i32
    return %c0_i32, %c0_i32_0 : i32, i32
  }
  func.func @transform_10(%arg0: i32) -> (i32, i32) {
    %c0_i32 = arith.constant 0 : i32
    %c0_i32_0 = arith.constant 0 : i32
    %c0_i32_1 = arith.constant 0 : i32
    return %c0_i32, %c0_i32_0 : i32, i32
  }
  func.func @transform_11(%arg0: i32) -> (i32, i32) {
    %c0_i32 = arith.constant 0 : i32
    %c0_i32_0 = arith.constant 0 : i32
    %c0_i32_1 = arith.constant 0 : i32
    return %c0_i32, %c0_i32_0 : i32, i32
  }
  func.func @transform_12(%arg0: i32) -> (i32, i32) {
    %c0_i32 = arith.constant 0 : i32
    %c0_i32_0 = arith.constant 0 : i32
    %c0_i32_1 = arith.constant 0 : i32
    return %c0_i32, %c0_i32_0 : i32, i32
  }
  func.func @transform_13(%arg0: i32) -> (i32, i32) {
    %c0_i32 = arith.constant 0 : i32
    %c0_i32_0 = arith.constant 0 : i32
    %c0_i32_1 = arith.constant 0 : i32
    return %c0_i32, %c0_i32_0 : i32, i32
  }
  func.func @transform_14(%arg0: i32) -> (i32, i32) {
    %c0_i32 = arith.constant 0 : i32
    %c0_i32_0 = arith.constant 0 : i32
    %c0_i32_1 = arith.constant 0 : i32
    return %c0_i32, %c0_i32_0 : i32, i32
  }
  func.func @transform_15(%arg0: i32) -> (i32, i32) {
    %c0_i32 = arith.constant 0 : i32
    %c0_i32_0 = arith.constant 0 : i32
    %c0_i32_1 = arith.constant 0 : i32
    return %c0_i32, %c0_i32_0 : i32, i32
  }
  func.func @transform_16(%arg0: i32) -> (i32, i32, i32) {
    %c0_i32 = arith.constant 0 : i32
    %c0_i32_0 = arith.constant 0 : i32
    %c0_i32_1 = arith.constant 0 : i32
    return %arg0, %c0_i32, %c0_i32_0 : i32, i32, i32
  }
}

module attributes {stable_mosaic.version = 11 : i64} {
  func.func @_enc_layer_kernel(%arg0: i32, %arg1: memref<1x16x64xf32, #tpu.memory_space<vmem>>, %arg2: memref<1x1x16xf32, #tpu.memory_space<vmem>>, %arg3: memref<1x64xf32, #tpu.memory_space<vmem>>, %arg4: memref<1x64xf32, #tpu.memory_space<vmem>>, %arg5: memref<64x192xf32, #tpu.memory_space<vmem>>, %arg6: memref<1x192xf32, #tpu.memory_space<vmem>>, %arg7: memref<64x64xf32, #tpu.memory_space<vmem>>, %arg8: memref<1x64xf32, #tpu.memory_space<vmem>>, %arg9: memref<1x64xf32, #tpu.memory_space<vmem>>, %arg10: memref<1x64xf32, #tpu.memory_space<vmem>>, %arg11: memref<64x128xf32, #tpu.memory_space<vmem>>, %arg12: memref<1x128xf32, #tpu.memory_space<vmem>>, %arg13: memref<128x64xf32, #tpu.memory_space<vmem>>, %arg14: memref<1x64xf32, #tpu.memory_space<vmem>>, %arg15: memref<1x64xf32, #tpu.memory_space<vmem>>, %arg16: memref<1x64xf32, #tpu.memory_space<vmem>>, %arg17: memref<1x16x64xf32, #tpu.memory_space<vmem>>) attributes {dimension_semantics = [#tpu.dimension_semantics<parallel>], iteration_bounds = array<i64: 2>, scalar_prefetch = 0 : i64, scratch_operands = 0 : i64, tpu.core_type = #tpu.core_type<tc>, window_params = [{transform_indices = @transform_0, window_bounds = array<i64: 1, 16, 64>}, {transform_indices = @transform_1, window_bounds = array<i64: 1, 1, 16>}, {pipeline_mode = #tpu.pipeline_mode<synchronous>, transform_indices = @transform_2, window_bounds = array<i64: 1, 64>}, {pipeline_mode = #tpu.pipeline_mode<synchronous>, transform_indices = @transform_3, window_bounds = array<i64: 1, 64>}, {pipeline_mode = #tpu.pipeline_mode<synchronous>, transform_indices = @transform_4, window_bounds = array<i64: 64, 192>}, {pipeline_mode = #tpu.pipeline_mode<synchronous>, transform_indices = @transform_5, window_bounds = array<i64: 1, 192>}, {pipeline_mode = #tpu.pipeline_mode<synchronous>, transform_indices = @transform_6, window_bounds = array<i64: 64, 64>}, {pipeline_mode = #tpu.pipeline_mode<synchronous>, transform_indices = @transform_7, window_bounds = array<i64: 1, 64>}, {pipeline_mode = #tpu.pipeline_mode<synchronous>, transform_indices = @transform_8, window_bounds = array<i64: 1, 64>}, {pipeline_mode = #tpu.pipeline_mode<synchronous>, transform_indices = @transform_9, window_bounds = array<i64: 1, 64>}, {pipeline_mode = #tpu.pipeline_mode<synchronous>, transform_indices = @transform_10, window_bounds = array<i64: 64, 128>}, {pipeline_mode = #tpu.pipeline_mode<synchronous>, transform_indices = @transform_11, window_bounds = array<i64: 1, 128>}, {pipeline_mode = #tpu.pipeline_mode<synchronous>, transform_indices = @transform_12, window_bounds = array<i64: 128, 64>}, {pipeline_mode = #tpu.pipeline_mode<synchronous>, transform_indices = @transform_13, window_bounds = array<i64: 1, 64>}, {pipeline_mode = #tpu.pipeline_mode<synchronous>, transform_indices = @transform_14, window_bounds = array<i64: 1, 64>}, {pipeline_mode = #tpu.pipeline_mode<synchronous>, transform_indices = @transform_15, window_bounds = array<i64: 1, 64>}, {transform_indices = @transform_16, window_bounds = array<i64: 1, 16, 64>}]} {
    %c0 = arith.constant 0 : index
    %c0_0 = arith.constant 0 : index
    %c0_1 = arith.constant 0 : index
    %0 = vector.load %arg1[%c0, %c0_0, %c0_1] : memref<1x16x64xf32, #tpu.memory_space<vmem>>, vector<1x16x64xf32>
    %1 = vector.shape_cast %0 : vector<1x16x64xf32> to vector<16x64xf32>
    %c0_2 = arith.constant 0 : index
    %c0_3 = arith.constant 0 : index
    %c0_4 = arith.constant 0 : index
    %2 = vector.load %arg2[%c0_2, %c0_3, %c0_4] : memref<1x1x16xf32, #tpu.memory_space<vmem>>, vector<1x1x16xf32>
    %3 = vector.shape_cast %2 : vector<1x1x16xf32> to vector<1x16xf32>
    %cst = arith.constant 1.000000e+00 : f32
    %4 = vector.broadcast %cst : f32 to vector<1x16xf32>
    %5 = arith.subf %4, %3 : vector<1x16xf32>
    %cst_5 = arith.constant -1.000000e+09 : f32
    %6 = vector.broadcast %cst_5 : f32 to vector<1x16xf32>
    %7 = arith.mulf %5, %6 : vector<1x16xf32>
    %c0_6 = arith.constant 0 : index
    %c0_7 = arith.constant 0 : index
    %8 = vector.load %arg3[%c0_6, %c0_7] : memref<1x64xf32, #tpu.memory_space<vmem>>, vector<1x64xf32>
    %c0_8 = arith.constant 0 : index
    %c0_9 = arith.constant 0 : index
    %9 = vector.load %arg4[%c0_8, %c0_9] : memref<1x64xf32, #tpu.memory_space<vmem>>, vector<1x64xf32>
    %cst_10 = arith.constant dense<0.000000e+00> : vector<16xf32>
    %10 = vector.multi_reduction <add>, %1, %cst_10 [1] : vector<16x64xf32> to vector<16xf32>
    %11 = vector.shape_cast %10 : vector<16xf32> to vector<16x1xf32>
    %cst_11 = arith.constant 6.400000e+01 : f32
    %12 = vector.broadcast %cst_11 : f32 to vector<16x1xf32>
    %13 = arith.divf %11, %12 : vector<16x1xf32>
    %14 = vector.broadcast %13 : vector<16x1xf32> to vector<16x64xf32>
    %15 = arith.subf %1, %14 : vector<16x64xf32>
    %16 = arith.mulf %15, %15 : vector<16x64xf32>
    %cst_12 = arith.constant dense<0.000000e+00> : vector<16xf32>
    %17 = vector.multi_reduction <add>, %16, %cst_12 [1] : vector<16x64xf32> to vector<16xf32>
    %18 = vector.shape_cast %17 : vector<16xf32> to vector<16x1xf32>
    %cst_13 = arith.constant 6.400000e+01 : f32
    %19 = vector.broadcast %cst_13 : f32 to vector<16x1xf32>
    %20 = arith.divf %18, %19 : vector<16x1xf32>
    %21 = vector.broadcast %13 : vector<16x1xf32> to vector<16x64xf32>
    %22 = arith.subf %1, %21 : vector<16x64xf32>
    %cst_14 = arith.constant 9.99999974E-6 : f32
    %23 = vector.broadcast %cst_14 : f32 to vector<16x1xf32>
    %24 = arith.addf %20, %23 : vector<16x1xf32>
    %25 = math.rsqrt %24 : vector<16x1xf32>
    %26 = vector.broadcast %25 : vector<16x1xf32> to vector<16x64xf32>
    %27 = arith.mulf %22, %26 : vector<16x64xf32>
    %28 = vector.broadcast %8 : vector<1x64xf32> to vector<16x64xf32>
    %29 = arith.mulf %27, %28 : vector<16x64xf32>
    %30 = vector.broadcast %9 : vector<1x64xf32> to vector<16x64xf32>
    %31 = arith.addf %29, %30 : vector<16x64xf32>
    %c0_15 = arith.constant 0 : index
    %c0_16 = arith.constant 0 : index
    %32 = vector.load %arg5[%c0_15, %c0_16] : memref<64x192xf32, #tpu.memory_space<vmem>>, vector<64x192xf32>
    %cst_17 = arith.constant dense<0.000000e+00> : vector<16x192xf32>
    %33 = tpu.matmul %31, %32, %cst_17 {dimension_numbers = #tpu.dot_dimension_numbers<[1], [0], [0], [1], [0, 0, 1, 1], [], []>} : vector<16x64xf32>, vector<64x192xf32>, vector<16x192xf32> -> vector<16x192xf32>
    %c0_18 = arith.constant 0 : index
    %c0_19 = arith.constant 0 : index
    %34 = vector.load %arg6[%c0_18, %c0_19] : memref<1x192xf32, #tpu.memory_space<vmem>>, vector<1x192xf32>
    %35 = vector.broadcast %34 : vector<1x192xf32> to vector<16x192xf32>
    %36 = arith.addf %33, %35 : vector<16x192xf32>
    %37 = vector.extract_strided_slice %36 {offsets = [0, 0], sizes = [16, 64], strides = [1, 1]} : vector<16x192xf32> to vector<16x64xf32>
    %38 = vector.extract_strided_slice %36 {offsets = [0, 64], sizes = [16, 64], strides = [1, 1]} : vector<16x192xf32> to vector<16x64xf32>
    %39 = vector.extract_strided_slice %36 {offsets = [0, 128], sizes = [16, 64], strides = [1, 1]} : vector<16x192xf32> to vector<16x64xf32>
    %c0_20 = arith.constant 0 : index
    %c0_21 = arith.constant 0 : index
    %40 = vector.load %arg7[%c0_20, %c0_21] : memref<64x64xf32, #tpu.memory_space<vmem>>, vector<64x64xf32>
    %c0_22 = arith.constant 0 : index
    %c0_23 = arith.constant 0 : index
    %41 = vector.load %arg8[%c0_22, %c0_23] : memref<1x64xf32, #tpu.memory_space<vmem>>, vector<1x64xf32>
    %42 = vector.extract_strided_slice %37 {offsets = [0, 0], sizes = [16, 32], strides = [1, 1]} : vector<16x64xf32> to vector<16x32xf32>
    %cst_24 = arith.constant 0.176776692 : f32
    %43 = vector.broadcast %cst_24 : f32 to vector<16x32xf32>
    %44 = arith.mulf %42, %43 : vector<16x32xf32>
    %45 = vector.extract_strided_slice %38 {offsets = [0, 0], sizes = [16, 32], strides = [1, 1]} : vector<16x64xf32> to vector<16x32xf32>
    %46 = vector.extract_strided_slice %39 {offsets = [0, 0], sizes = [16, 32], strides = [1, 1]} : vector<16x64xf32> to vector<16x32xf32>
    %cst_25 = arith.constant dense<0.000000e+00> : vector<16x16xf32>
    %47 = tpu.matmul %44, %45, %cst_25 {dimension_numbers = #tpu.dot_dimension_numbers<[1], [1], [0], [0], [0, 0, 1, 0], [], []>} : vector<16x32xf32>, vector<16x32xf32>, vector<16x16xf32> -> vector<16x16xf32>
    %48 = vector.broadcast %7 : vector<1x16xf32> to vector<16x16xf32>
    %49 = arith.addf %47, %48 : vector<16x16xf32>
    %cst_26 = arith.constant dense<0xFF800000> : vector<16xf32>
    %50 = vector.multi_reduction <maximumf>, %49, %cst_26 [1] : vector<16x16xf32> to vector<16xf32>
    %51 = vector.shape_cast %50 : vector<16xf32> to vector<16x1xf32>
    %52 = vector.broadcast %51 : vector<16x1xf32> to vector<16x16xf32>
    %53 = arith.subf %49, %52 : vector<16x16xf32>
    %54 = math.exp %53 : vector<16x16xf32>
    %cst_27 = arith.constant dense<0.000000e+00> : vector<16xf32>
    %55 = vector.multi_reduction <add>, %54, %cst_27 [1] : vector<16x16xf32> to vector<16xf32>
    %56 = vector.shape_cast %55 : vector<16xf32> to vector<16x1xf32>
    %57 = tpu.reciprocal %56 {approx = true} : vector<16x1xf32> -> vector<16x1xf32>
    %58 = vector.broadcast %57 : vector<16x1xf32> to vector<16x16xf32>
    %59 = arith.mulf %54, %58 : vector<16x16xf32>
    %cst_28 = arith.constant dense<0.000000e+00> : vector<16x32xf32>
    %60 = tpu.matmul %59, %46, %cst_28 {dimension_numbers = #tpu.dot_dimension_numbers<[1], [0], [0], [1], [0, 0, 1, 1], [], []>} : vector<16x16xf32>, vector<16x32xf32>, vector<16x32xf32> -> vector<16x32xf32>
    %61 = vector.extract_strided_slice %37 {offsets = [0, 32], sizes = [16, 32], strides = [1, 1]} : vector<16x64xf32> to vector<16x32xf32>
    %cst_29 = arith.constant 0.176776692 : f32
    %62 = vector.broadcast %cst_29 : f32 to vector<16x32xf32>
    %63 = arith.mulf %61, %62 : vector<16x32xf32>
    %64 = vector.extract_strided_slice %38 {offsets = [0, 32], sizes = [16, 32], strides = [1, 1]} : vector<16x64xf32> to vector<16x32xf32>
    %65 = vector.extract_strided_slice %39 {offsets = [0, 32], sizes = [16, 32], strides = [1, 1]} : vector<16x64xf32> to vector<16x32xf32>
    %cst_30 = arith.constant dense<0.000000e+00> : vector<16x16xf32>
    %66 = tpu.matmul %63, %64, %cst_30 {dimension_numbers = #tpu.dot_dimension_numbers<[1], [1], [0], [0], [0, 0, 1, 0], [], []>} : vector<16x32xf32>, vector<16x32xf32>, vector<16x16xf32> -> vector<16x16xf32>
    %67 = vector.broadcast %7 : vector<1x16xf32> to vector<16x16xf32>
    %68 = arith.addf %66, %67 : vector<16x16xf32>
    %cst_31 = arith.constant dense<0xFF800000> : vector<16xf32>
    %69 = vector.multi_reduction <maximumf>, %68, %cst_31 [1] : vector<16x16xf32> to vector<16xf32>
    %70 = vector.shape_cast %69 : vector<16xf32> to vector<16x1xf32>
    %71 = vector.broadcast %70 : vector<16x1xf32> to vector<16x16xf32>
    %72 = arith.subf %68, %71 : vector<16x16xf32>
    %73 = math.exp %72 : vector<16x16xf32>
    %cst_32 = arith.constant dense<0.000000e+00> : vector<16xf32>
    %74 = vector.multi_reduction <add>, %73, %cst_32 [1] : vector<16x16xf32> to vector<16xf32>
    %75 = vector.shape_cast %74 : vector<16xf32> to vector<16x1xf32>
    %76 = tpu.reciprocal %75 {approx = true} : vector<16x1xf32> -> vector<16x1xf32>
    %77 = vector.broadcast %76 : vector<16x1xf32> to vector<16x16xf32>
    %78 = arith.mulf %73, %77 : vector<16x16xf32>
    %cst_33 = arith.constant dense<0.000000e+00> : vector<16x32xf32>
    %79 = tpu.matmul %78, %65, %cst_33 {dimension_numbers = #tpu.dot_dimension_numbers<[1], [0], [0], [1], [0, 0, 1, 1], [], []>} : vector<16x16xf32>, vector<16x32xf32>, vector<16x32xf32> -> vector<16x32xf32>
    %80 = tpu.concatenate %60, %79 in 1 : vector<16x32xf32>, vector<16x32xf32> -> vector<16x64xf32>
    %cst_34 = arith.constant dense<0.000000e+00> : vector<16x64xf32>
    %81 = tpu.matmul %80, %40, %cst_34 {dimension_numbers = #tpu.dot_dimension_numbers<[1], [0], [0], [1], [0, 0, 1, 1], [], []>} : vector<16x64xf32>, vector<64x64xf32>, vector<16x64xf32> -> vector<16x64xf32>
    %82 = vector.broadcast %41 : vector<1x64xf32> to vector<16x64xf32>
    %83 = arith.addf %81, %82 : vector<16x64xf32>
    %84 = arith.addf %1, %83 : vector<16x64xf32>
    %c0_35 = arith.constant 0 : index
    %c0_36 = arith.constant 0 : index
    %85 = vector.load %arg9[%c0_35, %c0_36] : memref<1x64xf32, #tpu.memory_space<vmem>>, vector<1x64xf32>
    %c0_37 = arith.constant 0 : index
    %c0_38 = arith.constant 0 : index
    %86 = vector.load %arg10[%c0_37, %c0_38] : memref<1x64xf32, #tpu.memory_space<vmem>>, vector<1x64xf32>
    %cst_39 = arith.constant dense<0.000000e+00> : vector<16xf32>
    %87 = vector.multi_reduction <add>, %84, %cst_39 [1] : vector<16x64xf32> to vector<16xf32>
    %88 = vector.shape_cast %87 : vector<16xf32> to vector<16x1xf32>
    %cst_40 = arith.constant 6.400000e+01 : f32
    %89 = vector.broadcast %cst_40 : f32 to vector<16x1xf32>
    %90 = arith.divf %88, %89 : vector<16x1xf32>
    %91 = vector.broadcast %90 : vector<16x1xf32> to vector<16x64xf32>
    %92 = arith.subf %84, %91 : vector<16x64xf32>
    %93 = arith.mulf %92, %92 : vector<16x64xf32>
    %cst_41 = arith.constant dense<0.000000e+00> : vector<16xf32>
    %94 = vector.multi_reduction <add>, %93, %cst_41 [1] : vector<16x64xf32> to vector<16xf32>
    %95 = vector.shape_cast %94 : vector<16xf32> to vector<16x1xf32>
    %cst_42 = arith.constant 6.400000e+01 : f32
    %96 = vector.broadcast %cst_42 : f32 to vector<16x1xf32>
    %97 = arith.divf %95, %96 : vector<16x1xf32>
    %98 = vector.broadcast %90 : vector<16x1xf32> to vector<16x64xf32>
    %99 = arith.subf %84, %98 : vector<16x64xf32>
    %cst_43 = arith.constant 9.99999974E-6 : f32
    %100 = vector.broadcast %cst_43 : f32 to vector<16x1xf32>
    %101 = arith.addf %97, %100 : vector<16x1xf32>
    %102 = math.rsqrt %101 : vector<16x1xf32>
    %103 = vector.broadcast %102 : vector<16x1xf32> to vector<16x64xf32>
    %104 = arith.mulf %99, %103 : vector<16x64xf32>
    %105 = vector.broadcast %85 : vector<1x64xf32> to vector<16x64xf32>
    %106 = arith.mulf %104, %105 : vector<16x64xf32>
    %107 = vector.broadcast %86 : vector<1x64xf32> to vector<16x64xf32>
    %108 = arith.addf %106, %107 : vector<16x64xf32>
    %c0_44 = arith.constant 0 : index
    %c0_45 = arith.constant 0 : index
    %109 = vector.load %arg11[%c0_44, %c0_45] : memref<64x128xf32, #tpu.memory_space<vmem>>, vector<64x128xf32>
    %cst_46 = arith.constant dense<0.000000e+00> : vector<16x128xf32>
    %110 = tpu.matmul %108, %109, %cst_46 {dimension_numbers = #tpu.dot_dimension_numbers<[1], [0], [0], [1], [0, 0, 1, 1], [], []>} : vector<16x64xf32>, vector<64x128xf32>, vector<16x128xf32> -> vector<16x128xf32>
    %c0_47 = arith.constant 0 : index
    %c0_48 = arith.constant 0 : index
    %111 = vector.load %arg12[%c0_47, %c0_48] : memref<1x128xf32, #tpu.memory_space<vmem>>, vector<1x128xf32>
    %112 = vector.broadcast %111 : vector<1x128xf32> to vector<16x128xf32>
    %113 = arith.addf %110, %112 : vector<16x128xf32>
    %cst_49 = arith.constant 5.000000e-01 : f32
    %114 = vector.broadcast %cst_49 : f32 to vector<16x128xf32>
    %115 = arith.mulf %114, %113 : vector<16x128xf32>
    %cst_50 = arith.constant 4.471500e-02 : f32
    %116 = vector.broadcast %cst_50 : f32 to vector<16x128xf32>
    %117 = arith.mulf %116, %113 : vector<16x128xf32>
    %118 = arith.mulf %117, %113 : vector<16x128xf32>
    %119 = arith.mulf %118, %113 : vector<16x128xf32>
    %120 = arith.addf %113, %119 : vector<16x128xf32>
    %cst_51 = arith.constant 0.797884583 : f32
    %121 = vector.broadcast %cst_51 : f32 to vector<16x128xf32>
    %122 = arith.mulf %121, %120 : vector<16x128xf32>
    %123 = math.tanh %122 : vector<16x128xf32>
    %cst_52 = arith.constant 1.000000e+00 : f32
    %124 = vector.broadcast %cst_52 : f32 to vector<16x128xf32>
    %125 = arith.addf %124, %123 : vector<16x128xf32>
    %126 = arith.mulf %115, %125 : vector<16x128xf32>
    %c0_53 = arith.constant 0 : index
    %c0_54 = arith.constant 0 : index
    %127 = vector.load %arg13[%c0_53, %c0_54] : memref<128x64xf32, #tpu.memory_space<vmem>>, vector<128x64xf32>
    %cst_55 = arith.constant dense<0.000000e+00> : vector<16x64xf32>
    %128 = tpu.matmul %126, %127, %cst_55 {dimension_numbers = #tpu.dot_dimension_numbers<[1], [0], [0], [1], [0, 0, 1, 1], [], []>} : vector<16x128xf32>, vector<128x64xf32>, vector<16x64xf32> -> vector<16x64xf32>
    %c0_56 = arith.constant 0 : index
    %c0_57 = arith.constant 0 : index
    %129 = vector.load %arg14[%c0_56, %c0_57] : memref<1x64xf32, #tpu.memory_space<vmem>>, vector<1x64xf32>
    %130 = vector.broadcast %129 : vector<1x64xf32> to vector<16x64xf32>
    %131 = arith.addf %128, %130 : vector<16x64xf32>
    %132 = arith.addf %84, %131 : vector<16x64xf32>
    %c0_58 = arith.constant 0 : index
    %c0_59 = arith.constant 0 : index
    %133 = vector.load %arg15[%c0_58, %c0_59] : memref<1x64xf32, #tpu.memory_space<vmem>>, vector<1x64xf32>
    %c0_60 = arith.constant 0 : index
    %c0_61 = arith.constant 0 : index
    %134 = vector.load %arg16[%c0_60, %c0_61] : memref<1x64xf32, #tpu.memory_space<vmem>>, vector<1x64xf32>
    %cst_62 = arith.constant dense<0.000000e+00> : vector<16xf32>
    %135 = vector.multi_reduction <add>, %132, %cst_62 [1] : vector<16x64xf32> to vector<16xf32>
    %136 = vector.shape_cast %135 : vector<16xf32> to vector<16x1xf32>
    %cst_63 = arith.constant 6.400000e+01 : f32
    %137 = vector.broadcast %cst_63 : f32 to vector<16x1xf32>
    %138 = arith.divf %136, %137 : vector<16x1xf32>
    %139 = vector.broadcast %138 : vector<16x1xf32> to vector<16x64xf32>
    %140 = arith.subf %132, %139 : vector<16x64xf32>
    %141 = arith.mulf %140, %140 : vector<16x64xf32>
    %cst_64 = arith.constant dense<0.000000e+00> : vector<16xf32>
    %142 = vector.multi_reduction <add>, %141, %cst_64 [1] : vector<16x64xf32> to vector<16xf32>
    %143 = vector.shape_cast %142 : vector<16xf32> to vector<16x1xf32>
    %cst_65 = arith.constant 6.400000e+01 : f32
    %144 = vector.broadcast %cst_65 : f32 to vector<16x1xf32>
    %145 = arith.divf %143, %144 : vector<16x1xf32>
    %146 = vector.broadcast %138 : vector<16x1xf32> to vector<16x64xf32>
    %147 = arith.subf %132, %146 : vector<16x64xf32>
    %cst_66 = arith.constant 9.99999974E-6 : f32
    %148 = vector.broadcast %cst_66 : f32 to vector<16x1xf32>
    %149 = arith.addf %145, %148 : vector<16x1xf32>
    %150 = math.rsqrt %149 : vector<16x1xf32>
    %151 = vector.broadcast %150 : vector<16x1xf32> to vector<16x64xf32>
    %152 = arith.mulf %147, %151 : vector<16x64xf32>
    %153 = vector.broadcast %133 : vector<1x64xf32> to vector<16x64xf32>
    %154 = arith.mulf %152, %153 : vector<16x64xf32>
    %155 = vector.broadcast %134 : vector<1x64xf32> to vector<16x64xf32>
    %156 = arith.addf %154, %155 : vector<16x64xf32>
    %c0_67 = arith.constant 0 : index
    %c0_68 = arith.constant 0 : index
    %c0_69 = arith.constant 0 : index
    %157 = vector.load %arg17[%c0_67, %c0_68, %c0_69] : memref<1x16x64xf32, #tpu.memory_space<vmem>>, vector<1x16x64xf32>
    %158 = vector.shape_cast %157 : vector<1x16x64xf32> to vector<16x64xf32>
    %159 = vector.shape_cast %156 : vector<16x64xf32> to vector<1x16x64xf32>
    tpu.vector_store %arg17[%c0_67, %c0_68, %c0_69], %159 {strides = array<i32>} : memref<1x16x64xf32, #tpu.memory_space<vmem>>, vector<1x16x64xf32>,
    return
  }
  func.func @transform_0(%arg0: i32) -> (i32, i32, i32) {
    %c0_i32 = arith.constant 0 : i32
    %c0_i32_0 = arith.constant 0 : i32
    %c0_i32_1 = arith.constant 0 : i32
    return %arg0, %c0_i32, %c0_i32_0 : i32, i32, i32
  }
  func.func @transform_1(%arg0: i32) -> (i32, i32, i32) {
    %c0_i32 = arith.constant 0 : i32
    %c0_i32_0 = arith.constant 0 : i32
    %c0_i32_1 = arith.constant 0 : i32
    return %arg0, %c0_i32, %c0_i32_0 : i32, i32, i32
  }
  func.func @transform_2(%arg0: i32) -> (i32, i32) {
    %c0_i32 = arith.constant 0 : i32
    %c0_i32_0 = arith.constant 0 : i32
    %c0_i32_1 = arith.constant 0 : i32
    return %c0_i32, %c0_i32_0 : i32, i32
  }
  func.func @transform_3(%arg0: i32) -> (i32, i32) {
    %c0_i32 = arith.constant 0 : i32
    %c0_i32_0 = arith.constant 0 : i32
    %c0_i32_1 = arith.constant 0 : i32
    return %c0_i32, %c0_i32_0 : i32, i32
  }
  func.func @transform_4(%arg0: i32) -> (i32, i32) {
    %c0_i32 = arith.constant 0 : i32
    %c0_i32_0 = arith.constant 0 : i32
    %c0_i32_1 = arith.constant 0 : i32
    return %c0_i32, %c0_i32_0 : i32, i32
  }
  func.func @transform_5(%arg0: i32) -> (i32, i32) {
    %c0_i32 = arith.constant 0 : i32
    %c0_i32_0 = arith.constant 0 : i32
    %c0_i32_1 = arith.constant 0 : i32
    return %c0_i32, %c0_i32_0 : i32, i32
  }
  func.func @transform_6(%arg0: i32) -> (i32, i32) {
    %c0_i32 = arith.constant 0 : i32
    %c0_i32_0 = arith.constant 0 : i32
    %c0_i32_1 = arith.constant 0 : i32
    return %c0_i32, %c0_i32_0 : i32, i32
  }
  func.func @transform_7(%arg0: i32) -> (i32, i32) {
    %c0_i32 = arith.constant 0 : i32
    %c0_i32_0 = arith.constant 0 : i32
    %c0_i32_1 = arith.constant 0 : i32
    return %c0_i32, %c0_i32_0 : i32, i32
  }
  func.func @transform_8(%arg0: i32) -> (i32, i32) {
    %c0_i32 = arith.constant 0 : i32
    %c0_i32_0 = arith.constant 0 : i32
    %c0_i32_1 = arith.constant 0 : i32
    return %c0_i32, %c0_i32_0 : i32, i32
  }
  func.func @transform_9(%arg0: i32) -> (i32, i32) {
    %c0_i32 = arith.constant 0 : i32
    %c0_i32_0 = arith.constant 0 : i32
    %c0_i32_1 = arith.constant 0 : i32
    return %c0_i32, %c0_i32_0 : i32, i32
  }
  func.func @transform_10(%arg0: i32) -> (i32, i32) {
    %c0_i32 = arith.constant 0 : i32
    %c0_i32_0 = arith.constant 0 : i32
    %c0_i32_1 = arith.constant 0 : i32
    return %c0_i32, %c0_i32_0 : i32, i32
  }
  func.func @transform_11(%arg0: i32) -> (i32, i32) {
    %c0_i32 = arith.constant 0 : i32
    %c0_i32_0 = arith.constant 0 : i32
    %c0_i32_1 = arith.constant 0 : i32
    return %c0_i32, %c0_i32_0 : i32, i32
  }
  func.func @transform_12(%arg0: i32) -> (i32, i32) {
    %c0_i32 = arith.constant 0 : i32
    %c0_i32_0 = arith.constant 0 : i32
    %c0_i32_1 = arith.constant 0 : i32
    return %c0_i32, %c0_i32_0 : i32, i32
  }
  func.func @transform_13(%arg0: i32) -> (i32, i32) {
    %c0_i32 = arith.constant 0 : i32
    %c0_i32_0 = arith.constant 0 : i32
    %c0_i32_1 = arith.constant 0 : i32
    return %c0_i32, %c0_i32_0 : i32, i32
  }
  func.func @transform_14(%arg0: i32) -> (i32, i32) {
    %c0_i32 = arith.constant 0 : i32
    %c0_i32_0 = arith.constant 0 : i32
    %c0_i32_1 = arith.constant 0 : i32
    return %c0_i32, %c0_i32_0 : i32, i32
  }
  func.func @transform_15(%arg0: i32) -> (i32, i32) {
    %c0_i32 = arith.constant 0 : i32
    %c0_i32_0 = arith.constant 0 : i32
    %c0_i32_1 = arith.constant 0 : i32
    return %c0_i32, %c0_i32_0 : i32, i32
  }
  func.func @transform_16(%arg0: i32) -> (i32, i32, i32) {
    %c0_i32 = arith.constant 0 : i32
    %c0_i32_0 = arith.constant 0 : i32
    %c0_i32_1 = arith.constant 0 : i32
    return %arg0, %c0_i32, %c0_i32_0 : i32, i32, i32
  }
}

module attributes {stable_mosaic.version = 11 : i64} {
  func.func @_lm_head_ce_kernel(%arg0: i32, %arg1: memref<1x8x64xf32, #tpu.memory_space<vmem>>, %arg2: memref<1x8x1xi32, #tpu.memory_space<vmem>>, %arg3: memref<1x64xf32, #tpu.memory_space<vmem>>, %arg4: memref<1x64xf32, #tpu.memory_space<vmem>>, %arg5: memref<256x64xf32, #tpu.memory_space<vmem>>, %arg6: memref<1x256xf32, #tpu.memory_space<vmem>>, %arg7: memref<1x8x256xf32, #tpu.memory_space<vmem>>, %arg8: memref<1x8x1xf32, #tpu.memory_space<vmem>>) attributes {dimension_semantics = [#tpu.dimension_semantics<parallel>], iteration_bounds = array<i64: 2>, scalar_prefetch = 0 : i64, scratch_operands = 0 : i64, tpu.core_type = #tpu.core_type<tc>, window_params = [{transform_indices = @transform_0, window_bounds = array<i64: 1, 8, 64>}, {transform_indices = @transform_1, window_bounds = array<i64: 1, 8, 1>}, {pipeline_mode = #tpu.pipeline_mode<synchronous>, transform_indices = @transform_2, window_bounds = array<i64: 1, 64>}, {pipeline_mode = #tpu.pipeline_mode<synchronous>, transform_indices = @transform_3, window_bounds = array<i64: 1, 64>}, {pipeline_mode = #tpu.pipeline_mode<synchronous>, transform_indices = @transform_4, window_bounds = array<i64: 256, 64>}, {pipeline_mode = #tpu.pipeline_mode<synchronous>, transform_indices = @transform_5, window_bounds = array<i64: 1, 256>}, {transform_indices = @transform_6, window_bounds = array<i64: 1, 8, 256>}, {transform_indices = @transform_7, window_bounds = array<i64: 1, 8, 1>}]} {
    %c0 = arith.constant 0 : index
    %c0_0 = arith.constant 0 : index
    %c0_1 = arith.constant 0 : index
    %0 = vector.load %arg1[%c0, %c0_0, %c0_1] : memref<1x8x64xf32, #tpu.memory_space<vmem>>, vector<1x8x64xf32>
    %1 = vector.shape_cast %0 : vector<1x8x64xf32> to vector<8x64xf32>
    %c0_2 = arith.constant 0 : index
    %c0_3 = arith.constant 0 : index
    %2 = vector.load %arg3[%c0_2, %c0_3] : memref<1x64xf32, #tpu.memory_space<vmem>>, vector<1x64xf32>
    %c0_4 = arith.constant 0 : index
    %c0_5 = arith.constant 0 : index
    %3 = vector.load %arg4[%c0_4, %c0_5] : memref<1x64xf32, #tpu.memory_space<vmem>>, vector<1x64xf32>
    %cst = arith.constant dense<0.000000e+00> : vector<8xf32>
    %4 = vector.multi_reduction <add>, %1, %cst [1] : vector<8x64xf32> to vector<8xf32>
    %5 = vector.shape_cast %4 : vector<8xf32> to vector<8x1xf32>
    %cst_6 = arith.constant 6.400000e+01 : f32
    %6 = vector.broadcast %cst_6 : f32 to vector<8x1xf32>
    %7 = arith.divf %5, %6 : vector<8x1xf32>
    %8 = vector.broadcast %7 : vector<8x1xf32> to vector<8x64xf32>
    %9 = arith.subf %1, %8 : vector<8x64xf32>
    %10 = arith.mulf %9, %9 : vector<8x64xf32>
    %cst_7 = arith.constant dense<0.000000e+00> : vector<8xf32>
    %11 = vector.multi_reduction <add>, %10, %cst_7 [1] : vector<8x64xf32> to vector<8xf32>
    %12 = vector.shape_cast %11 : vector<8xf32> to vector<8x1xf32>
    %cst_8 = arith.constant 6.400000e+01 : f32
    %13 = vector.broadcast %cst_8 : f32 to vector<8x1xf32>
    %14 = arith.divf %12, %13 : vector<8x1xf32>
    %15 = vector.broadcast %7 : vector<8x1xf32> to vector<8x64xf32>
    %16 = arith.subf %1, %15 : vector<8x64xf32>
    %cst_9 = arith.constant 9.99999974E-6 : f32
    %17 = vector.broadcast %cst_9 : f32 to vector<8x1xf32>
    %18 = arith.addf %14, %17 : vector<8x1xf32>
    %19 = math.rsqrt %18 : vector<8x1xf32>
    %20 = vector.broadcast %19 : vector<8x1xf32> to vector<8x64xf32>
    %21 = arith.mulf %16, %20 : vector<8x64xf32>
    %22 = vector.broadcast %2 : vector<1x64xf32> to vector<8x64xf32>
    %23 = arith.mulf %21, %22 : vector<8x64xf32>
    %24 = vector.broadcast %3 : vector<1x64xf32> to vector<8x64xf32>
    %25 = arith.addf %23, %24 : vector<8x64xf32>
    %c0_10 = arith.constant 0 : index
    %c0_11 = arith.constant 0 : index
    %26 = vector.load %arg5[%c0_10, %c0_11] : memref<256x64xf32, #tpu.memory_space<vmem>>, vector<256x64xf32>
    %cst_12 = arith.constant dense<0.000000e+00> : vector<8x256xf32>
    %27 = tpu.matmul %25, %26, %cst_12 {dimension_numbers = #tpu.dot_dimension_numbers<[1], [1], [0], [0], [0, 0, 1, 0], [], []>} : vector<8x64xf32>, vector<256x64xf32>, vector<8x256xf32> -> vector<8x256xf32>
    %c0_13 = arith.constant 0 : index
    %c0_14 = arith.constant 0 : index
    %28 = vector.load %arg6[%c0_13, %c0_14] : memref<1x256xf32, #tpu.memory_space<vmem>>, vector<1x256xf32>
    %29 = vector.broadcast %28 : vector<1x256xf32> to vector<8x256xf32>
    %30 = arith.addf %27, %29 : vector<8x256xf32>
    %c0_15 = arith.constant 0 : index
    %c0_16 = arith.constant 0 : index
    %c0_17 = arith.constant 0 : index
    %31 = vector.load %arg7[%c0_15, %c0_16, %c0_17] : memref<1x8x256xf32, #tpu.memory_space<vmem>>, vector<1x8x256xf32>
    %32 = vector.shape_cast %31 : vector<1x8x256xf32> to vector<8x256xf32>
    %33 = vector.shape_cast %30 : vector<8x256xf32> to vector<1x8x256xf32>
    tpu.vector_store %arg7[%c0_15, %c0_16, %c0_17], %33 {strides = array<i32>} : memref<1x8x256xf32, #tpu.memory_space<vmem>>, vector<1x8x256xf32>,
    %cst_18 = arith.constant dense<0xFF800000> : vector<8xf32>
    %34 = vector.multi_reduction <maximumf>, %30, %cst_18 [1] : vector<8x256xf32> to vector<8xf32>
    %35 = vector.shape_cast %34 : vector<8xf32> to vector<8x1xf32>
    %36 = vector.broadcast %35 : vector<8x1xf32> to vector<8x256xf32>
    %37 = arith.subf %30, %36 : vector<8x256xf32>
    %38 = math.exp %37 : vector<8x256xf32>
    %cst_19 = arith.constant dense<0.000000e+00> : vector<8xf32>
    %39 = vector.multi_reduction <add>, %38, %cst_19 [1] : vector<8x256xf32> to vector<8xf32>
    %40 = vector.shape_cast %39 : vector<8xf32> to vector<8x1xf32>
    %41 = math.log %40 : vector<8x1xf32>
    %42 = arith.addf %35, %41 : vector<8x1xf32>
    %c0_20 = arith.constant 0 : index
    %c0_21 = arith.constant 0 : index
    %c0_22 = arith.constant 0 : index
    %43 = vector.load %arg2[%c0_20, %c0_21, %c0_22] : memref<1x8x1xi32, #tpu.memory_space<vmem>>, vector<1x8x1xi32>
    %44 = vector.shape_cast %43 : vector<1x8x1xi32> to vector<8x1xi32>
    %45 = tpu.iota {dimensions = array<i32: 1>} : vector<8x256xi32>
    %46 = vector.broadcast %44 : vector<8x1xi32> to vector<8x256xi32>
    %47 = arith.cmpi eq, %45, %46 : vector<8x256xi32>
    %cst_23 = arith.constant 0.000000e+00 : f32
    %48 = vector.broadcast %cst_23 : f32 to vector<8x256xf32>
    %49 = arith.select %47, %30, %48 : vector<8x256xi1>, vector<8x256xf32>
    %cst_24 = arith.constant dense<0.000000e+00> : vector<8xf32>
    %50 = vector.multi_reduction <add>, %49, %cst_24 [1] : vector<8x256xf32> to vector<8xf32>
    %51 = vector.shape_cast %50 : vector<8xf32> to vector<8x1xf32>
    %52 = arith.subf %42, %51 : vector<8x1xf32>
    %c0_25 = arith.constant 0 : index
    %c0_26 = arith.constant 0 : index
    %c0_27 = arith.constant 0 : index
    %53 = vector.load %arg8[%c0_25, %c0_26, %c0_27] : memref<1x8x1xf32, #tpu.memory_space<vmem>>, vector<1x8x1xf32>
    %54 = vector.shape_cast %53 : vector<1x8x1xf32> to vector<8x1xf32>
    %55 = vector.shape_cast %52 : vector<8x1xf32> to vector<1x8x1xf32>
    tpu.vector_store %arg8[%c0_25, %c0_26, %c0_27], %55 {strides = array<i32>} : memref<1x8x1xf32, #tpu.memory_space<vmem>>, vector<1x8x1xf32>,
    return
  }
  func.func @transform_0(%arg0: i32) -> (i32, i32, i32) {
    %c0_i32 = arith.constant 0 : i32
    %c0_i32_0 = arith.constant 0 : i32
    %c0_i32_1 = arith.constant 0 : i32
    return %arg0, %c0_i32, %c0_i32_0 : i32, i32, i32
  }
  func.func @transform_1(%arg0: i32) -> (i32, i32, i32) {
    %c0_i32 = arith.constant 0 : i32
    %c0_i32_0 = arith.constant 0 : i32
    %c0_i32_1 = arith.constant 0 : i32
    return %arg0, %c0_i32, %c0_i32_0 : i32, i32, i32
  }
  func.func @transform_2(%arg0: i32) -> (i32, i32) {
    %c0_i32 = arith.constant 0 : i32
    %c0_i32_0 = arith.constant 0 : i32
    %c0_i32_1 = arith.constant 0 : i32
    return %c0_i32, %c0_i32_0 : i32, i32
  }
  func.func @transform_3(%arg0: i32) -> (i32, i32) {
    %c0_i32 = arith.constant 0 : i32
    %c0_i32_0 = arith.constant 0 : i32
    %c0_i32_1 = arith.constant 0 : i32
    return %c0_i32, %c0_i32_0 : i32, i32
  }
  func.func @transform_4(%arg0: i32) -> (i32, i32) {
    %c0_i32 = arith.constant 0 : i32
    %c0_i32_0 = arith.constant 0 : i32
    %c0_i32_1 = arith.constant 0 : i32
    return %c0_i32, %c0_i32_0 : i32, i32
  }
  func.func @transform_5(%arg0: i32) -> (i32, i32) {
    %c0_i32 = arith.constant 0 : i32
    %c0_i32_0 = arith.constant 0 : i32
    %c0_i32_1 = arith.constant 0 : i32
    return %c0_i32, %c0_i32_0 : i32, i32
  }
  func.func @transform_6(%arg0: i32) -> (i32, i32, i32) {
    %c0_i32 = arith.constant 0 : i32
    %c0_i32_0 = arith.constant 0 : i32
    %c0_i32_1 = arith.constant 0 : i32
    return %arg0, %c0_i32, %c0_i32_0 : i32, i32, i32
  }
  func.func @transform_7(%arg0: i32) -> (i32, i32, i32) {
    %c0_i32 = arith.constant 0 : i32
    %c0_i32_0 = arith.constant 0 : i32
    %c0_i32_1 = arith.constant 0 : i32
    return %arg0, %c0_i32, %c0_i32_0 : i32, i32, i32
  }
}

module attributes {stable_mosaic.version = 11 : i64} {
  func.func @_dec_layer_kernel(%arg0: i32, %arg1: memref<1x8x64xf32, #tpu.memory_space<vmem>>, %arg2: memref<1x16x64xf32, #tpu.memory_space<vmem>>, %arg3: memref<1x1x16xf32, #tpu.memory_space<vmem>>, %arg4: memref<1x64xf32, #tpu.memory_space<vmem>>, %arg5: memref<1x64xf32, #tpu.memory_space<vmem>>, %arg6: memref<64x192xf32, #tpu.memory_space<vmem>>, %arg7: memref<1x192xf32, #tpu.memory_space<vmem>>, %arg8: memref<64x64xf32, #tpu.memory_space<vmem>>, %arg9: memref<1x64xf32, #tpu.memory_space<vmem>>, %arg10: memref<1x64xf32, #tpu.memory_space<vmem>>, %arg11: memref<1x64xf32, #tpu.memory_space<vmem>>, %arg12: memref<64x64xf32, #tpu.memory_space<vmem>>, %arg13: memref<1x64xf32, #tpu.memory_space<vmem>>, %arg14: memref<64x128xf32, #tpu.memory_space<vmem>>, %arg15: memref<1x128xf32, #tpu.memory_space<vmem>>, %arg16: memref<64x64xf32, #tpu.memory_space<vmem>>, %arg17: memref<1x64xf32, #tpu.memory_space<vmem>>, %arg18: memref<1x64xf32, #tpu.memory_space<vmem>>, %arg19: memref<1x64xf32, #tpu.memory_space<vmem>>, %arg20: memref<64x128xf32, #tpu.memory_space<vmem>>, %arg21: memref<1x128xf32, #tpu.memory_space<vmem>>, %arg22: memref<128x64xf32, #tpu.memory_space<vmem>>, %arg23: memref<1x64xf32, #tpu.memory_space<vmem>>, %arg24: memref<1x8x64xf32, #tpu.memory_space<vmem>>) attributes {dimension_semantics = [#tpu.dimension_semantics<parallel>], iteration_bounds = array<i64: 2>, scalar_prefetch = 0 : i64, scratch_operands = 0 : i64, tpu.core_type = #tpu.core_type<tc>, window_params = [{transform_indices = @transform_0, window_bounds = array<i64: 1, 8, 64>}, {transform_indices = @transform_1, window_bounds = array<i64: 1, 16, 64>}, {transform_indices = @transform_2, window_bounds = array<i64: 1, 1, 16>}, {pipeline_mode = #tpu.pipeline_mode<synchronous>, transform_indices = @transform_3, window_bounds = array<i64: 1, 64>}, {pipeline_mode = #tpu.pipeline_mode<synchronous>, transform_indices = @transform_4, window_bounds = array<i64: 1, 64>}, {pipeline_mode = #tpu.pipeline_mode<synchronous>, transform_indices = @transform_5, window_bounds = array<i64: 64, 192>}, {pipeline_mode = #tpu.pipeline_mode<synchronous>, transform_indices = @transform_6, window_bounds = array<i64: 1, 192>}, {pipeline_mode = #tpu.pipeline_mode<synchronous>, transform_indices = @transform_7, window_bounds = array<i64: 64, 64>}, {pipeline_mode = #tpu.pipeline_mode<synchronous>, transform_indices = @transform_8, window_bounds = array<i64: 1, 64>}, {pipeline_mode = #tpu.pipeline_mode<synchronous>, transform_indices = @transform_9, window_bounds = array<i64: 1, 64>}, {pipeline_mode = #tpu.pipeline_mode<synchronous>, transform_indices = @transform_10, window_bounds = array<i64: 1, 64>}, {pipeline_mode = #tpu.pipeline_mode<synchronous>, transform_indices = @transform_11, window_bounds = array<i64: 64, 64>}, {pipeline_mode = #tpu.pipeline_mode<synchronous>, transform_indices = @transform_12, window_bounds = array<i64: 1, 64>}, {pipeline_mode = #tpu.pipeline_mode<synchronous>, transform_indices = @transform_13, window_bounds = array<i64: 64, 128>}, {pipeline_mode = #tpu.pipeline_mode<synchronous>, transform_indices = @transform_14, window_bounds = array<i64: 1, 128>}, {pipeline_mode = #tpu.pipeline_mode<synchronous>, transform_indices = @transform_15, window_bounds = array<i64: 64, 64>}, {pipeline_mode = #tpu.pipeline_mode<synchronous>, transform_indices = @transform_16, window_bounds = array<i64: 1, 64>}, {pipeline_mode = #tpu.pipeline_mode<synchronous>, transform_indices = @transform_17, window_bounds = array<i64: 1, 64>}, {pipeline_mode = #tpu.pipeline_mode<synchronous>, transform_indices = @transform_18, window_bounds = array<i64: 1, 64>}, {pipeline_mode = #tpu.pipeline_mode<synchronous>, transform_indices = @transform_19, window_bounds = array<i64: 64, 128>}, {pipeline_mode = #tpu.pipeline_mode<synchronous>, transform_indices = @transform_20, window_bounds = array<i64: 1, 128>}, {pipeline_mode = #tpu.pipeline_mode<synchronous>, transform_indices = @transform_21, window_bounds = array<i64: 128, 64>}, {pipeline_mode = #tpu.pipeline_mode<synchronous>, transform_indices = @transform_22, window_bounds = array<i64: 1, 64>}, {transform_indices = @transform_23, window_bounds = array<i64: 1, 8, 64>}]} {
    %c0 = arith.constant 0 : index
    %c0_0 = arith.constant 0 : index
    %c0_1 = arith.constant 0 : index
    %0 = vector.load %arg1[%c0, %c0_0, %c0_1] : memref<1x8x64xf32, #tpu.memory_space<vmem>>, vector<1x8x64xf32>
    %1 = vector.shape_cast %0 : vector<1x8x64xf32> to vector<8x64xf32>
    %c0_2 = arith.constant 0 : index
    %c0_3 = arith.constant 0 : index
    %c0_4 = arith.constant 0 : index
    %2 = vector.load %arg2[%c0_2, %c0_3, %c0_4] : memref<1x16x64xf32, #tpu.memory_space<vmem>>, vector<1x16x64xf32>
    %3 = vector.shape_cast %2 : vector<1x16x64xf32> to vector<16x64xf32>
    %4 = tpu.iota {dimensions = array<i32: 0>} : vector<8x8xi32>
    %5 = tpu.iota {dimensions = array<i32: 1>} : vector<8x8xi32>
    %6 = arith.cmpi sge, %4, %5 : vector<8x8xi32>
    %cst = arith.constant 0.000000e+00 : f32
    %cst_5 = arith.constant -1.000000e+09 : f32
    %7 = vector.broadcast %cst : f32 to vector<8x8xf32>
    %8 = vector.broadcast %cst_5 : f32 to vector<8x8xf32>
    %9 = arith.select %6, %7, %8 : vector<8x8xi1>, vector<8x8xf32>
    %c0_6 = arith.constant 0 : index
    %c0_7 = arith.constant 0 : index
    %c0_8 = arith.constant 0 : index
    %10 = vector.load %arg3[%c0_6, %c0_7, %c0_8] : memref<1x1x16xf32, #tpu.memory_space<vmem>>, vector<1x1x16xf32>
    %11 = vector.shape_cast %10 : vector<1x1x16xf32> to vector<1x16xf32>
    %cst_9 = arith.constant 1.000000e+00 : f32
    %12 = vector.broadcast %cst_9 : f32 to vector<1x16xf32>
    %13 = arith.subf %12, %11 : vector<1x16xf32>
    %cst_10 = arith.constant -1.000000e+09 : f32
    %14 = vector.broadcast %cst_10 : f32 to vector<1x16xf32>
    %15 = arith.mulf %13, %14 : vector<1x16xf32>
    %c0_11 = arith.constant 0 : index
    %c0_12 = arith.constant 0 : index
    %16 = vector.load %arg4[%c0_11, %c0_12] : memref<1x64xf32, #tpu.memory_space<vmem>>, vector<1x64xf32>
    %c0_13 = arith.constant 0 : index
    %c0_14 = arith.constant 0 : index
    %17 = vector.load %arg5[%c0_13, %c0_14] : memref<1x64xf32, #tpu.memory_space<vmem>>, vector<1x64xf32>
    %cst_15 = arith.constant dense<0.000000e+00> : vector<8xf32>
    %18 = vector.multi_reduction <add>, %1, %cst_15 [1] : vector<8x64xf32> to vector<8xf32>
    %19 = vector.shape_cast %18 : vector<8xf32> to vector<8x1xf32>
    %cst_16 = arith.constant 6.400000e+01 : f32
    %20 = vector.broadcast %cst_16 : f32 to vector<8x1xf32>
    %21 = arith.divf %19, %20 : vector<8x1xf32>
    %22 = vector.broadcast %21 : vector<8x1xf32> to vector<8x64xf32>
    %23 = arith.subf %1, %22 : vector<8x64xf32>
    %24 = arith.mulf %23, %23 : vector<8x64xf32>
    %cst_17 = arith.constant dense<0.000000e+00> : vector<8xf32>
    %25 = vector.multi_reduction <add>, %24, %cst_17 [1] : vector<8x64xf32> to vector<8xf32>
    %26 = vector.shape_cast %25 : vector<8xf32> to vector<8x1xf32>
    %cst_18 = arith.constant 6.400000e+01 : f32
    %27 = vector.broadcast %cst_18 : f32 to vector<8x1xf32>
    %28 = arith.divf %26, %27 : vector<8x1xf32>
    %29 = vector.broadcast %21 : vector<8x1xf32> to vector<8x64xf32>
    %30 = arith.subf %1, %29 : vector<8x64xf32>
    %cst_19 = arith.constant 9.99999974E-6 : f32
    %31 = vector.broadcast %cst_19 : f32 to vector<8x1xf32>
    %32 = arith.addf %28, %31 : vector<8x1xf32>
    %33 = math.rsqrt %32 : vector<8x1xf32>
    %34 = vector.broadcast %33 : vector<8x1xf32> to vector<8x64xf32>
    %35 = arith.mulf %30, %34 : vector<8x64xf32>
    %36 = vector.broadcast %16 : vector<1x64xf32> to vector<8x64xf32>
    %37 = arith.mulf %35, %36 : vector<8x64xf32>
    %38 = vector.broadcast %17 : vector<1x64xf32> to vector<8x64xf32>
    %39 = arith.addf %37, %38 : vector<8x64xf32>
    %c0_20 = arith.constant 0 : index
    %c0_21 = arith.constant 0 : index
    %40 = vector.load %arg6[%c0_20, %c0_21] : memref<64x192xf32, #tpu.memory_space<vmem>>, vector<64x192xf32>
    %cst_22 = arith.constant dense<0.000000e+00> : vector<8x192xf32>
    %41 = tpu.matmul %39, %40, %cst_22 {dimension_numbers = #tpu.dot_dimension_numbers<[1], [0], [0], [1], [0, 0, 1, 1], [], []>} : vector<8x64xf32>, vector<64x192xf32>, vector<8x192xf32> -> vector<8x192xf32>
    %c0_23 = arith.constant 0 : index
    %c0_24 = arith.constant 0 : index
    %42 = vector.load %arg7[%c0_23, %c0_24] : memref<1x192xf32, #tpu.memory_space<vmem>>, vector<1x192xf32>
    %43 = vector.broadcast %42 : vector<1x192xf32> to vector<8x192xf32>
    %44 = arith.addf %41, %43 : vector<8x192xf32>
    %45 = vector.extract_strided_slice %44 {offsets = [0, 0], sizes = [8, 64], strides = [1, 1]} : vector<8x192xf32> to vector<8x64xf32>
    %46 = vector.extract_strided_slice %44 {offsets = [0, 64], sizes = [8, 64], strides = [1, 1]} : vector<8x192xf32> to vector<8x64xf32>
    %47 = vector.extract_strided_slice %44 {offsets = [0, 128], sizes = [8, 64], strides = [1, 1]} : vector<8x192xf32> to vector<8x64xf32>
    %c0_25 = arith.constant 0 : index
    %c0_26 = arith.constant 0 : index
    %48 = vector.load %arg8[%c0_25, %c0_26] : memref<64x64xf32, #tpu.memory_space<vmem>>, vector<64x64xf32>
    %c0_27 = arith.constant 0 : index
    %c0_28 = arith.constant 0 : index
    %49 = vector.load %arg9[%c0_27, %c0_28] : memref<1x64xf32, #tpu.memory_space<vmem>>, vector<1x64xf32>
    %50 = vector.extract_strided_slice %45 {offsets = [0, 0], sizes = [8, 32], strides = [1, 1]} : vector<8x64xf32> to vector<8x32xf32>
    %cst_29 = arith.constant 0.176776692 : f32
    %51 = vector.broadcast %cst_29 : f32 to vector<8x32xf32>
    %52 = arith.mulf %50, %51 : vector<8x32xf32>
    %53 = vector.extract_strided_slice %46 {offsets = [0, 0], sizes = [8, 32], strides = [1, 1]} : vector<8x64xf32> to vector<8x32xf32>
    %54 = vector.extract_strided_slice %47 {offsets = [0, 0], sizes = [8, 32], strides = [1, 1]} : vector<8x64xf32> to vector<8x32xf32>
    %cst_30 = arith.constant dense<0.000000e+00> : vector<8x8xf32>
    %55 = tpu.matmul %52, %53, %cst_30 {dimension_numbers = #tpu.dot_dimension_numbers<[1], [1], [0], [0], [0, 0, 1, 0], [], []>} : vector<8x32xf32>, vector<8x32xf32>, vector<8x8xf32> -> vector<8x8xf32>
    %56 = arith.addf %55, %9 : vector<8x8xf32>
    %cst_31 = arith.constant dense<0xFF800000> : vector<8xf32>
    %57 = vector.multi_reduction <maximumf>, %56, %cst_31 [1] : vector<8x8xf32> to vector<8xf32>
    %58 = vector.shape_cast %57 : vector<8xf32> to vector<8x1xf32>
    %59 = vector.broadcast %58 : vector<8x1xf32> to vector<8x8xf32>
    %60 = arith.subf %56, %59 : vector<8x8xf32>
    %61 = math.exp %60 : vector<8x8xf32>
    %cst_32 = arith.constant dense<0.000000e+00> : vector<8xf32>
    %62 = vector.multi_reduction <add>, %61, %cst_32 [1] : vector<8x8xf32> to vector<8xf32>
    %63 = vector.shape_cast %62 : vector<8xf32> to vector<8x1xf32>
    %64 = tpu.reciprocal %63 {approx = true} : vector<8x1xf32> -> vector<8x1xf32>
    %65 = vector.broadcast %64 : vector<8x1xf32> to vector<8x8xf32>
    %66 = arith.mulf %61, %65 : vector<8x8xf32>
    %cst_33 = arith.constant dense<0.000000e+00> : vector<8x32xf32>
    %67 = tpu.matmul %66, %54, %cst_33 {dimension_numbers = #tpu.dot_dimension_numbers<[1], [0], [0], [1], [0, 0, 1, 1], [], []>} : vector<8x8xf32>, vector<8x32xf32>, vector<8x32xf32> -> vector<8x32xf32>
    %68 = vector.extract_strided_slice %45 {offsets = [0, 32], sizes = [8, 32], strides = [1, 1]} : vector<8x64xf32> to vector<8x32xf32>
    %cst_34 = arith.constant 0.176776692 : f32
    %69 = vector.broadcast %cst_34 : f32 to vector<8x32xf32>
    %70 = arith.mulf %68, %69 : vector<8x32xf32>
    %71 = vector.extract_strided_slice %46 {offsets = [0, 32], sizes = [8, 32], strides = [1, 1]} : vector<8x64xf32> to vector<8x32xf32>
    %72 = vector.extract_strided_slice %47 {offsets = [0, 32], sizes = [8, 32], strides = [1, 1]} : vector<8x64xf32> to vector<8x32xf32>
    %cst_35 = arith.constant dense<0.000000e+00> : vector<8x8xf32>
    %73 = tpu.matmul %70, %71, %cst_35 {dimension_numbers = #tpu.dot_dimension_numbers<[1], [1], [0], [0], [0, 0, 1, 0], [], []>} : vector<8x32xf32>, vector<8x32xf32>, vector<8x8xf32> -> vector<8x8xf32>
    %74 = arith.addf %73, %9 : vector<8x8xf32>
    %cst_36 = arith.constant dense<0xFF800000> : vector<8xf32>
    %75 = vector.multi_reduction <maximumf>, %74, %cst_36 [1] : vector<8x8xf32> to vector<8xf32>
    %76 = vector.shape_cast %75 : vector<8xf32> to vector<8x1xf32>
    %77 = vector.broadcast %76 : vector<8x1xf32> to vector<8x8xf32>
    %78 = arith.subf %74, %77 : vector<8x8xf32>
    %79 = math.exp %78 : vector<8x8xf32>
    %cst_37 = arith.constant dense<0.000000e+00> : vector<8xf32>
    %80 = vector.multi_reduction <add>, %79, %cst_37 [1] : vector<8x8xf32> to vector<8xf32>
    %81 = vector.shape_cast %80 : vector<8xf32> to vector<8x1xf32>
    %82 = tpu.reciprocal %81 {approx = true} : vector<8x1xf32> -> vector<8x1xf32>
    %83 = vector.broadcast %82 : vector<8x1xf32> to vector<8x8xf32>
    %84 = arith.mulf %79, %83 : vector<8x8xf32>
    %cst_38 = arith.constant dense<0.000000e+00> : vector<8x32xf32>
    %85 = tpu.matmul %84, %72, %cst_38 {dimension_numbers = #tpu.dot_dimension_numbers<[1], [0], [0], [1], [0, 0, 1, 1], [], []>} : vector<8x8xf32>, vector<8x32xf32>, vector<8x32xf32> -> vector<8x32xf32>
    %86 = tpu.concatenate %67, %85 in 1 : vector<8x32xf32>, vector<8x32xf32> -> vector<8x64xf32>
    %cst_39 = arith.constant dense<0.000000e+00> : vector<8x64xf32>
    %87 = tpu.matmul %86, %48, %cst_39 {dimension_numbers = #tpu.dot_dimension_numbers<[1], [0], [0], [1], [0, 0, 1, 1], [], []>} : vector<8x64xf32>, vector<64x64xf32>, vector<8x64xf32> -> vector<8x64xf32>
    %88 = vector.broadcast %49 : vector<1x64xf32> to vector<8x64xf32>
    %89 = arith.addf %87, %88 : vector<8x64xf32>
    %90 = arith.addf %1, %89 : vector<8x64xf32>
    %c0_40 = arith.constant 0 : index
    %c0_41 = arith.constant 0 : index
    %91 = vector.load %arg10[%c0_40, %c0_41] : memref<1x64xf32, #tpu.memory_space<vmem>>, vector<1x64xf32>
    %c0_42 = arith.constant 0 : index
    %c0_43 = arith.constant 0 : index
    %92 = vector.load %arg11[%c0_42, %c0_43] : memref<1x64xf32, #tpu.memory_space<vmem>>, vector<1x64xf32>
    %cst_44 = arith.constant dense<0.000000e+00> : vector<8xf32>
    %93 = vector.multi_reduction <add>, %90, %cst_44 [1] : vector<8x64xf32> to vector<8xf32>
    %94 = vector.shape_cast %93 : vector<8xf32> to vector<8x1xf32>
    %cst_45 = arith.constant 6.400000e+01 : f32
    %95 = vector.broadcast %cst_45 : f32 to vector<8x1xf32>
    %96 = arith.divf %94, %95 : vector<8x1xf32>
    %97 = vector.broadcast %96 : vector<8x1xf32> to vector<8x64xf32>
    %98 = arith.subf %90, %97 : vector<8x64xf32>
    %99 = arith.mulf %98, %98 : vector<8x64xf32>
    %cst_46 = arith.constant dense<0.000000e+00> : vector<8xf32>
    %100 = vector.multi_reduction <add>, %99, %cst_46 [1] : vector<8x64xf32> to vector<8xf32>
    %101 = vector.shape_cast %100 : vector<8xf32> to vector<8x1xf32>
    %cst_47 = arith.constant 6.400000e+01 : f32
    %102 = vector.broadcast %cst_47 : f32 to vector<8x1xf32>
    %103 = arith.divf %101, %102 : vector<8x1xf32>
    %104 = vector.broadcast %96 : vector<8x1xf32> to vector<8x64xf32>
    %105 = arith.subf %90, %104 : vector<8x64xf32>
    %cst_48 = arith.constant 9.99999974E-6 : f32
    %106 = vector.broadcast %cst_48 : f32 to vector<8x1xf32>
    %107 = arith.addf %103, %106 : vector<8x1xf32>
    %108 = math.rsqrt %107 : vector<8x1xf32>
    %109 = vector.broadcast %108 : vector<8x1xf32> to vector<8x64xf32>
    %110 = arith.mulf %105, %109 : vector<8x64xf32>
    %111 = vector.broadcast %91 : vector<1x64xf32> to vector<8x64xf32>
    %112 = arith.mulf %110, %111 : vector<8x64xf32>
    %113 = vector.broadcast %92 : vector<1x64xf32> to vector<8x64xf32>
    %114 = arith.addf %112, %113 : vector<8x64xf32>
    %c0_49 = arith.constant 0 : index
    %c0_50 = arith.constant 0 : index
    %115 = vector.load %arg12[%c0_49, %c0_50] : memref<64x64xf32, #tpu.memory_space<vmem>>, vector<64x64xf32>
    %cst_51 = arith.constant dense<0.000000e+00> : vector<8x64xf32>
    %116 = tpu.matmul %114, %115, %cst_51 {dimension_numbers = #tpu.dot_dimension_numbers<[1], [0], [0], [1], [0, 0, 1, 1], [], []>} : vector<8x64xf32>, vector<64x64xf32>, vector<8x64xf32> -> vector<8x64xf32>
    %c0_52 = arith.constant 0 : index
    %c0_53 = arith.constant 0 : index
    %117 = vector.load %arg13[%c0_52, %c0_53] : memref<1x64xf32, #tpu.memory_space<vmem>>, vector<1x64xf32>
    %118 = vector.broadcast %117 : vector<1x64xf32> to vector<8x64xf32>
    %119 = arith.addf %116, %118 : vector<8x64xf32>
    %c0_54 = arith.constant 0 : index
    %c0_55 = arith.constant 0 : index
    %120 = vector.load %arg14[%c0_54, %c0_55] : memref<64x128xf32, #tpu.memory_space<vmem>>, vector<64x128xf32>
    %cst_56 = arith.constant dense<0.000000e+00> : vector<16x128xf32>
    %121 = tpu.matmul %3, %120, %cst_56 {dimension_numbers = #tpu.dot_dimension_numbers<[1], [0], [0], [1], [0, 0, 1, 1], [], []>} : vector<16x64xf32>, vector<64x128xf32>, vector<16x128xf32> -> vector<16x128xf32>
    %c0_57 = arith.constant 0 : index
    %c0_58 = arith.constant 0 : index
    %122 = vector.load %arg15[%c0_57, %c0_58] : memref<1x128xf32, #tpu.memory_space<vmem>>, vector<1x128xf32>
    %123 = vector.broadcast %122 : vector<1x128xf32> to vector<16x128xf32>
    %124 = arith.addf %121, %123 : vector<16x128xf32>
    %125 = vector.extract_strided_slice %124 {offsets = [0, 0], sizes = [16, 64], strides = [1, 1]} : vector<16x128xf32> to vector<16x64xf32>
    %126 = vector.extract_strided_slice %124 {offsets = [0, 64], sizes = [16, 64], strides = [1, 1]} : vector<16x128xf32> to vector<16x64xf32>
    %c0_59 = arith.constant 0 : index
    %c0_60 = arith.constant 0 : index
    %127 = vector.load %arg16[%c0_59, %c0_60] : memref<64x64xf32, #tpu.memory_space<vmem>>, vector<64x64xf32>
    %c0_61 = arith.constant 0 : index
    %c0_62 = arith.constant 0 : index
    %128 = vector.load %arg17[%c0_61, %c0_62] : memref<1x64xf32, #tpu.memory_space<vmem>>, vector<1x64xf32>
    %129 = vector.extract_strided_slice %119 {offsets = [0, 0], sizes = [8, 32], strides = [1, 1]} : vector<8x64xf32> to vector<8x32xf32>
    %cst_63 = arith.constant 0.176776692 : f32
    %130 = vector.broadcast %cst_63 : f32 to vector<8x32xf32>
    %131 = arith.mulf %129, %130 : vector<8x32xf32>
    %132 = vector.extract_strided_slice %125 {offsets = [0, 0], sizes = [16, 32], strides = [1, 1]} : vector<16x64xf32> to vector<16x32xf32>
    %133 = vector.extract_strided_slice %126 {offsets = [0, 0], sizes = [16, 32], strides = [1, 1]} : vector<16x64xf32> to vector<16x32xf32>
    %cst_64 = arith.constant dense<0.000000e+00> : vector<8x16xf32>
    %134 = tpu.matmul %131, %132, %cst_64 {dimension_numbers = #tpu.dot_dimension_numbers<[1], [1], [0], [0], [0, 0, 1, 0], [], []>} : vector<8x32xf32>, vector<16x32xf32>, vector<8x16xf32> -> vector<8x16xf32>
    %135 = vector.broadcast %15 : vector<1x16xf32> to vector<8x16xf32>
    %136 = arith.addf %134, %135 : vector<8x16xf32>
    %cst_65 = arith.constant dense<0xFF800000> : vector<8xf32>
    %137 = vector.multi_reduction <maximumf>, %136, %cst_65 [1] : vector<8x16xf32> to vector<8xf32>
    %138 = vector.shape_cast %137 : vector<8xf32> to vector<8x1xf32>
    %139 = vector.broadcast %138 : vector<8x1xf32> to vector<8x16xf32>
    %140 = arith.subf %136, %139 : vector<8x16xf32>
    %141 = math.exp %140 : vector<8x16xf32>
    %cst_66 = arith.constant dense<0.000000e+00> : vector<8xf32>
    %142 = vector.multi_reduction <add>, %141, %cst_66 [1] : vector<8x16xf32> to vector<8xf32>
    %143 = vector.shape_cast %142 : vector<8xf32> to vector<8x1xf32>
    %144 = tpu.reciprocal %143 {approx = true} : vector<8x1xf32> -> vector<8x1xf32>
    %145 = vector.broadcast %144 : vector<8x1xf32> to vector<8x16xf32>
    %146 = arith.mulf %141, %145 : vector<8x16xf32>
    %cst_67 = arith.constant dense<0.000000e+00> : vector<8x32xf32>
    %147 = tpu.matmul %146, %133, %cst_67 {dimension_numbers = #tpu.dot_dimension_numbers<[1], [0], [0], [1], [0, 0, 1, 1], [], []>} : vector<8x16xf32>, vector<16x32xf32>, vector<8x32xf32> -> vector<8x32xf32>
    %148 = vector.extract_strided_slice %119 {offsets = [0, 32], sizes = [8, 32], strides = [1, 1]} : vector<8x64xf32> to vector<8x32xf32>
    %cst_68 = arith.constant 0.176776692 : f32
    %149 = vector.broadcast %cst_68 : f32 to vector<8x32xf32>
    %150 = arith.mulf %148, %149 : vector<8x32xf32>
    %151 = vector.extract_strided_slice %125 {offsets = [0, 32], sizes = [16, 32], strides = [1, 1]} : vector<16x64xf32> to vector<16x32xf32>
    %152 = vector.extract_strided_slice %126 {offsets = [0, 32], sizes = [16, 32], strides = [1, 1]} : vector<16x64xf32> to vector<16x32xf32>
    %cst_69 = arith.constant dense<0.000000e+00> : vector<8x16xf32>
    %153 = tpu.matmul %150, %151, %cst_69 {dimension_numbers = #tpu.dot_dimension_numbers<[1], [1], [0], [0], [0, 0, 1, 0], [], []>} : vector<8x32xf32>, vector<16x32xf32>, vector<8x16xf32> -> vector<8x16xf32>
    %154 = vector.broadcast %15 : vector<1x16xf32> to vector<8x16xf32>
    %155 = arith.addf %153, %154 : vector<8x16xf32>
    %cst_70 = arith.constant dense<0xFF800000> : vector<8xf32>
    %156 = vector.multi_reduction <maximumf>, %155, %cst_70 [1] : vector<8x16xf32> to vector<8xf32>
    %157 = vector.shape_cast %156 : vector<8xf32> to vector<8x1xf32>
    %158 = vector.broadcast %157 : vector<8x1xf32> to vector<8x16xf32>
    %159 = arith.subf %155, %158 : vector<8x16xf32>
    %160 = math.exp %159 : vector<8x16xf32>
    %cst_71 = arith.constant dense<0.000000e+00> : vector<8xf32>
    %161 = vector.multi_reduction <add>, %160, %cst_71 [1] : vector<8x16xf32> to vector<8xf32>
    %162 = vector.shape_cast %161 : vector<8xf32> to vector<8x1xf32>
    %163 = tpu.reciprocal %162 {approx = true} : vector<8x1xf32> -> vector<8x1xf32>
    %164 = vector.broadcast %163 : vector<8x1xf32> to vector<8x16xf32>
    %165 = arith.mulf %160, %164 : vector<8x16xf32>
    %cst_72 = arith.constant dense<0.000000e+00> : vector<8x32xf32>
    %166 = tpu.matmul %165, %152, %cst_72 {dimension_numbers = #tpu.dot_dimension_numbers<[1], [0], [0], [1], [0, 0, 1, 1], [], []>} : vector<8x16xf32>, vector<16x32xf32>, vector<8x32xf32> -> vector<8x32xf32>
    %167 = tpu.concatenate %147, %166 in 1 : vector<8x32xf32>, vector<8x32xf32> -> vector<8x64xf32>
    %cst_73 = arith.constant dense<0.000000e+00> : vector<8x64xf32>
    %168 = tpu.matmul %167, %127, %cst_73 {dimension_numbers = #tpu.dot_dimension_numbers<[1], [0], [0], [1], [0, 0, 1, 1], [], []>} : vector<8x64xf32>, vector<64x64xf32>, vector<8x64xf32> -> vector<8x64xf32>
    %169 = vector.broadcast %128 : vector<1x64xf32> to vector<8x64xf32>
    %170 = arith.addf %168, %169 : vector<8x64xf32>
    %171 = arith.addf %90, %170 : vector<8x64xf32>
    %c0_74 = arith.constant 0 : index
    %c0_75 = arith.constant 0 : index
    %172 = vector.load %arg18[%c0_74, %c0_75] : memref<1x64xf32, #tpu.memory_space<vmem>>, vector<1x64xf32>
    %c0_76 = arith.constant 0 : index
    %c0_77 = arith.constant 0 : index
    %173 = vector.load %arg19[%c0_76, %c0_77] : memref<1x64xf32, #tpu.memory_space<vmem>>, vector<1x64xf32>
    %cst_78 = arith.constant dense<0.000000e+00> : vector<8xf32>
    %174 = vector.multi_reduction <add>, %171, %cst_78 [1] : vector<8x64xf32> to vector<8xf32>
    %175 = vector.shape_cast %174 : vector<8xf32> to vector<8x1xf32>
    %cst_79 = arith.constant 6.400000e+01 : f32
    %176 = vector.broadcast %cst_79 : f32 to vector<8x1xf32>
    %177 = arith.divf %175, %176 : vector<8x1xf32>
    %178 = vector.broadcast %177 : vector<8x1xf32> to vector<8x64xf32>
    %179 = arith.subf %171, %178 : vector<8x64xf32>
    %180 = arith.mulf %179, %179 : vector<8x64xf32>
    %cst_80 = arith.constant dense<0.000000e+00> : vector<8xf32>
    %181 = vector.multi_reduction <add>, %180, %cst_80 [1] : vector<8x64xf32> to vector<8xf32>
    %182 = vector.shape_cast %181 : vector<8xf32> to vector<8x1xf32>
    %cst_81 = arith.constant 6.400000e+01 : f32
    %183 = vector.broadcast %cst_81 : f32 to vector<8x1xf32>
    %184 = arith.divf %182, %183 : vector<8x1xf32>
    %185 = vector.broadcast %177 : vector<8x1xf32> to vector<8x64xf32>
    %186 = arith.subf %171, %185 : vector<8x64xf32>
    %cst_82 = arith.constant 9.99999974E-6 : f32
    %187 = vector.broadcast %cst_82 : f32 to vector<8x1xf32>
    %188 = arith.addf %184, %187 : vector<8x1xf32>
    %189 = math.rsqrt %188 : vector<8x1xf32>
    %190 = vector.broadcast %189 : vector<8x1xf32> to vector<8x64xf32>
    %191 = arith.mulf %186, %190 : vector<8x64xf32>
    %192 = vector.broadcast %172 : vector<1x64xf32> to vector<8x64xf32>
    %193 = arith.mulf %191, %192 : vector<8x64xf32>
    %194 = vector.broadcast %173 : vector<1x64xf32> to vector<8x64xf32>
    %195 = arith.addf %193, %194 : vector<8x64xf32>
    %c0_83 = arith.constant 0 : index
    %c0_84 = arith.constant 0 : index
    %196 = vector.load %arg20[%c0_83, %c0_84] : memref<64x128xf32, #tpu.memory_space<vmem>>, vector<64x128xf32>
    %cst_85 = arith.constant dense<0.000000e+00> : vector<8x128xf32>
    %197 = tpu.matmul %195, %196, %cst_85 {dimension_numbers = #tpu.dot_dimension_numbers<[1], [0], [0], [1], [0, 0, 1, 1], [], []>} : vector<8x64xf32>, vector<64x128xf32>, vector<8x128xf32> -> vector<8x128xf32>
    %c0_86 = arith.constant 0 : index
    %c0_87 = arith.constant 0 : index
    %198 = vector.load %arg21[%c0_86, %c0_87] : memref<1x128xf32, #tpu.memory_space<vmem>>, vector<1x128xf32>
    %199 = vector.broadcast %198 : vector<1x128xf32> to vector<8x128xf32>
    %200 = arith.addf %197, %199 : vector<8x128xf32>
    %cst_88 = arith.constant 5.000000e-01 : f32
    %201 = vector.broadcast %cst_88 : f32 to vector<8x128xf32>
    %202 = arith.mulf %201, %200 : vector<8x128xf32>
    %cst_89 = arith.constant 4.471500e-02 : f32
    %203 = vector.broadcast %cst_89 : f32 to vector<8x128xf32>
    %204 = arith.mulf %203, %200 : vector<8x128xf32>
    %205 = arith.mulf %204, %200 : vector<8x128xf32>
    %206 = arith.mulf %205, %200 : vector<8x128xf32>
    %207 = arith.addf %200, %206 : vector<8x128xf32>
    %cst_90 = arith.constant 0.797884583 : f32
    %208 = vector.broadcast %cst_90 : f32 to vector<8x128xf32>
    %209 = arith.mulf %208, %207 : vector<8x128xf32>
    %210 = math.tanh %209 : vector<8x128xf32>
    %cst_91 = arith.constant 1.000000e+00 : f32
    %211 = vector.broadcast %cst_91 : f32 to vector<8x128xf32>
    %212 = arith.addf %211, %210 : vector<8x128xf32>
    %213 = arith.mulf %202, %212 : vector<8x128xf32>
    %c0_92 = arith.constant 0 : index
    %c0_93 = arith.constant 0 : index
    %214 = vector.load %arg22[%c0_92, %c0_93] : memref<128x64xf32, #tpu.memory_space<vmem>>, vector<128x64xf32>
    %cst_94 = arith.constant dense<0.000000e+00> : vector<8x64xf32>
    %215 = tpu.matmul %213, %214, %cst_94 {dimension_numbers = #tpu.dot_dimension_numbers<[1], [0], [0], [1], [0, 0, 1, 1], [], []>} : vector<8x128xf32>, vector<128x64xf32>, vector<8x64xf32> -> vector<8x64xf32>
    %c0_95 = arith.constant 0 : index
    %c0_96 = arith.constant 0 : index
    %216 = vector.load %arg23[%c0_95, %c0_96] : memref<1x64xf32, #tpu.memory_space<vmem>>, vector<1x64xf32>
    %217 = vector.broadcast %216 : vector<1x64xf32> to vector<8x64xf32>
    %218 = arith.addf %215, %217 : vector<8x64xf32>
    %219 = arith.addf %171, %218 : vector<8x64xf32>
    %c0_97 = arith.constant 0 : index
    %c0_98 = arith.constant 0 : index
    %c0_99 = arith.constant 0 : index
    %220 = vector.load %arg24[%c0_97, %c0_98, %c0_99] : memref<1x8x64xf32, #tpu.memory_space<vmem>>, vector<1x8x64xf32>
    %221 = vector.shape_cast %220 : vector<1x8x64xf32> to vector<8x64xf32>
    %222 = vector.shape_cast %219 : vector<8x64xf32> to vector<1x8x64xf32>
    tpu.vector_store %arg24[%c0_97, %c0_98, %c0_99], %222 {strides = array<i32>} : memref<1x8x64xf32, #tpu.memory_space<vmem>>, vector<1x8x64xf32>,
    return
  }
  func.func @transform_0(%arg0: i32) -> (i32, i32, i32) {
    %c0_i32 = arith.constant 0 : i32
    %c0_i32_0 = arith.constant 0 : i32
    %c0_i32_1 = arith.constant 0 : i32
    return %arg0, %c0_i32, %c0_i32_0 : i32, i32, i32
  }
  func.func @transform_1(%arg0: i32) -> (i32, i32, i32) {
    %c0_i32 = arith.constant 0 : i32
    %c0_i32_0 = arith.constant 0 : i32
    %c0_i32_1 = arith.constant 0 : i32
    return %arg0, %c0_i32, %c0_i32_0 : i32, i32, i32
  }
  func.func @transform_2(%arg0: i32) -> (i32, i32, i32) {
    %c0_i32 = arith.constant 0 : i32
    %c0_i32_0 = arith.constant 0 : i32
    %c0_i32_1 = arith.constant 0 : i32
    return %arg0, %c0_i32, %c0_i32_0 : i32, i32, i32
  }
  func.func @transform_3(%arg0: i32) -> (i32, i32) {
    %c0_i32 = arith.constant 0 : i32
    %c0_i32_0 = arith.constant 0 : i32
    %c0_i32_1 = arith.constant 0 : i32
    return %c0_i32, %c0_i32_0 : i32, i32
  }
  func.func @transform_4(%arg0: i32) -> (i32, i32) {
    %c0_i32 = arith.constant 0 : i32
    %c0_i32_0 = arith.constant 0 : i32
    %c0_i32_1 = arith.constant 0 : i32
    return %c0_i32, %c0_i32_0 : i32, i32
  }
  func.func @transform_5(%arg0: i32) -> (i32, i32) {
    %c0_i32 = arith.constant 0 : i32
    %c0_i32_0 = arith.constant 0 : i32
    %c0_i32_1 = arith.constant 0 : i32
    return %c0_i32, %c0_i32_0 : i32, i32
  }
  func.func @transform_6(%arg0: i32) -> (i32, i32) {
    %c0_i32 = arith.constant 0 : i32
    %c0_i32_0 = arith.constant 0 : i32
    %c0_i32_1 = arith.constant 0 : i32
    return %c0_i32, %c0_i32_0 : i32, i32
  }
  func.func @transform_7(%arg0: i32) -> (i32, i32) {
    %c0_i32 = arith.constant 0 : i32
    %c0_i32_0 = arith.constant 0 : i32
    %c0_i32_1 = arith.constant 0 : i32
    return %c0_i32, %c0_i32_0 : i32, i32
  }
  func.func @transform_8(%arg0: i32) -> (i32, i32) {
    %c0_i32 = arith.constant 0 : i32
    %c0_i32_0 = arith.constant 0 : i32
    %c0_i32_1 = arith.constant 0 : i32
    return %c0_i32, %c0_i32_0 : i32, i32
  }
  func.func @transform_9(%arg0: i32) -> (i32, i32) {
    %c0_i32 = arith.constant 0 : i32
    %c0_i32_0 = arith.constant 0 : i32
    %c0_i32_1 = arith.constant 0 : i32
    return %c0_i32, %c0_i32_0 : i32, i32
  }
  func.func @transform_10(%arg0: i32) -> (i32, i32) {
    %c0_i32 = arith.constant 0 : i32
    %c0_i32_0 = arith.constant 0 : i32
    %c0_i32_1 = arith.constant 0 : i32
    return %c0_i32, %c0_i32_0 : i32, i32
  }
  func.func @transform_11(%arg0: i32) -> (i32, i32) {
    %c0_i32 = arith.constant 0 : i32
    %c0_i32_0 = arith.constant 0 : i32
    %c0_i32_1 = arith.constant 0 : i32
    return %c0_i32, %c0_i32_0 : i32, i32
  }
  func.func @transform_12(%arg0: i32) -> (i32, i32) {
    %c0_i32 = arith.constant 0 : i32
    %c0_i32_0 = arith.constant 0 : i32
    %c0_i32_1 = arith.constant 0 : i32
    return %c0_i32, %c0_i32_0 : i32, i32
  }
  func.func @transform_13(%arg0: i32) -> (i32, i32) {
    %c0_i32 = arith.constant 0 : i32
    %c0_i32_0 = arith.constant 0 : i32
    %c0_i32_1 = arith.constant 0 : i32
    return %c0_i32, %c0_i32_0 : i32, i32
  }
  func.func @transform_14(%arg0: i32) -> (i32, i32) {
    %c0_i32 = arith.constant 0 : i32
    %c0_i32_0 = arith.constant 0 : i32
    %c0_i32_1 = arith.constant 0 : i32
    return %c0_i32, %c0_i32_0 : i32, i32
  }
  func.func @transform_15(%arg0: i32) -> (i32, i32) {
    %c0_i32 = arith.constant 0 : i32
    %c0_i32_0 = arith.constant 0 : i32
    %c0_i32_1 = arith.constant 0 : i32
    return %c0_i32, %c0_i32_0 : i32, i32
  }
  func.func @transform_16(%arg0: i32) -> (i32, i32) {
    %c0_i32 = arith.constant 0 : i32
    %c0_i32_0 = arith.constant 0 : i32
    %c0_i32_1 = arith.constant 0 : i32
    return %c0_i32, %c0_i32_0 : i32, i32
  }
  func.func @transform_17(%arg0: i32) -> (i32, i32) {
    %c0_i32 = arith.constant 0 : i32
    %c0_i32_0 = arith.constant 0 : i32
    %c0_i32_1 = arith.constant 0 : i32
    return %c0_i32, %c0_i32_0 : i32, i32
  }
  func.func @transform_18(%arg0: i32) -> (i32, i32) {
    %c0_i32 = arith.constant 0 : i32
    %c0_i32_0 = arith.constant 0 : i32
    %c0_i32_1 = arith.constant 0 : i32
    return %c0_i32, %c0_i32_0 : i32, i32
  }
  func.func @transform_19(%arg0: i32) -> (i32, i32) {
    %c0_i32 = arith.constant 0 : i32
    %c0_i32_0 = arith.constant 0 : i32
    %c0_i32_1 = arith.constant 0 : i32
    return %c0_i32, %c0_i32_0 : i32, i32
  }
  func.func @transform_20(%arg0: i32) -> (i32, i32) {
    %c0_i32 = arith.constant 0 : i32
    %c0_i32_0 = arith.constant 0 : i32
    %c0_i32_1 = arith.constant 0 : i32
    return %c0_i32, %c0_i32_0 : i32, i32
  }
  func.func @transform_21(%arg0: i32) -> (i32, i32) {
    %c0_i32 = arith.constant 0 : i32
    %c0_i32_0 = arith.constant 0 : i32
    %c0_i32_1 = arith.constant 0 : i32
    return %c0_i32, %c0_i32_0 : i32, i32
  }
  func.func @transform_22(%arg0: i32) -> (i32, i32) {
    %c0_i32 = arith.constant 0 : i32
    %c0_i32_0 = arith.constant 0 : i32
    %c0_i32_1 = arith.constant 0 : i32
    return %c0_i32, %c0_i32_0 : i32, i32
  }
  func.func @transform_23(%arg0: i32) -> (i32, i32, i32) {
    %c0_i32 = arith.constant 0 : i32
    %c0_i32_0 = arith.constant 0 : i32
    %c0_i32_1 = arith.constant 0 : i32
    return %arg0, %c0_i32, %c0_i32_0 : i32, i32, i32
  }
}

</mosaic_0001>

<bundles_post_ra>
// kernel: forward.9
= control target key start
LH: loop header
LB: loop body
LE: loop exit
PB: predicated region body
PF: predicated region fallthrough
CT: control target
= control target key end

     0   :  { %13 = vsyncpa [#allocation3], 0  ;;  %s1247_s0 = inlined_call_operand.vmem [shape: f32[2,8,64], index: 0, kind: input, shape index: {}]   ;;  %s1248_s1 = inlined_call_operand.vmem [shape: s32[2,8,1], index: 1, kind: input, shape index: {}]   ;;  %s1249_s2 = inlined_call_operand.vmem [shape: f32[1,64], index: 2, kind: input, shape index: {}]   ;;  %s1250_s3 = inlined_call_operand.vmem [shape: f32[1,64], index: 3, kind: input, shape index: {}]   ;;  %s1251_s4 = inlined_call_operand.vmem [shape: f32[256,64], index: 4, kind: input, shape index: {}]   ;;  %s1252_s5 = inlined_call_operand.vmem [shape: f32[1,256], index: 5, kind: input, shape index: {}]   ;;  %s1253_s6 = inlined_call_operand.hbm [shape: f32[2,8,256], index: 6, kind: output, shape index: {0}]   ;;  %s1254_s7 = inlined_call_operand.vmem [shape: f32[2,8,1], index: 7, kind: output, shape index: {1}]  }
   0x1   :  { %15 = vsyncpa [#allocation3 + $0x1], 0  ;;  %s986_s24 = smov 0   ;;  %s988_s25 = smov 0  }
   0x2   :  { %s990_s26 = smov 0   ;;  %s992_s27 = smov 0  }
   0x3 LB: > { %s1007_s28 = sadd.s32 4294967295, %s942_s27   ;;  %s699_s29 = sadd.s32 4294967294, %s942_s27   ;;  %s942_s27 = sphi %s992_s27, %s1262_s27   ;;  %s938_s26 = sphi %s990_s26, %s1261_s26   ;;  %s934_s25 = sphi %s988_s25, %s1260_s25   ;;  %s930_s24 = sphi %s986_s24, %s1259_s24  }
   0x4   : > { %s1011_s30 = sadd.s32 1, %s942_s27   ;;  %s164_s8 = sadd.s32 1, %s938_s26 }
   0x5   : > { %s161_s9 = ssub.s32 %s942_s27, %s1011_s30  ;;  %p174_p0 = scmp.ne.s32.totalorder %s938_s26, %s934_s25 }
   0x6   : > { %p162_p1 = scmp.eq.s32.totalorder %s161_s9, 0  ;;  %p175_p2 = scmp.eq.s32.totalorder %s1007_s28, 1 }
   0x7   : > { %p180_p3 = scmp.ne.s32.totalorder %s934_s25, %s930_s24  ;;  %p181_p4 = scmp.eq.s32.totalorder %s699_s29, 1 }
   0x8   : > { %s1022_s10 = scalar_select %p162_p1, %s938_s26, %s164_s8  }
   0x9   : > { %p1024_p5 = por %p175_p2, %p174_p0  ;;  %p1028_p6 = por %p181_p4, %p180_p3 }
   0xa   : > { %p702_p7 = scmp.ge.s32.totalorder %s942_s27, 1  ;;  %p251_p8 = scmp.lt.s32.totalorder %s942_s27, 3 }
   0xc   : > { %p252_p9 = pnand %p702_p7, %p251_p8 }
   0xd   : > { %p290_p10 = scmp.lt.s32.totalorder (!%p252_p9), %s1007_s28, 1  ;;  %vm305_vm0 = vcmask (!%p252_p9), 523264   ;;  %v350_v3 = vld [vmem:[%s1251_s4 + $0x80] sm:$0xff] (!%p252_p9)  ;;  %v351_v4 = vld [vmem:[%s1251_s4 + $0x88] sm:$0xff] (!%p252_p9)  ;;  %v352_v8 = vld [vmem:[%s1251_s4 + $0x90] sm:$0xff] (!%p252_p9)  ;;  %v368_v2 = vlaneseq (!%p252_p9)  ;;  %s281_s23 = sand.u32 (!%p252_p9), 1, %s934_s25  }
   0xe   : > { %255 = sbr.rel (%p252_p9) target bundleno = 877 (0x36d), region = 44  ;;  %vm1045_vm1 = vmpackc.low (!%p252_p9), %vm305_vm0, %vm305_vm0  ;;  %v334_v5 = vld [vmem:[%s1251_s4] sm:$0xff] (!%p252_p9)  ;;  %v782_v6 = vpack.c.bf16 (!%p252_p9), %v351_v4, %v350_v3  ;;  %v335_v7 = vld [vmem:[%s1251_s4 + $0x8] sm:$0xff] (!%p252_p9)  ;;  %s703_s29 = sshll.u32 (!%p252_p9), %s281_s23, 4 }
   0xf   : > { %v353_v9 = vld [vmem:[%s1251_s4 + $0x98] sm:$0xff] (!%p252_p9)  ;;  %v785_v10 = vpack.c.bf16 (!%p252_p9), %v335_v7, %v334_v5  ;;  %v336_v12 = vld [vmem:[%s1251_s4 + $0x10] sm:$0xff] (!%p252_p9)  ;;  %v354_v14 = vld [vmem:[%s1251_s4 + $0xa0] sm:$0xff] (!%p252_p9)  ;;  %v369_v3 = vshrl.u32 (!%p252_p9), %v368_v2, 7  ;;  %s1192_s8 = scalar_lea.vmem (!%p252_p9), [#allocation2], %s703_s29  ;;  %s747_s16 = sshll.u32 (!%p252_p9), %s1007_s28, 8 }
  0x10   : > { %v788_v11 = vpack.c.bf16 (!%p252_p9), %v353_v9, %v352_v8  ;;  %784 = vmatprep.subr.msk.bf16.mxu0 (!%p252_p9), %vm1045_vm1, %v782_v6  ;;  %v337_v13 = vld [vmem:[%s1251_s4 + $0x18] sm:$0xff] (!%p252_p9)  ;;  %v355_v15 = vld [vmem:[%s1251_s4 + $0xa8] sm:$0xff] (!%p252_p9)  ;;  %v338_v18 = vld [vmem:[%s1251_s4 + $0x20] sm:$0xff] (!%p252_p9)  ;;  %s1205_s20 = scalar_lea.hbm (!%p252_p9), %s1253_s6, %s747_s16  ;;  %s583_s21 = scalar_lea.sflag (!%p252_p9), [#allocation3], %s281_s23 }
  0x11   : > { %787 = vmatpush3.bf16.xpose.msk.msra.mxu0 (!%p252_p9), %vm1045_vm1, %v785_v10  ;;  %v791_v16 = vpack.c.bf16 (!%p252_p9), %v337_v13, %v336_v12  ;;  %v794_v17 = vpack.c.bf16 (!%p252_p9), %v355_v15, %v354_v14  ;;  %v339_v19 = vld [vmem:[%s1251_s4 + $0x28] sm:$0xff] (!%p252_p9)  ;;  %v356_v20 = vld [vmem:[%s1251_s4 + $0xb0] sm:$0xff] (!%p252_p9)  ;;  %v357_v21 = vld [vmem:[%s1251_s4 + $0xb8] sm:$0xff] (!%p252_p9)  ;;  %v370_v4 = vsub.s32 (!%p252_p9), 0, %v369_v3  ;;  %v374_v6 = vsub.s32 (!%p252_p9), 1, %v369_v3  ;;  %s945_s29 = smov (!%p252_p9), [#allocation2]  }
  0x12   : > { %790 = vmatprep.subr.msk.bf16.mxu0 (!%p252_p9), %vm1045_vm1, %v788_v11  ;;  %v797_v22 = vpack.c.bf16 (!%p252_p9), %v339_v19, %v338_v18  ;;  %v800_v23 = vpack.c.bf16 (!%p252_p9), %v357_v21, %v356_v20  ;;  %v340_v24 = vld [vmem:[%s1251_s4 + $0x30] sm:$0xff] (!%p252_p9)  ;;  %v341_v25 = vld [vmem:[%s1251_s4 + $0x38] sm:$0xff] (!%p252_p9)  ;;  %v358_v26 = vld [vmem:[%s1251_s4 + $0xc0] sm:$0xff] (!%p252_p9)  ;;  %v567_v20 = vand.u32 (!%p252_p9), 127, %v368_v2  ;;  %s884_s9 = sshll.u32 (!%p252_p9), %s945_s29, 4  ;;  %s885_s9 = int_to_ptr.vmem [resolvable:$false] %s884_s9 }
  0x13   : > { %v359_v27 = vld [vmem:[%s1251_s4 + $0xc8] sm:$0xff] (!%p252_p9)  ;;  %v803_v28 = vpack.c.bf16 (!%p252_p9), %v341_v25, %v340_v24  ;;  %v342_v30 = vld [vmem:[%s1251_s4 + $0x40] sm:$0xff] (!%p252_p9)  ;;  %v360_v32 = vld [vmem:[%s1251_s4 + $0xd0] sm:$0xff] (!%p252_p9) }
  0x14   : > { %v806_v29 = vpack.c.bf16 (!%p252_p9), %v359_v27, %v358_v26  ;;  %v343_v31 = vld [vmem:[%s1251_s4 + $0x48] sm:$0xff] (!%p252_p9)  ;;  %v361_v33 = vld [vmem:[%s1251_s4 + $0xd8] sm:$0xff] (!%p252_p9)  ;;  %v344_v36 = vld [vmem:[%s1251_s4 + $0x50] sm:$0xff] (!%p252_p9)  ;;  %v568_v21 = vadd.s32 (!%p252_p9), 128, %v567_v20 }
  0x15   : > { %s291_s13 = scalar_select %p290_p10, %s1007_s28, 1  ;;  %v809_v34 = vpack.c.bf16 %v343_v31, %v342_v30  ;;  %v812_v35 = vpack.c.bf16 %v361_v33, %v360_v32  ;;  %v345_v37 = vld [vmem:[%s1251_s4 + $0x58] sm:$0xff]  ;;  %v362_v44 = vld [vmem:[%s1251_s4 + $0xe0] sm:$0xff]  ;;  %v363_v45 = vld [vmem:[%s1251_s4 + $0xe8] sm:$0xff] }
  0x16   : > { %v815_v38 = vpack.c.bf16 %v345_v37, %v344_v36  ;;  %v818_v46 = vpack.c.bf16 %v363_v45, %v362_v44  ;;  %v346_v47 = vld [vmem:[%s1251_s4 + $0x60] sm:$0xff]  ;;  %v347_v48 = vld [vmem:[%s1251_s4 + $0x68] sm:$0xff]  ;;  %v364_v49 = vld [vmem:[%s1251_s4 + $0xf0] sm:$0xff] }
  0x17   : > { %s1036_s14 = sshll.u32 %s291_s13, 3  ;;  %v821_v50 = vpack.c.bf16 %v347_v48, %v346_v47  ;;  %v365_v51 = vld [vmem:[%s1251_s4 + $0xf8] sm:$0xff]  ;;  %v348_v53 = vld [vmem:[%s1251_s4 + $0x70] sm:$0xff]  ;;  %v707_v60 = vld [vmem:[%s1249_s2] ss:$0 sm:$0xff]  ;;  %s886_s13 = scalar_lea.vmem %s885_s9, 512 }
  0x18   : > { %s293_s17 = scalar_lea.vmem %s1247_s0, %s1036_s14  ;;  %v824_v52 = vpack.c.bf16 %v365_v51, %v364_v49  ;;  %v349_v54 = vld [vmem:[%s1251_s4 + $0x78] sm:$0xff]  ;;  %v708_v62 = vld [vmem:[%s1250_s3] ss:$0 sm:$0xff]  ;;  %s297_s15 = scalar_lea.vmem %s1248_s1, %s1036_s14 }
  0x19   : > { %v302_v0 = vld [vmem:[%s293_s17] sm:$0xff]  ;;  %793 = vmatpush3.bf16.xpose.msk.msra.mxu0 %vm1045_vm1, %v791_v16  ;;  %v827_v55 = vpack.c.bf16 %v349_v54, %v348_v53  ;;  %s601_s17 = sshll.u32 %s1192_s8, 4  ;;  %s602_s17 = int_to_ptr.vmem [resolvable:$true] %s601_s17 }
  0x1a   : > { %v306_v1 = vsel %vm305_vm0, %v302_v0, 0.0  ;;  %796 = vmatprep.subr.msk.bf16.mxu0 %vm1045_vm1, %v794_v17  ;;  %v366_v5 = vld [vmem:[%s1252_s5] sm:$0x3]  ;;  %s880_s22 = scalar_lea.vmem %s602_s17, 256  ;;  %p887_p0 = scmp.lt.s32.totalorder %s602_s17, %s885_s9 }
  0x1b   : > { %307 = vadd.xlane.f32.xlu0 %v306_v1  ;;  %v944_v1 = vmov 0   ;;  %v371_v7 = vrot.slane %v366_v5, %v370_v4  ;;  %v375_v8 = vrot.slane %v366_v5, %v374_v6  ;;  %v565_v14 = vld [vmem:[%s297_s15] sm:$0xff]  ;;  %p881_p11 = scmp.ne.s32.totalorder %s602_s17, %s880_s22  ;;  %p888_p1 = scmp.lt.s32.totalorder %s886_s13, %s880_s22 }
  0x1c   : > { %870 = vset.pattern.permute.xlu1 %v944_v1  ;;  %871 = vset.pattern.permute.xlu0 %v944_v1 }
  0x1d   : > { %p882_p12 = pnand %p881_p11, %p1024_p5  ;;  %p889_p2 = por %p888_p1, %p887_p0 }
  0x1f   : > { %p883_p13 = pneg %p882_p12 }
  0x21   : > { %799 = vmatpush3.bf16.xpose.msk.msra.mxu0 %vm1045_vm1, %v797_v22  ;;  %p890_p3 = pnand %p889_p2, %p883_p13 }
  0x22   : > { %802 = vmatprep.subr.msk.bf16.mxu0 %vm1045_vm1, %v800_v23 }
  0x29   : > { %805 = vmatpush3.bf16.xpose.msk.msra.mxu0 %vm1045_vm1, %v803_v28 }
  0x2a   : > { %808 = vmatprep.subr.msk.bf16.mxu0 %vm1045_vm1, %v806_v29 }
  0x31   : > { %811 = vmatpush3.bf16.xpose.msk.msra.mxu0 %vm1045_vm1, %v809_v34 }
  0x32   : > { %814 = vmatprep.subr.msk.bf16.mxu0 %vm1045_vm1, %v812_v35 }
  0x39   : > { %817 = vmatpush3.bf16.xpose.msk.msra.mxu0 %vm1045_vm1, %v815_v38 }
  0x3a   : > { %820 = vmatprep.subr.msk.bf16.mxu0 %vm1045_vm1, %v818_v46 }
  0x41   : > { %823 = vmatpush3.bf16.xpose.msk.msra.mxu0 %vm1045_vm1, %v821_v50 }
  0x42   : > { %826 = vmatprep.subr.msk.bf16.mxu0 %vm1045_vm1, %v824_v52 }
  0x49   : > { %829 = vmatpush3.bf16.xpose.msk.msra.mxu0 %vm1045_vm1, %v827_v55 }
  0xa8   : > { %v308_v39 = vpop.xlane.xlu0 %307 }
  0xa9   : > { %v310_v40 = vmul.f32 0.015625, %v308_v39 }
  0xab   : > { %v311_v41 = vsub.f32 %v302_v0, %v310_v40 }
  0xad   : > { %v312_v42 = vmul.f32 %v311_v41, %v311_v41 }
  0xaf   : > { %v313_v43 = vsel %vm305_vm0, %v312_v42, 0.0 }
  0xb0   : > { %314 = vadd.xlane.f32.xlu0 %v313_v43 }
 0x13d   : > { %v315_v56 = vpop.xlane.xlu0 %314 }
 0x13e   : > { %v316_v57 = vmul.f32 0.015625, %v315_v56 }
 0x140   : > { %v317_v58 = vadd.f32 1e-05, %v316_v57 }
 0x142   : > { %872 = vrsqrt.f32 %v317_v58 }
 0x14c   : > { %v873_v59 = vpop.eup %872 }
 0x14d   : > { %v319_v61 = vmul.f32 %v873_v59, %v311_v41 }
 0x14f   : > { %v326_v63 = vmul.f32 %v707_v60, %v319_v61 }
 0x151   : > { %v333_v0 = vadd.f32 %v708_v62, %v326_v63 }
 0x153   : > { %780 = vmatprep.mubr.msk.f32.mxu0 %vm305_vm0, %v333_v0 }
 0x154   : > { %781 = vmatmul.mubr.msk.f32.vlgmr.msra.gmra.mrb[0].mxu0 %vm305_vm0, %v333_v0 }
 0x227   : > { %v543_v9 = vpop.f32.mrb[0].mxu0 }
 0x228   : > { %v544_v10 = vadd.f32 %v543_v9, %v371_v7  ;;  %v545_v11 = vpop.f32.mrb[1].mxu0 }
 0x229   : > { %v546_v12 = vadd.f32 %v545_v11, %v375_v8 }
 0x22a   : > { %548 = vst [vmem:[%s1192_s8] sm:$0xff] %v544_v10 }
 0x22b   : > { %v550_v13 = vmax.f32 %v544_v10, %v546_v12  ;;  %549 = vst [vmem:[%s1192_s8 + $0x8] sm:$0xff] %v546_v12 }
 0x22d   : > { %551 = vmax.xlane.f32.xlu1 %v550_v13 }
 0x23e   : > { %570 = vperm.xlu1 %870, %v565_v14  }
 0x2ba   : > { %v552_v15 = vpop.xlane.xlu1 %551 }
 0x2bb   : > { %v553_v16 = vsub.f32 %v544_v10, %v552_v15  ;;  %v554_v17 = vsub.f32 %v546_v12, %v552_v15 }
 0x2bd   : > { %v555_v18 = vmul.f32 1.442695, %v553_v16  ;;  %v557_v19 = vmul.f32 1.442695, %v554_v17 }
 0x2be   : > { %v571_v22 = vpop.permute.xlu1 %570 }
 0x2bf   : > { %874 = vpow2.f32 %v555_v18  ;;  %vm572_vm2 = vcmp.eq.s32.totalorder %v567_v20, %v571_v22  ;;  %vm573_vm3 = vcmp.eq.s32.totalorder %v568_v21, %v571_v22 }
 0x2c0   : > { %876 = vpow2.f32 %v557_v19  ;;  %v574_v26 = vsel %vm572_vm2, %v544_v10, 0.0  ;;  %v575_v27 = vsel %vm573_vm3, %v546_v12, 0.0 }
 0x2c1   : > { %v576_v28 = vadd.f32 %v575_v27, %v574_v26 }
 0x2c9   : > { %v875_v23 = vpop.eup %874 }
 0x2ca   : > { %v877_v24 = vpop.eup %876 }
 0x2cb   : > { %v559_v25 = vadd.f32 %v877_v24, %v875_v23 }
 0x2cd   : > { %560 = vadd.xlane.f32.xlu0 %v559_v25 }
 0x2d1   : > { %577 = vadd.xlane.f32.xlu0 %v576_v28 }
 0x2d2   : > { %893 = shalt.err (!%p890_p3)
}
 0x2d3   : > { %s894_s28 = scalar_lea.hbm %s1205_s20, 256  ;;  %s898_s15 = scalar_lea.hbm %s1253_s6, 512 }
 0x2d4   : > { %p895_p4 = scmp.ne.s32.totalorder %s1205_s20, %s894_s28  ;;  %p899_p9 = scmp.lt.u32.totalorder %s1205_s20, %s1253_s6 }
 0x2d5   : > { %p900_p10 = scmp.lt.u32.totalorder %s898_s15, %s894_s28  ;;  %p902_p12 = scmp.lt.u32.totalorder %s894_s28, %s1205_s20 }
 0x2d6   : > { %p896_p7 = pnand %p895_p4, %p1024_p5 }
 0x2d7   : > { %p901_p11 = por %p900_p10, %p899_p9 }
 0x2d8   : > { %p897_p8 = pneg %p896_p7 }
 0x2d9   : > { %p903_p13 = por %p902_p12, %p901_p11 }
 0x2db   : > { %p904_p0 = pnand %p903_p13, %p897_p8 }
 0x2dd   : > { %907 = shalt.err (!%p904_p0)
}
 0x2de   : > { %830 = dma.vmem_to_hbm [thread:$0]  (%p1024_p5), %s602_s17, 256, %s1205_s20, %s583_s21   ;;  %vm580_vm4 = vcmask 7168  }
 0x2df   : > { %s301_s29 = scalar_lea.vmem %s1254_s7, %s1036_s14 }
 0x35a   : > { %v561_v29 = vpop.xlane.xlu0 %560 }
 0x35b   : > { %878 = vlog2.f32 %v561_v29 }
 0x35e   : > { %v578_v33 = vpop.xlane.xlu0 %577 }
 0x365   : > { %v879_v30 = vpop.eup %878 }
 0x366   : > { %v563_v31 = vmul.f32 0.6931472, %v879_v30 }
 0x368   : > { %v564_v32 = vadd.f32 %v563_v31, %v552_v15 }
 0x36a   : > { %v579_v34 = vsub.f32 %v564_v32, %v578_v33 }
 0x36c   : > { %581 = vst.msk [vmem:[%s301_s29] sm:$0xff] %vm580_vm4, %v579_v34 }
 0x36d PF: > { %p836_p1 = scmp.ge.s32.totalorder %s942_s27, 2  ;;  %s616_s11 = sand.u32 1, %s930_s24  }
 0x36e   : > { %s617_s17 = scalar_lea.sflag [#allocation3], %s616_s11 }
 0x36f   : > { %p833_p5 = pnand %p836_p1, %p1028_p6 }
 0x371   : > { %925 = dma.done.wait (!%p833_p5), %s617_s17, 256  }
 0x372   : > { %927 = vsyncadd (!%p833_p5), %s617_s17, 4294967040  ;;  %p18_p2 = scmp.ge.s32.totalorder %s1011_s30, 4   ;;  %s1259_s24 = smov %s934_s25 }
 0x373   : > { %s1260_s25 = smov %s938_s26  ;;  %s1261_s26 = smov %s1022_s10 }
 0x374   : > { %s1262_s27 = smov %s1011_s30  ;;  %20 = sbr.rel (!%p18_p2) target bundleno = 3 (0x3), region = 94 }
 0x37b   :  { %629 = vsyncpa [#allocation3], 1 }
 0x37c   :  { %631 = vsyncpa [#allocation3 + $0x1], 1 }

// kernel: forward.5
= control target key start
LH: loop header
LB: loop body
LE: loop exit
PB: predicated region body
PF: predicated region fallthrough
CT: control target
= control target key end

     0   :  { %s1981_s21 = smov 0   ;;  %s2268_s0 = inlined_call_operand.vmem [shape: f32[2,16,64], index: 0, kind: input, shape index: {}]   ;;  %s2269_s1 = inlined_call_operand.vmem [shape: f32[2,1,16], index: 1, kind: input, shape index: {}]   ;;  %s2270_s2 = inlined_call_operand.vmem [shape: f32[1,64], index: 2, kind: input, shape index: {}]   ;;  %s2271_s3 = inlined_call_operand.vmem [shape: f32[1,64], index: 3, kind: input, shape index: {}]   ;;  %s2272_s4 = inlined_call_operand.vmem [shape: f32[64,192], index: 4, kind: input, shape index: {}]   ;;  %s2273_s5 = inlined_call_operand.vmem [shape: f32[1,192], index: 5, kind: input, shape index: {}]   ;;  %s2274_s6 = inlined_call_operand.vmem [shape: f32[64,64], index: 6, kind: input, shape index: {}]   ;;  %s2275_s7 = inlined_call_operand.vmem [shape: f32[1,64], index: 7, kind: input, shape index: {}]   ;;  %s2276_s8 = inlined_call_operand.vmem [shape: f32[1,64], index: 8, kind: input, shape index: {}]   ;;  %s2277_s9 = inlined_call_operand.vmem [shape: f32[1,64], index: 9, kind: input, shape index: {}]   ;;  %s2278_s10 = inlined_call_operand.vmem [shape: f32[64,128], index: 10, kind: input, shape index: {}]   ;;  %s2279_s11 = inlined_call_operand.vmem [shape: f32[1,128], index: 11, kind: input, shape index: {}]   ;;  %s2280_s12 = inlined_call_operand.vmem [shape: f32[128,64], index: 12, kind: input, shape index: {}]   ;;  %s2281_s13 = inlined_call_operand.vmem [shape: f32[1,64], index: 13, kind: input, shape index: {}]   ;;  %s2282_s14 = inlined_call_operand.vmem [shape: f32[1,64], index: 14, kind: input, shape index: {}]   ;;  %s2283_s15 = inlined_call_operand.vmem [shape: f32[1,64], index: 15, kind: input, shape index: {}]   ;;  %s2284_s16 = inlined_call_operand.vmem [shape: f32[2,16,64], index: 16, kind: output, shape index: {}]  }
   0x1   :  { %2285 = sst [smem:[#allocation2_spill]] %s2268_s0 }
   0x2 LB: > { %s1536_s22 = sadd.s32 4294967295, %s1890_s21   ;;  %p1540_p0 = scmp.ge.s32.totalorder %s1890_s21, 1  ;;  %s1890_s21 = sphi %s1981_s21, %s26_s21  }
   0x3   : > { %p470_p1 = scmp.lt.s32.totalorder %s1890_s21, 3 }
   0x5   : > { %p471_p2 = pnand %p1540_p0, %p470_p1 }
   0x6   : > { %p523_p3 = scmp.lt.s32.totalorder (!%p471_p2), %s1536_s22, 1  ;;  %vm543_vm0 = vcmask (!%p471_p2), 523264   ;;  %s2286_s24 = sld [smem:[#allocation2_spill]] (!%p471_p2)  ;;  %v588_v14 = vld [vmem:[%s2272_s4 + $0x8] sm:$0xff] (!%p471_p2)  ;;  %v590_v15 = vld [vmem:[%s2272_s4 + $0x18] sm:$0xff] (!%p471_p2)  ;;  %v587_v17 = vld [vmem:[%s2272_s4] sm:$0xff] (!%p471_p2)  ;;  %v605_v55 = vlaneseq (!%p471_p2) }
   0x7   : > { %474 = sbr.rel (%p471_p2) target bundleno = 3083 (0xc0b), region = 84  ;;  %v1729_v16 = vpack.c.bf16 (!%p471_p2), %v590_v15, %v588_v14  ;;  %v589_v18 = vld [vmem:[%s2272_s4 + $0x10] sm:$0xff] (!%p471_p2)  ;;  %v592_v20 = vld [vmem:[%s2272_s4 + $0x28] sm:$0xff] (!%p471_p2)  ;;  %v594_v21 = vld [vmem:[%s2272_s4 + $0x38] sm:$0xff] (!%p471_p2)  ;;  %v1892_v33 = vmov (!%p471_p2), 0.0   ;;  %vm721_vm1 = vcmask (!%p471_p2), 261120  }
   0x8   : > { %v1731_v19 = vpack.c.bf16 (!%p471_p2), %v589_v18, %v587_v17  ;;  %v1733_v22 = vpack.c.bf16 (!%p471_p2), %v594_v21, %v592_v20  ;;  %v591_v23 = vld [vmem:[%s2272_s4 + $0x20] sm:$0xff] (!%p471_p2)  ;;  %v593_v24 = vld [vmem:[%s2272_s4 + $0x30] sm:$0xff] (!%p471_p2)  ;;  %v596_v26 = vld [vmem:[%s2272_s4 + $0x48] sm:$0xff] (!%p471_p2)  ;;  %685 = vmatprep.mubr.f32.mxu0 (!%p471_p2), %v1892_v33  ;;  %v606_v56 = vshrl.u32 (!%p471_p2), %v605_v55, 7  ;;  %s1893_s15 = smov (!%p471_p2), 64   ;;  %s1894_s23 = smov (!%p471_p2), 96  }
   0x9   : > { %1730 = vmatprep.subr.bf16.mxu0 (!%p471_p2), %v1729_v16  ;;  %v1735_v25 = vpack.c.bf16 (!%p471_p2), %v593_v24, %v591_v23  ;;  %v598_v27 = vld [vmem:[%s2272_s4 + $0x58] sm:$0xff] (!%p471_p2)  ;;  %v595_v28 = vld [vmem:[%s2272_s4 + $0x40] sm:$0xff] (!%p471_p2)  ;;  %v597_v30 = vld [vmem:[%s2272_s4 + $0x50] sm:$0xff] (!%p471_p2)  ;;  %vm807_vm3 = vcmask (!%p471_p2), 130048   ;;  %s1895_s27 = smov (!%p471_p2), 32  }
   0xa   : > { %1732 = vmatpush1.bf16.msra.mxu0 (!%p471_p2), %v1731_v19  ;;  %v1737_v29 = vpack.c.bf16 (!%p471_p2), %v598_v27, %v596_v26  ;;  %v600_v31 = vld [vmem:[%s2272_s4 + $0x68] sm:$0xff] (!%p471_p2)  ;;  %v602_v32 = vld [vmem:[%s2272_s4 + $0x78] sm:$0xff] (!%p471_p2)  ;;  %v1739_v34 = vpack.c.bf16 (!%p471_p2), %v597_v30, %v595_v28  ;;  %v599_v36 = vld [vmem:[%s2272_s4 + $0x60] sm:$0xff] (!%p471_p2)  ;;  %v607_v57 = vsub.s32 (!%p471_p2), 0, %v606_v56  ;;  %v611_v60 = vsub.s32 (!%p471_p2), 1, %v606_v56 }
   0xb   : > { %1734 = vmatprep.subr.bf16.mxu0 (!%p471_p2), %v1733_v22  ;;  %v1741_v35 = vpack.c.bf16 (!%p471_p2), %v602_v32, %v600_v31  ;;  %v601_v37 = vld [vmem:[%s2272_s4 + $0x70] sm:$0xff] (!%p471_p2)  ;;  %v1545_v46 = vld [vmem:[%s2270_s2] ss:$0 sm:$0xff] (!%p471_p2)  ;;  %vm2081_vm2 = vmpackc.low (!%p471_p2), %vm721_vm1, %vm721_vm1 }
   0xc   : > { %v1743_v38 = vpack.c.bf16 (!%p471_p2), %v601_v37, %v599_v36  ;;  %v1546_v48 = vld [vmem:[%s2271_s3] ss:$0 sm:$0xff] (!%p471_p2) }
   0xd   : > { %v603_v58 = vld [vmem:[%s2273_s5] sm:$0x3] (!%p471_p2) }
   0xe   : > { %s2290_s22 = smov (!%p523_p3, %s1536_s22), 1  ;;  %1736 = vmatpush1.bf16.msra.mxu0 %v1735_v25  ;;  %v608_v59 = vrot.slane %v603_v58, %v607_v57 }
   0xf   : > { %s1572_s14 = sshll.u32 %s2290_s22, 4  ;;  %1738 = vmatprep.subr.bf16.mxu0 %v1737_v29  ;;  %s530_s26 = scalar_lea.vmem %s2269_s1, %s2290_s22 }
  0x10   : > { %s527_s25 = scalar_lea.vmem %s2286_s24, %s1572_s14  ;;  %v538_v18 = vld [vmem:[%s530_s26] sm:$0x1]  ;;  %s535_s19 = scalar_lea.vmem %s2284_s16, %s1572_s14 }
  0x11   : > { %v1997_v0 = vld [vmem:[%s527_s25] sm:$0xff]  ;;  %v1999_v1 = vld [vmem:[%s527_s25 + $0x8] sm:$0xff]  ;;  %v539_v19 = vsub.f32 1.0, %v538_v18 }
  0x12   : > { %v544_v2 = vsel %vm543_vm0, %v1997_v0, 0.0  ;;  %v547_v3 = vsel %vm543_vm0, %v1999_v1, 0.0  ;;  %1740 = vmatpush1.bf16.msra.mxu0 %v1739_v34 }
  0x13   : > { %545 = vadd.xlane.f32.xlu0 %v544_v2  ;;  %1742 = vmatprep.subr.bf16.mxu0 %v1741_v35  ;;  %v612_v2 = vrot.slane %v603_v58, %v611_v60  ;;  %v540_v20 = vmul.f32 -1e+09, %v539_v19 }
  0x15   : > { %v713_v21 = vrot.slane %v540_v20, %v607_v57  ;;  %v701_v20 = vld [vmem:[%s2274_s6 + $0x18] sm:$0xff] }
  0x16   : > { %1744 = vmatpush1.bf16.msra.mxu0 %v1743_v38 }
  0x17   : > { %548 = vadd.xlane.f32.xlu0 %v547_v3 }
  0xa0   : > { %v546_v4 = vpop.xlane.xlu0 %545 }
  0xa1   : > { %v551_v5 = vmul.f32 0.015625, %v546_v4 }
  0xa3   : > { %v553_v6 = vsub.f32 %v1997_v0, %v551_v5 }
  0xa4   : > { %v549_v7 = vpop.xlane.xlu0 %548 }
  0xa5   : > { %v552_v8 = vmul.f32 0.015625, %v549_v7  ;;  %v555_v9 = vmul.f32 %v553_v6, %v553_v6 }
  0xa7   : > { %v554_v10 = vsub.f32 %v1999_v1, %v552_v8  ;;  %v557_v11 = vsel %vm543_vm0, %v555_v9, 0.0 }
  0xa8   : > { %558 = vadd.xlane.f32.xlu1 %v557_v11 }
  0xa9   : > { %v556_v12 = vmul.f32 %v554_v10, %v554_v10 }
  0xab   : > { %v560_v13 = vsel %vm543_vm0, %v556_v12, 0.0 }
  0xac   : > { %561 = vadd.xlane.f32.xlu1 %v560_v13 }
 0x135   : > { %v559_v39 = vpop.xlane.xlu1 %558 }
 0x136   : > { %v563_v40 = vmul.f32 0.015625, %v559_v39 }
 0x138   : > { %v565_v41 = vadd.f32 1e-05, %v563_v40 }
 0x139   : > { %v562_v42 = vpop.xlane.xlu1 %561 }
 0x13a   : > { %1856 = vrsqrt.f32 %v565_v41  ;;  %v564_v43 = vmul.f32 0.015625, %v562_v42 }
 0x13c   : > { %v566_v44 = vadd.f32 1e-05, %v564_v43 }
 0x13e   : > { %1858 = vrsqrt.f32 %v566_v44 }
 0x144   : > { %v1857_v45 = vpop.eup %1856 }
 0x145   : > { %v569_v47 = vmul.f32 %v1857_v45, %v553_v6 }
 0x147   : > { %v577_v49 = vmul.f32 %v1545_v46, %v569_v47 }
 0x148   : > { %v1859_v50 = vpop.eup %1858 }
 0x149   : > { %v585_v51 = vadd.f32 %v1546_v48, %v577_v49  ;;  %v570_v52 = vmul.f32 %v1859_v50, %v554_v10 }
 0x14b   : > { %1547 = vmatmul.mubr.msk.f32.vlgmr.msra.gmra.mrb[0].mxu0 %vm543_vm0, %v585_v51  ;;  %v578_v53 = vmul.f32 %v1545_v46, %v570_v52 }
 0x14c   : > { %691 = vmatprep.mubr.f32.mxu0 %v1892_v33 }
 0x14d   : > { %v586_v54 = vadd.f32 %v1546_v48, %v578_v53 }
 0x14f   : > { %1548 = vmatmul.mubr.msk.f32.gmra.mrb[2].mxu0 %vm543_vm0, %v586_v54 }
 0x21e   : > { %v687_v61 = vpop.f32.mrb[0].mxu0 }
 0x21f   : > { %v688_v62 = vadd.f32 %v687_v61, %v608_v59  ;;  %v689_v63 = vpop.f32.mrb[1].mxu0 }
 0x220   : > { %v2069_v7 = vadd.f32 %v689_v63, %v612_v2 }
 0x221   : > { %v707_v3 = vmul.f32 0.17677669, %v688_v62 }
 0x222   : > { %v693_v4 = vpop.f32.mrb[2].mxu0 }
 0x223   : > { %v694_v5 = vadd.f32 %v693_v4, %v608_v59  ;;  %v695_v6 = vpop.f32.mrb[3].mxu0  ;;  %1632 = vmatprep.mubr.msk.f32.mxu1 %vm721_vm1, %v707_v3 }
 0x224   : > { %v2071_v8 = vadd.f32 %v695_v6, %v612_v2 }
 0x225   : > { %v1841_v9 = vpack.i.bf16 %v694_v5, %v688_v62  ;;  %v708_v12 = vmul.f32 0.17677669, %v694_v5 }
 0x226   : > { %v1851_v10 = vpack.i.bf16 %v2071_v8, %v2069_v7  ;;  %v1751_v11 = vpack.c.bf16 %v2071_v8, %v2069_v7  ;;  %v698_v7 = vld [vmem:[%s2274_s6] sm:$0xff]  ;;  %v699_v8 = vld [vmem:[%s2274_s6 + $0x8] sm:$0xff] }
 0x227   : > { %1842 = vrot.lane.b32.xlu0 %v1841_v9, %s1893_s15  ;;  %v1765_v19 = vpack.c.bf16 %v699_v8, %v698_v7 }
 0x22b   : > { %911 = vrot.lane.b32.xlu0 %v707_v3, %s1894_s23 }
 0x22f   : > { %913 = vrot.lane.b32.xlu0 %v708_v12, %s1894_s23 }
 0x299   : > { %v1843_v13 = vpop.permute.xlu0 %1842 }
 0x29a   : > { %v1845_v14 = vunpack.i.h.bf16 %v1843_v13  ;;  %v1844_v15 = vunpack.i.l.bf16 %v1843_v13 }
 0x29c   : > { %v1745_v17 = vpack.c.bf16 %v1845_v14, %v1844_v15 }
 0x29d   : > { %v912_v48 = vpop.permute.xlu0 %911 }
 0x29e   : > { %1747 = vmatprep.subr.msk.bf16.mxu1 %vm2081_vm2, %v1745_v17 }
 0x29f   : > { %1750 = vmatpush3.bf16.xpose.msk.msra.mxu1 %vm2081_vm2, %v1745_v17 }
 0x2a0   : > { %1752 = vmatprep.subr.bf16.mxu1 %v1751_v11 }
 0x2a1   : > { %v914_v49 = vpop.permute.xlu0 %913 }
 0x2a6   : > { %1633 = vmatmul.mubr.msk.f32.vlgmr.msra.gmra.mrb[0].mxu1 %vm721_vm1, %v708_v12 }
 0x2a7   : > { %1754 = vmatpush3.bf16.msra.mxu1 %v1751_v11 }
 0x379   : > { %v1634_v22 = vpop.f32.mrb[0].mxu1 }
 0x37a   : > { %v798_v23 = vpop.f32.mrb[1].mxu1  ;;  %v804_v25 = vadd.f32 %v1634_v22, %v713_v21  ;;  %v702_v22 = vld [vmem:[%s2274_s6 + $0x20] sm:$0xff] }
 0x37b   : > { %v799_v24 = vadd.f32 %v798_v23, %v713_v21  ;;  %v703_v23 = vld [vmem:[%s2274_s6 + $0x28] sm:$0xff] }
 0x37c   : > { %v811_v27 = vsel %vm807_vm3, %v804_v25, -inf }
 0x37d   : > { %v808_v26 = vsel %vm807_vm3, %v799_v24, -inf }
 0x37e   : > { %809 = vmax.xlane.f32.xlu1 %v808_v26  ;;  %v705_v26 = vld [vmem:[%s2274_s6 + $0x38] sm:$0xff] }
 0x382   : > { %812 = vmax.xlane.f32.xlu1 %v811_v27 }
 0x40b   : > { %v810_v28 = vpop.xlane.xlu1 %809 }
 0x40c   : > { %v814_v29 = vsub.f32 %v799_v24, %v810_v28  ;;  %v1773_v24 = vpack.c.bf16 %v703_v23, %v702_v22  ;;  %v1374_v23 = vld [vmem:[%s2280_s12 + $0x20] sm:$0xff] }
 0x40e   : > { %v816_v32 = vmul.f32 1.442695, %v814_v29 }
 0x40f   : > { %v813_v30 = vpop.xlane.xlu1 %812 }
 0x410   : > { %v815_v31 = vsub.f32 %v804_v25, %v813_v30  ;;  %v704_v25 = vld [vmem:[%s2274_s6 + $0x30] sm:$0xff] }
 0x411   : > { %v1777_v27 = vpack.c.bf16 %v705_v26, %v704_v25  ;;  %v1376_v26 = vld [vmem:[%s2280_s12 + $0x30] sm:$0xff] }
 0x412   : > { %v818_v33 = vmul.f32 1.442695, %v815_v31 }
 0x414   : > { %1860 = vpow2.f32 %v818_v33 }
 0x415   : > { %1862 = vpow2.f32 %v816_v32 }
 0x41e   : > { %v1861_v34 = vpop.eup %1860 }
 0x41f   : > { %v823_v35 = vsel %vm807_vm3, %v1861_v34, 0.0  ;;  %v1863_v36 = vpop.eup %1862 }
 0x420   : > { %824 = vadd.xlane.f32.xlu1 %v823_v35  ;;  %v820_v37 = vsel %vm807_vm3, %v1863_v36, 0.0 }
 0x424   : > { %821 = vadd.xlane.f32.xlu1 %v820_v37 }
 0x435   : > { %1847 = vrot.lane.b32.xlu1 %v1841_v9, %s1895_s27 }
 0x4ad   : > { %v825_v38 = vpop.xlane.xlu1 %824 }
 0x4ae   : > { %1864 = vrcp.f32 %v825_v38 }
 0x4b1   : > { %v822_v39 = vpop.xlane.xlu1 %821 }
 0x4b2   : > { %1866 = vrcp.f32 %v822_v39 }
 0x4b5   : > { %v1848_v40 = vpop.permute.xlu1 %1847 }
 0x4b6   : > { %v1850_v41 = vunpack.i.h.bf16 %v1848_v40  ;;  %v1849_v42 = vunpack.i.l.bf16 %v1848_v40 }
 0x4b8   : > { %v1755_v43 = vpack.c.bf16 %v1850_v41, %v1849_v42  ;;  %v1865_v44 = vpop.eup %1864 }
 0x4b9   : > { %v829_v47 = vmul.f32 %v1865_v44, %v1861_v34  ;;  %v1561_v34 = vld [vmem:[%s2275_s7] ss:$0 sm:$0xff] }
 0x4ba   : > { %1757 = vmatprep.subr.msk.bf16.mxu1 %vm2081_vm2, %v1755_v43 }
 0x4bc   : > { %v1867_v45 = vpop.eup %1866 }
 0x4bd   : > { %v828_v46 = vmul.f32 %v1867_v45, %v1863_v36 }
 0x4bf   : > { %1639 = vmatprep.mubr.msk.f32.mxu1 %vm807_vm3, %v828_v46 }
 0x4c0   : > { %1640 = vmatmul.mubr.msk.f32.vlgmr.msra.gmra.mrb[2].mxu1 %vm807_vm3, %v829_v47 }
 0x4c1   : > { %1760 = vmatpush3.bf16.xpose.msk.msra.mxu1 %vm2081_vm2, %v1755_v43  ;;  %1646 = vmatprep.mubr.msk.f32.mxu1 %vm721_vm1, %v912_v48 }
 0x4c8   : > { %1647 = vmatmul.mubr.msk.f32.vlgmr.msra.gmra.mrb[4].mxu1 %vm721_vm1, %v914_v49 }
 0x593   : > { %v2107_v50 = vpop.f32.mrb[2].mxu1 }
 0x594   : > { %v2109_v51 = vpop.f32.mrb[3].mxu1 }
 0x59b   : > { %v1648_v52 = vpop.f32.mrb[4].mxu1 }
 0x59c   : > { %v999_v53 = vadd.f32 %v1648_v52, %v713_v21  ;;  %v993_v54 = vpop.f32.mrb[5].mxu1  ;;  %v1257_v52 = vld [vmem:[%s2278_s10 + $0x8] sm:$0xff] }
 0x59d   : > { %v994_v55 = vadd.f32 %v993_v54, %v713_v21  ;;  %v1258_v54 = vld [vmem:[%s2278_s10 + $0x10] sm:$0xff] }
 0x59e   : > { %v1005_v56 = vsel %vm807_vm3, %v999_v53, -inf }
 0x59f   : > { %1006 = vmax.xlane.f32.xlu1 %v1005_v56  ;;  %v1002_v57 = vsel %vm807_vm3, %v994_v55, -inf }
 0x5a0   : > { %1003 = vmax.xlane.f32.xlu0 %v1002_v57  ;;  %v1260_v57 = vld [vmem:[%s2278_s10 + $0x20] sm:$0xff] }
 0x62c   : > { %v1007_v58 = vpop.xlane.xlu1 %1006 }
 0x62d   : > { %v1009_v59 = vsub.f32 %v999_v53, %v1007_v58  ;;  %v1004_v60 = vpop.xlane.xlu0 %1003  ;;  %v1261_v58 = vld [vmem:[%s2278_s10 + $0x28] sm:$0xff] }
 0x62e   : > { %v1008_v61 = vsub.f32 %v994_v55, %v1004_v60  ;;  %v1259_v55 = vld [vmem:[%s2278_s10 + $0x18] sm:$0xff]  ;;  %v1262_v60 = vld [vmem:[%s2278_s10 + $0x30] sm:$0xff] }
 0x62f   : > { %v1012_v62 = vmul.f32 1.442695, %v1009_v59  ;;  %v1785_v56 = vpack.c.bf16 %v1259_v55, %v1258_v54  ;;  %v1789_v59 = vpack.c.bf16 %v1261_v58, %v1260_v57 }
 0x630   : > { %v1010_v63 = vmul.f32 1.442695, %v1008_v61  ;;  %v1263_v61 = vld [vmem:[%s2278_s10 + $0x38] sm:$0xff] }
 0x631   : > { %1868 = vpow2.f32 %v1012_v62  ;;  %v1793_v62 = vpack.c.bf16 %v1263_v61, %v1262_v60 }
 0x632   : > { %1870 = vpow2.f32 %v1010_v63  ;;  %v1370_v63 = vld [vmem:[%s2280_s12] sm:$0xff] }
 0x63b   : > { %v1869_v2 = vpop.eup %1868 }
 0x63c   : > { %v1017_v3 = vsel %vm807_vm3, %v1869_v2, 0.0  ;;  %v1871_v4 = vpop.eup %1870 }
 0x63d   : > { %1018 = vadd.xlane.f32.xlu0 %v1017_v3  ;;  %v1014_v5 = vsel %vm807_vm3, %v1871_v4, 0.0 }
 0x641   : > { %1015 = vadd.xlane.f32.xlu0 %v1014_v5 }
 0x657   : > { %1852 = vrot.lane.b32.xlu0 %v1851_v10, %s1894_s23  ;;  %v700_v10 = vld [vmem:[%s2274_s6 + $0x10] sm:$0xff] }
 0x658   : > { %v1769_v21 = vpack.c.bf16 %v701_v20, %v700_v10  ;;  %v1372_v20 = vld [vmem:[%s2280_s12 + $0x10] sm:$0xff] }
 0x6ca   : > { %v1019_v6 = vpop.xlane.xlu0 %1018 }
 0x6cb   : > { %1872 = vrcp.f32 %v1019_v6 }
 0x6ce   : > { %v1016_v9 = vpop.xlane.xlu0 %1015 }
 0x6cf   : > { %1874 = vrcp.f32 %v1016_v9 }
 0x6d2   : > { %v1853_v11 = vpop.permute.xlu0 %1852 }
 0x6d3   : > { %v1855_v12 = vunpack.i.h.bf16 %v1853_v11  ;;  %v1854_v13 = vunpack.i.l.bf16 %v1853_v11 }
 0x6d5   : > { %v1761_v14 = vpack.c.bf16 %v1855_v12, %v1854_v13  ;;  %v1873_v15 = vpop.eup %1872 }
 0x6d6   : > { %v1023_v18 = vmul.f32 %v1873_v15, %v1869_v2  ;;  %v1371_v2 = vld [vmem:[%s2280_s12 + $0x8] sm:$0xff] }
 0x6d7   : > { %1762 = vmatprep.subr.bf16.mxu0 %v1761_v14  ;;  %v1797_v3 = vpack.c.bf16 %v1371_v2, %v1370_v63  ;;  %v1569_v2 = vld [vmem:[%s2281_s13] ss:$0 sm:$0xff] }
 0x6d8   : > { %1764 = vmatpush3.bf16.msra.mxu0 %v1761_v14  ;;  %v1564_v14 = vld [vmem:[%s2276_s8] ss:$0 sm:$0xff] }
 0x6d9   : > { %v1875_v16 = vpop.eup %1874  ;;  %1766 = vmatprep.subr.bf16.mxu0 %v1765_v19  ;;  %1798 = vmatprep.subr.bf16.mxu1 %v1797_v3 }
 0x6da   : > { %v1022_v17 = vmul.f32 %v1875_v16, %v1871_v4  ;;  %1800 = vmatpush3.bf16.msra.mxu1 %v1797_v3  ;;  %v1565_v16 = vld [vmem:[%s2277_s9] ss:$0 sm:$0xff] }
 0x6dc   : > { %1653 = vmatprep.mubr.msk.f32.mxu0 %vm807_vm3, %v1022_v17 }
 0x6dd   : > { %1654 = vmatmul.mubr.msk.f32.vlgmr.msra.gmra.mrb[4].mxu0 %vm807_vm3, %v1023_v18 }
 0x6de   : > { %1768 = vmatpush3.bf16.msra.mxu0 %v1765_v19 }
 0x6df   : > { %1770 = vmatprep.subr.bf16.mxu0 %v1769_v21 }
 0x6e2   : > { %1772 = vmatpush3.bf16.msra.mxu0 %v1769_v21  ;;  %v1373_v21 = vld [vmem:[%s2280_s12 + $0x18] sm:$0xff] }
 0x6e3   : > { %1774 = vmatprep.subr.bf16.mxu0 %v1773_v24  ;;  %v1801_v22 = vpack.c.bf16 %v1373_v21, %v1372_v20 }
 0x6e5   : > { %1802 = vmatprep.subr.bf16.mxu1 %v1801_v22 }
 0x6e6   : > { %1776 = vmatpush3.bf16.msra.mxu0 %v1773_v24  ;;  %1804 = vmatpush3.bf16.msra.mxu1 %v1801_v22  ;;  %v1375_v24 = vld [vmem:[%s2280_s12 + $0x28] sm:$0xff] }
 0x6e7   : > { %1778 = vmatprep.subr.bf16.mxu0 %v1777_v27  ;;  %v1805_v25 = vpack.c.bf16 %v1375_v24, %v1374_v23 }
 0x6e9   : > { %1806 = vmatprep.subr.bf16.mxu1 %v1805_v25 }
 0x6ea   : > { %1780 = vmatpush3.bf16.msra.mxu0 %v1777_v27  ;;  %1808 = vmatpush3.bf16.msra.mxu1 %v1805_v25  ;;  %v1377_v27 = vld [vmem:[%s2280_s12 + $0x38] sm:$0xff] }
 0x7b0   : > { %v1655_v28 = vpop.f32.mrb[4].mxu0 }
 0x7b1   : > { %v1104_v29 = vpop.f32.mrb[5].mxu0 }
 0x7b2   : > { %1115 = vrot.lane.b32.xlu1 %v1104_v29, %s1895_s27  ;;  %v1378_v29 = vld [vmem:[%s2280_s12 + $0x40] sm:$0xff] }
 0x7b6   : > { %1117 = vrot.lane.b32.xlu1 %v1655_v28, %s1895_s27  ;;  %v1809_v28 = vpack.c.bf16 %v1377_v27, %v1376_v26 }
 0x7b8   : > { %1810 = vmatprep.subr.bf16.mxu1 %v1809_v28 }
 0x7b9   : > { %1812 = vmatpush3.bf16.msra.mxu1 %v1809_v28 }
 0x824   : > { %v1116_v30 = vpop.permute.xlu1 %1115 }
 0x825   : > { %v1121_v31 = vsel %vm721_vm1, %v2109_v51, %v1116_v30  ;;  %v1256_v51 = vld [vmem:[%s2278_s10] sm:$0xff]  ;;  %v1379_v30 = vld [vmem:[%s2280_s12 + $0x48] sm:$0xff] }
 0x826   : > { %1672 = vmatprep.mubr.msk.f32.mxu0 %vm543_vm0, %v1121_v31  ;;  %v1781_v53 = vpack.c.bf16 %v1257_v52, %v1256_v51  ;;  %v1380_v31 = vld [vmem:[%s2280_s12 + $0x50] sm:$0xff] }
 0x828   : > { %v1118_v32 = vpop.permute.xlu1 %1117  ;;  %1782 = vmatprep.subr.bf16.mxu0 %v1781_v53 }
 0x829   : > { %v1122_v33 = vsel %vm721_vm1, %v2107_v50, %v1118_v32  ;;  %v1813_v32 = vpack.c.bf16 %v1379_v30, %v1378_v29 }
 0x82a   : > { %1673 = vmatmul.mubr.msk.f32.vlgmr.msra.gmra.mrb[6].mxu0 %vm543_vm0, %v1122_v33  ;;  %v1381_v33 = vld [vmem:[%s2280_s12 + $0x58] sm:$0xff] }
 0x82b   : > { %1784 = vmatpush3.bf16.msra.mxu0 %v1781_v53  ;;  %1814 = vmatprep.subr.bf16.mxu1 %v1813_v32 }
 0x82c   : > { %1786 = vmatprep.subr.bf16.mxu0 %v1785_v56  ;;  %1816 = vmatpush3.bf16.msra.mxu1 %v1813_v32 }
 0x82f   : > { %1788 = vmatpush3.bf16.msra.mxu0 %v1785_v56 }
 0x830   : > { %1790 = vmatprep.subr.bf16.mxu0 %v1789_v59 }
 0x833   : > { %1792 = vmatpush3.bf16.msra.mxu0 %v1789_v59 }
 0x834   : > { %1794 = vmatprep.subr.bf16.mxu0 %v1793_v62 }
 0x837   : > { %1796 = vmatpush3.bf16.msra.mxu0 %v1793_v62 }
 0x8fd   : > { %v1674_v35 = vpop.f32.mrb[6].mxu0 }
 0x8fe   : > { %v1207_v36 = vadd.f32 %v1674_v35, %v1561_v34  ;;  %v1201_v37 = vpop.f32.mrb[7].mxu0  ;;  %v1382_v35 = vld [vmem:[%s2280_s12 + $0x60] sm:$0xff] }
 0x8ff   : > { %v1202_v38 = vadd.f32 %v1561_v34, %v1201_v37  ;;  %v1817_v34 = vpack.c.bf16 %v1381_v33, %v1380_v31 }
 0x900   : > { %v2157_v39 = vadd.f32 %v1207_v36, %v1999_v1  ;;  %v1383_v36 = vld [vmem:[%s2280_s12 + $0x68] sm:$0xff] }
 0x901   : > { %v2160_v40 = vadd.f32 %v1202_v38, %v1997_v0  ;;  %1818 = vmatprep.subr.bf16.mxu1 %v1817_v34  ;;  %v1821_v37 = vpack.c.bf16 %v1383_v36, %v1382_v35  ;;  %v1384_v38 = vld [vmem:[%s2280_s12 + $0x70] sm:$0xff] }
 0x902   : > { %v1217_v41 = vsel %vm543_vm0, %v2157_v39, 0.0  ;;  %1820 = vmatpush3.bf16.msra.mxu1 %v1817_v34 }
 0x903   : > { %1218 = vadd.xlane.f32.xlu0 %v1217_v41  ;;  %v1214_v42 = vsel %vm543_vm0, %v2160_v40, 0.0  ;;  %v1385_v41 = vld [vmem:[%s2280_s12 + $0x78] sm:$0xff]  ;;  %1822 = vmatprep.subr.bf16.mxu1 %v1821_v37 }
 0x904   : > { %1215 = vadd.xlane.f32.xlu1 %v1214_v42  ;;  %v1825_v42 = vpack.c.bf16 %v1385_v41, %v1384_v38 }
 0x906   : > { %1824 = vmatpush3.bf16.msra.mxu1 %v1821_v37 }
 0x907   : > { %1826 = vmatprep.subr.bf16.mxu1 %v1825_v42 }
 0x90a   : > { %1828 = vmatpush3.bf16.msra.mxu1 %v1825_v42 }
 0x990   : > { %v1219_v43 = vpop.xlane.xlu0 %1218 }
 0x991   : > { %v1221_v44 = vmul.f32 0.015625, %v1219_v43  ;;  %v1216_v45 = vpop.xlane.xlu1 %1215  ;;  %v1566_v43 = vld [vmem:[%s2279_s11] ss:$0 sm:$0xff] }
 0x992   : > { %v1220_v46 = vmul.f32 0.015625, %v1216_v45 }
 0x993   : > { %v1223_v47 = vsub.f32 %v2157_v39, %v1221_v44 }
 0x994   : > { %v1222_v1 = vsub.f32 %v2160_v40, %v1220_v46 }
 0x995   : > { %v1225_v49 = vmul.f32 %v1223_v47, %v1223_v47 }
 0x996   : > { %v1224_v48 = vmul.f32 %v1222_v1, %v1222_v1 }
 0x997   : > { %v1229_v50 = vsel %vm543_vm0, %v1225_v49, 0.0 }
 0x998   : > { %v1226_v0 = vsel %vm543_vm0, %v1224_v48, 0.0 }
 0x999   : > { %1227 = vadd.xlane.f32.xlu0 %v1226_v0 }
 0x99d   : > { %1230 = vadd.xlane.f32.xlu0 %v1229_v50 }
 0xa26   : > { %v1228_v4 = vpop.xlane.xlu0 %1227 }
 0xa27   : > { %v1232_v5 = vmul.f32 0.015625, %v1228_v4 }
 0xa29   : > { %v1234_v6 = vadd.f32 1e-05, %v1232_v5 }
 0xa2a   : > { %v1231_v9 = vpop.xlane.xlu0 %1230 }
 0xa2b   : > { %1876 = vrsqrt.f32 %v1234_v6  ;;  %v1233_v11 = vmul.f32 0.015625, %v1231_v9 }
 0xa2d   : > { %v1235_v12 = vadd.f32 1e-05, %v1233_v11 }
 0xa2f   : > { %1878 = vrsqrt.f32 %v1235_v12 }
 0xa35   : > { %v1877_v13 = vpop.eup %1876 }
 0xa36   : > { %v1238_v15 = vmul.f32 %v1877_v13, %v1222_v1 }
 0xa38   : > { %v1246_v17 = vmul.f32 %v1564_v14, %v1238_v15 }
 0xa39   : > { %v1879_v18 = vpop.eup %1878 }
 0xa3a   : > { %v1239_v7 = vmul.f32 %v1879_v18, %v1223_v47  ;;  %v1254_v8 = vadd.f32 %v1565_v16, %v1246_v17 }
 0xa3c   : > { %v1247_v10 = vmul.f32 %v1564_v14, %v1239_v7  ;;  %1691 = vmatprep.mubr.msk.f32.mxu0 %vm543_vm0, %v1254_v8 }
 0xa3e   : > { %v1255_v19 = vadd.f32 %v1565_v16, %v1247_v10 }
 0xa40   : > { %1692 = vmatmul.mubr.msk.f32.vlgmr.msra.gmra.mrb[8].mxu0 %vm543_vm0, %v1255_v19 }
 0xb13   : > { %v1693_v44 = vpop.f32.mrb[8].mxu0 }
 0xb14   : > { %v1349_v45 = vadd.f32 %v1693_v44, %v1566_v43  ;;  %v1343_v46 = vpop.f32.mrb[9].mxu0 }
 0xb15   : > { %v1344_v47 = vadd.f32 %v1566_v43, %v1343_v46 }
 0xb16   : > { %v1355_v1 = vmul.f32 0.044715, %v1349_v45  ;;  %v1353_v61 = vmul.f32 0.5, %v1349_v45 }
 0xb17   : > { %v1354_v48 = vmul.f32 0.044715, %v1344_v47  ;;  %v1352_v59 = vmul.f32 0.5, %v1344_v47 }
 0xb18   : > { %v1357_v0 = vmul.f32 %v1355_v1, %v1349_v45 }
 0xb19   : > { %v1356_v49 = vmul.f32 %v1354_v48, %v1344_v47 }
 0xb1a   : > { %v1359_v50 = vmul.f32 %v1357_v0, %v1349_v45 }
 0xb1b   : > { %v1358_v51 = vmul.f32 %v1356_v49, %v1344_v47 }
 0xb1c   : > { %v1361_v52 = vadd.f32 %v1359_v50, %v1349_v45 }
 0xb1d   : > { %v1360_v53 = vadd.f32 %v1358_v51, %v1344_v47 }
 0xb1e   : > { %v1363_v54 = vmul.f32 0.7978846, %v1361_v52 }
 0xb1f   : > { %v1362_v55 = vmul.f32 0.7978846, %v1360_v53 }
 0xb20   : > { %1880 = vtanh.f32 %v1363_v54 }
 0xb21   : > { %1882 = vtanh.f32 %v1362_v55 }
 0xb2a   : > { %v1881_v56 = vpop.eup %1880 }
 0xb2b   : > { %v1883_v57 = vpop.eup %1882  ;;  %v1367_v58 = vadd.f32 1.0, %v1881_v56 }
 0xb2c   : > { %v1366_v60 = vadd.f32 1.0, %v1883_v57 }
 0xb2d   : > { %v1369_v63 = vmul.f32 %v1367_v58, %v1353_v61 }
 0xb2e   : > { %v1368_v62 = vmul.f32 %v1366_v60, %v1352_v59 }
 0xb30   : > { %1726 = vmatprep.mubr.f32.mxu1 %v1368_v62 }
 0xb31   : > { %1727 = vmatmul.mubr.f32.vlgmr.msra.gmra.mrb[6].mxu1 %v1369_v63 }
 0xc04   : > { %v1728_v3 = vpop.f32.mrb[6].mxu1 }
 0xc05   : > { %v1465_v4 = vadd.f32 %v1728_v3, %v1569_v2  ;;  %v1459_v5 = vpop.f32.mrb[7].mxu1 }
 0xc06   : > { %v1460_v6 = vadd.f32 %v1569_v2, %v1459_v5 }
 0xc07   : > { %v1469_v9 = vadd.f32 %v1465_v4, %v2157_v39 }
 0xc08   : > { %v1468_v11 = vadd.f32 %v1460_v6, %v2160_v40 }
 0xc09   : > { %1471 = vst.msk [vmem:[%s535_s19 + $0x8] sm:$0xff] %vm543_vm0, %v1469_v9 }
 0xc0a   : > { %1470 = vst.msk [vmem:[%s535_s19] sm:$0xff] %vm543_vm0, %v1468_v11 }
 0xc0b PF: > { %s26_s21 = sadd.s32 1, %s1890_s21  }
 0xc0c   : > { %p23_p4 = scmp.ge.s32.totalorder %s26_s21, 4  }
 0xc0e   :  { %25 = sbr.rel (!%p23_p4) target bundleno = 2 (0x2), region = 117 }

// kernel: forward.6
= control target key start
LH: loop header
LB: loop body
LE: loop exit
PB: predicated region body
PF: predicated region fallthrough
CT: control target
= control target key end

     0   :  { %s2031_s21 = smov 0   ;;  %s2328_s0 = inlined_call_operand.vmem [shape: f32[2,16,64], index: 0, kind: input, shape index: {}]   ;;  %s2329_s1 = inlined_call_operand.vmem [shape: f32[2,1,16], index: 1, kind: input, shape index: {}]   ;;  %s2330_s2 = inlined_call_operand.vmem [shape: f32[1,64], index: 2, kind: input, shape index: {}]   ;;  %s2331_s3 = inlined_call_operand.vmem [shape: f32[1,64], index: 3, kind: input, shape index: {}]   ;;  %s2332_s4 = inlined_call_operand.vmem [shape: f32[64,192], index: 4, kind: input, shape index: {}]   ;;  %s2333_s5 = inlined_call_operand.vmem [shape: f32[1,192], index: 5, kind: input, shape index: {}]   ;;  %s2334_s6 = inlined_call_operand.vmem [shape: f32[64,64], index: 6, kind: input, shape index: {}]   ;;  %s2335_s7 = inlined_call_operand.vmem [shape: f32[1,64], index: 7, kind: input, shape index: {}]   ;;  %s2336_s8 = inlined_call_operand.vmem [shape: f32[1,64], index: 8, kind: input, shape index: {}]   ;;  %s2337_s9 = inlined_call_operand.vmem [shape: f32[1,64], index: 9, kind: input, shape index: {}]   ;;  %s2338_s10 = inlined_call_operand.vmem [shape: f32[64,128], index: 10, kind: input, shape index: {}]   ;;  %s2339_s11 = inlined_call_operand.vmem [shape: f32[1,128], index: 11, kind: input, shape index: {}]   ;;  %s2340_s12 = inlined_call_operand.vmem [shape: f32[128,64], index: 12, kind: input, shape index: {}]   ;;  %s2341_s13 = inlined_call_operand.vmem [shape: f32[1,64], index: 13, kind: input, shape index: {}]   ;;  %s2342_s14 = inlined_call_operand.vmem [shape: f32[1,64], index: 14, kind: input, shape index: {}]   ;;  %s2343_s15 = inlined_call_operand.vmem [shape: f32[1,64], index: 15, kind: input, shape index: {}]   ;;  %s2344_s16 = inlined_call_operand.vmem [shape: f32[2,16,64], index: 16, kind: output, shape index: {}]  }
   0x1   :  { %2345 = sst [smem:[#allocation2_spill]] %s2328_s0 }
   0x2 LB: > { %s1580_s22 = sadd.s32 4294967295, %s1940_s21   ;;  %p1584_p0 = scmp.ge.s32.totalorder %s1940_s21, 1  ;;  %s1940_s21 = sphi %s2031_s21, %s26_s21  }
   0x3   : > { %p470_p1 = scmp.lt.s32.totalorder %s1940_s21, 3 }
   0x5   : > { %p471_p2 = pnand %p1584_p0, %p470_p1 }
   0x6   : > { %p523_p3 = scmp.lt.s32.totalorder (!%p471_p2), %s1580_s22, 1  ;;  %vm543_vm0 = vcmask (!%p471_p2), 523264   ;;  %s2346_s26 = sld [smem:[#allocation2_spill]] (!%p471_p2)  ;;  %v588_v14 = vld [vmem:[%s2332_s4 + $0x8] sm:$0xff] (!%p471_p2)  ;;  %v590_v15 = vld [vmem:[%s2332_s4 + $0x18] sm:$0xff] (!%p471_p2)  ;;  %v587_v17 = vld [vmem:[%s2332_s4] sm:$0xff] (!%p471_p2)  ;;  %v605_v55 = vlaneseq (!%p471_p2) }
   0x7   : > { %474 = sbr.rel (%p471_p2) target bundleno = 3396 (0xd44), region = 84  ;;  %v1775_v16 = vpack.c.bf16 (!%p471_p2), %v590_v15, %v588_v14  ;;  %v589_v18 = vld [vmem:[%s2332_s4 + $0x10] sm:$0xff] (!%p471_p2)  ;;  %v592_v20 = vld [vmem:[%s2332_s4 + $0x28] sm:$0xff] (!%p471_p2)  ;;  %v594_v21 = vld [vmem:[%s2332_s4 + $0x38] sm:$0xff] (!%p471_p2)  ;;  %v1942_v33 = vmov (!%p471_p2), 0.0   ;;  %vm721_vm1 = vcmask (!%p471_p2), 261120  }
   0x8   : > { %v1777_v19 = vpack.c.bf16 (!%p471_p2), %v589_v18, %v587_v17  ;;  %v1779_v22 = vpack.c.bf16 (!%p471_p2), %v594_v21, %v592_v20  ;;  %v591_v23 = vld [vmem:[%s2332_s4 + $0x20] sm:$0xff] (!%p471_p2)  ;;  %v593_v24 = vld [vmem:[%s2332_s4 + $0x30] sm:$0xff] (!%p471_p2)  ;;  %v596_v26 = vld [vmem:[%s2332_s4 + $0x48] sm:$0xff] (!%p471_p2)  ;;  %685 = vmatprep.mubr.f32.mxu0 (!%p471_p2), %v1942_v33  ;;  %v606_v56 = vshrl.u32 (!%p471_p2), %v605_v55, 7  ;;  %s1943_s30 = smov (!%p471_p2), 64   ;;  %s1944_s0 = smov (!%p471_p2), 96  }
   0x9   : > { %1776 = vmatprep.subr.bf16.mxu0 (!%p471_p2), %v1775_v16  ;;  %v1781_v25 = vpack.c.bf16 (!%p471_p2), %v593_v24, %v591_v23  ;;  %v598_v27 = vld [vmem:[%s2332_s4 + $0x58] sm:$0xff] (!%p471_p2)  ;;  %v595_v28 = vld [vmem:[%s2332_s4 + $0x40] sm:$0xff] (!%p471_p2)  ;;  %v597_v30 = vld [vmem:[%s2332_s4 + $0x50] sm:$0xff] (!%p471_p2)  ;;  %vm807_vm3 = vcmask (!%p471_p2), 130048   ;;  %s1945_s20 = smov (!%p471_p2), 32  }
   0xa   : > { %1778 = vmatpush1.bf16.msra.mxu0 (!%p471_p2), %v1777_v19  ;;  %v1783_v29 = vpack.c.bf16 (!%p471_p2), %v598_v27, %v596_v26  ;;  %v600_v31 = vld [vmem:[%s2332_s4 + $0x68] sm:$0xff] (!%p471_p2)  ;;  %v602_v32 = vld [vmem:[%s2332_s4 + $0x78] sm:$0xff] (!%p471_p2)  ;;  %v1785_v34 = vpack.c.bf16 (!%p471_p2), %v597_v30, %v595_v28  ;;  %v599_v36 = vld [vmem:[%s2332_s4 + $0x60] sm:$0xff] (!%p471_p2)  ;;  %v607_v57 = vsub.s32 (!%p471_p2), 0, %v606_v56  ;;  %v611_v60 = vsub.s32 (!%p471_p2), 1, %v606_v56 }
   0xb   : > { %1780 = vmatprep.subr.bf16.mxu0 (!%p471_p2), %v1779_v22  ;;  %v1787_v35 = vpack.c.bf16 (!%p471_p2), %v602_v32, %v600_v31  ;;  %v601_v37 = vld [vmem:[%s2332_s4 + $0x70] sm:$0xff] (!%p471_p2)  ;;  %v1589_v46 = vld [vmem:[%s2330_s2] ss:$0 sm:$0xff] (!%p471_p2)  ;;  %vm2131_vm2 = vmpackc.low (!%p471_p2), %vm721_vm1, %vm721_vm1 }
   0xc   : > { %v1789_v38 = vpack.c.bf16 (!%p471_p2), %v601_v37, %v599_v36  ;;  %v1590_v48 = vld [vmem:[%s2331_s3] ss:$0 sm:$0xff] (!%p471_p2) }
   0xd   : > { %v603_v58 = vld [vmem:[%s2333_s5] sm:$0x3] (!%p471_p2) }
   0xe   : > { %s2350_s22 = smov (!%p523_p3, %s1580_s22), 1  ;;  %1782 = vmatpush1.bf16.msra.mxu0 %v1781_v25  ;;  %v608_v59 = vrot.slane %v603_v58, %v607_v57 }
   0xf   : > { %s1618_s23 = sshll.u32 %s2350_s22, 4  ;;  %1784 = vmatprep.subr.bf16.mxu0 %v1783_v29  ;;  %s530_s19 = scalar_lea.vmem %s2329_s1, %s2350_s22 }
  0x10   : > { %s527_s27 = scalar_lea.vmem %s2346_s26, %s1618_s23  ;;  %v538_v18 = vld [vmem:[%s530_s19] sm:$0x1]  ;;  %s535_s17 = scalar_lea.vmem %s2344_s16, %s1618_s23 }
  0x11   : > { %v2047_v0 = vld [vmem:[%s527_s27] sm:$0xff]  ;;  %v2049_v1 = vld [vmem:[%s527_s27 + $0x8] sm:$0xff]  ;;  %v539_v19 = vsub.f32 1.0, %v538_v18 }
  0x12   : > { %v544_v2 = vsel %vm543_vm0, %v2047_v0, 0.0  ;;  %v547_v3 = vsel %vm543_vm0, %v2049_v1, 0.0  ;;  %1786 = vmatpush1.bf16.msra.mxu0 %v1785_v34 }
  0x13   : > { %545 = vadd.xlane.f32.xlu0 %v544_v2  ;;  %1788 = vmatprep.subr.bf16.mxu0 %v1787_v35  ;;  %v612_v2 = vrot.slane %v603_v58, %v611_v60  ;;  %v540_v20 = vmul.f32 -1e+09, %v539_v19 }
  0x15   : > { %v713_v21 = vrot.slane %v540_v20, %v607_v57  ;;  %v701_v20 = vld [vmem:[%s2334_s6 + $0x18] sm:$0xff] }
  0x16   : > { %1790 = vmatpush1.bf16.msra.mxu0 %v1789_v38 }
  0x17   : > { %548 = vadd.xlane.f32.xlu0 %v547_v3 }
  0xa0   : > { %v546_v4 = vpop.xlane.xlu0 %545 }
  0xa1   : > { %v551_v5 = vmul.f32 0.015625, %v546_v4 }
  0xa3   : > { %v553_v6 = vsub.f32 %v2047_v0, %v551_v5 }
  0xa4   : > { %v549_v7 = vpop.xlane.xlu0 %548 }
  0xa5   : > { %v552_v8 = vmul.f32 0.015625, %v549_v7  ;;  %v555_v9 = vmul.f32 %v553_v6, %v553_v6 }
  0xa7   : > { %v554_v10 = vsub.f32 %v2049_v1, %v552_v8  ;;  %v557_v11 = vsel %vm543_vm0, %v555_v9, 0.0 }
  0xa8   : > { %558 = vadd.xlane.f32.xlu1 %v557_v11 }
  0xa9   : > { %v556_v12 = vmul.f32 %v554_v10, %v554_v10 }
  0xab   : > { %v560_v13 = vsel %vm543_vm0, %v556_v12, 0.0 }
  0xac   : > { %561 = vadd.xlane.f32.xlu1 %v560_v13 }
 0x135   : > { %v559_v39 = vpop.xlane.xlu1 %558 }
 0x136   : > { %v563_v40 = vmul.f32 0.015625, %v559_v39 }
 0x138   : > { %v565_v41 = vadd.f32 1e-05, %v563_v40 }
 0x139   : > { %v562_v42 = vpop.xlane.xlu1 %561 }
 0x13a   : > { %1902 = vrsqrt.f32 %v565_v41  ;;  %v564_v43 = vmul.f32 0.015625, %v562_v42 }
 0x13c   : > { %v566_v44 = vadd.f32 1e-05, %v564_v43 }
 0x13e   : > { %1904 = vrsqrt.f32 %v566_v44 }
 0x144   : > { %v1903_v45 = vpop.eup %1902 }
 0x145   : > { %v569_v47 = vmul.f32 %v1903_v45, %v553_v6 }
 0x147   : > { %v577_v49 = vmul.f32 %v1589_v46, %v569_v47 }
 0x148   : > { %v1905_v50 = vpop.eup %1904 }
 0x149   : > { %v585_v51 = vadd.f32 %v1590_v48, %v577_v49  ;;  %v570_v52 = vmul.f32 %v1905_v50, %v554_v10 }
 0x14b   : > { %1591 = vmatmul.mubr.msk.f32.vlgmr.msra.gmra.mrb[0].mxu0 %vm543_vm0, %v585_v51  ;;  %v578_v53 = vmul.f32 %v1589_v46, %v570_v52 }
 0x14c   : > { %691 = vmatprep.mubr.f32.mxu0 %v1942_v33 }
 0x14d   : > { %v586_v54 = vadd.f32 %v1590_v48, %v578_v53 }
 0x14f   : > { %1592 = vmatmul.mubr.msk.f32.gmra.mrb[2].mxu0 %vm543_vm0, %v586_v54 }
 0x21e   : > { %v687_v61 = vpop.f32.mrb[0].mxu0 }
 0x21f   : > { %v688_v62 = vadd.f32 %v687_v61, %v608_v59  ;;  %v689_v63 = vpop.f32.mrb[1].mxu0 }
 0x220   : > { %v2119_v7 = vadd.f32 %v689_v63, %v612_v2 }
 0x221   : > { %v707_v3 = vmul.f32 0.17677669, %v688_v62 }
 0x222   : > { %v693_v4 = vpop.f32.mrb[2].mxu0 }
 0x223   : > { %v694_v5 = vadd.f32 %v693_v4, %v608_v59  ;;  %v695_v6 = vpop.f32.mrb[3].mxu0  ;;  %1678 = vmatprep.mubr.msk.f32.mxu1 %vm721_vm1, %v707_v3 }
 0x224   : > { %v2121_v8 = vadd.f32 %v695_v6, %v612_v2 }
 0x225   : > { %v1887_v9 = vpack.i.bf16 %v694_v5, %v688_v62  ;;  %v708_v12 = vmul.f32 0.17677669, %v694_v5 }
 0x226   : > { %v1897_v10 = vpack.i.bf16 %v2121_v8, %v2119_v7  ;;  %v1797_v11 = vpack.c.bf16 %v2121_v8, %v2119_v7  ;;  %v698_v7 = vld [vmem:[%s2334_s6] sm:$0xff]  ;;  %v699_v8 = vld [vmem:[%s2334_s6 + $0x8] sm:$0xff] }
 0x227   : > { %1888 = vrot.lane.b32.xlu0 %v1887_v9, %s1943_s30  ;;  %v1811_v19 = vpack.c.bf16 %v699_v8, %v698_v7 }
 0x22b   : > { %911 = vrot.lane.b32.xlu0 %v707_v3, %s1944_s0 }
 0x22f   : > { %913 = vrot.lane.b32.xlu0 %v708_v12, %s1944_s0 }
 0x299   : > { %v1889_v13 = vpop.permute.xlu0 %1888 }
 0x29a   : > { %v1891_v14 = vunpack.i.h.bf16 %v1889_v13  ;;  %v1890_v15 = vunpack.i.l.bf16 %v1889_v13 }
 0x29c   : > { %v1791_v17 = vpack.c.bf16 %v1891_v14, %v1890_v15 }
 0x29d   : > { %v912_v48 = vpop.permute.xlu0 %911 }
 0x29e   : > { %1793 = vmatprep.subr.msk.bf16.mxu1 %vm2131_vm2, %v1791_v17 }
 0x29f   : > { %1796 = vmatpush3.bf16.xpose.msk.msra.mxu1 %vm2131_vm2, %v1791_v17 }
 0x2a0   : > { %1798 = vmatprep.subr.bf16.mxu1 %v1797_v11 }
 0x2a1   : > { %v914_v49 = vpop.permute.xlu0 %913 }
 0x2a6   : > { %1679 = vmatmul.mubr.msk.f32.vlgmr.msra.gmra.mrb[0].mxu1 %vm721_vm1, %v708_v12 }
 0x2a7   : > { %1800 = vmatpush3.bf16.msra.mxu1 %v1797_v11 }
 0x379   : > { %v1680_v22 = vpop.f32.mrb[0].mxu1 }
 0x37a   : > { %v798_v23 = vpop.f32.mrb[1].mxu1  ;;  %v804_v25 = vadd.f32 %v1680_v22, %v713_v21  ;;  %v702_v22 = vld [vmem:[%s2334_s6 + $0x20] sm:$0xff] }
 0x37b   : > { %v799_v24 = vadd.f32 %v798_v23, %v713_v21  ;;  %v703_v23 = vld [vmem:[%s2334_s6 + $0x28] sm:$0xff] }
 0x37c   : > { %v811_v27 = vsel %vm807_vm3, %v804_v25, -inf }
 0x37d   : > { %v808_v26 = vsel %vm807_vm3, %v799_v24, -inf }
 0x37e   : > { %809 = vmax.xlane.f32.xlu1 %v808_v26  ;;  %v705_v26 = vld [vmem:[%s2334_s6 + $0x38] sm:$0xff] }
 0x382   : > { %812 = vmax.xlane.f32.xlu1 %v811_v27 }
 0x40b   : > { %v810_v28 = vpop.xlane.xlu1 %809 }
 0x40c   : > { %v814_v29 = vsub.f32 %v799_v24, %v810_v28  ;;  %v1819_v24 = vpack.c.bf16 %v703_v23, %v702_v22  ;;  %v1374_v23 = vld [vmem:[%s2340_s12 + $0x20] sm:$0xff] }
 0x40e   : > { %v816_v32 = vmul.f32 1.442695, %v814_v29 }
 0x40f   : > { %v813_v30 = vpop.xlane.xlu1 %812 }
 0x410   : > { %v815_v31 = vsub.f32 %v804_v25, %v813_v30  ;;  %v704_v25 = vld [vmem:[%s2334_s6 + $0x30] sm:$0xff] }
 0x411   : > { %v1823_v27 = vpack.c.bf16 %v705_v26, %v704_v25  ;;  %v1376_v26 = vld [vmem:[%s2340_s12 + $0x30] sm:$0xff] }
 0x412   : > { %v818_v33 = vmul.f32 1.442695, %v815_v31 }
 0x414   : > { %1906 = vpow2.f32 %v818_v33 }
 0x415   : > { %1908 = vpow2.f32 %v816_v32 }
 0x41e   : > { %v1907_v34 = vpop.eup %1906 }
 0x41f   : > { %v823_v35 = vsel %vm807_vm3, %v1907_v34, 0.0  ;;  %v1909_v36 = vpop.eup %1908 }
 0x420   : > { %824 = vadd.xlane.f32.xlu1 %v823_v35  ;;  %v820_v37 = vsel %vm807_vm3, %v1909_v36, 0.0 }
 0x424   : > { %821 = vadd.xlane.f32.xlu1 %v820_v37 }
 0x435   : > { %1893 = vrot.lane.b32.xlu1 %v1887_v9, %s1945_s20 }
 0x4ad   : > { %v825_v38 = vpop.xlane.xlu1 %824 }
 0x4ae   : > { %1910 = vrcp.f32 %v825_v38 }
 0x4b1   : > { %v822_v39 = vpop.xlane.xlu1 %821 }
 0x4b2   : > { %1912 = vrcp.f32 %v822_v39 }
 0x4b5   : > { %v1894_v40 = vpop.permute.xlu1 %1893 }
 0x4b6   : > { %v1896_v41 = vunpack.i.h.bf16 %v1894_v40  ;;  %v1895_v42 = vunpack.i.l.bf16 %v1894_v40 }
 0x4b8   : > { %v1801_v43 = vpack.c.bf16 %v1896_v41, %v1895_v42  ;;  %v1911_v44 = vpop.eup %1910 }
 0x4b9   : > { %v829_v47 = vmul.f32 %v1911_v44, %v1907_v34  ;;  %v1605_v34 = vld [vmem:[%s2335_s7] ss:$0 sm:$0xff] }
 0x4ba   : > { %1803 = vmatprep.subr.msk.bf16.mxu1 %vm2131_vm2, %v1801_v43 }
 0x4bc   : > { %v1913_v45 = vpop.eup %1912 }
 0x4bd   : > { %v828_v46 = vmul.f32 %v1913_v45, %v1909_v36 }
 0x4bf   : > { %1685 = vmatprep.mubr.msk.f32.mxu1 %vm807_vm3, %v828_v46 }
 0x4c0   : > { %1686 = vmatmul.mubr.msk.f32.vlgmr.msra.gmra.mrb[2].mxu1 %vm807_vm3, %v829_v47 }
 0x4c1   : > { %1806 = vmatpush3.bf16.xpose.msk.msra.mxu1 %vm2131_vm2, %v1801_v43  ;;  %1692 = vmatprep.mubr.msk.f32.mxu1 %vm721_vm1, %v912_v48 }
 0x4c8   : > { %1693 = vmatmul.mubr.msk.f32.vlgmr.msra.gmra.mrb[4].mxu1 %vm721_vm1, %v914_v49 }
 0x593   : > { %v2157_v50 = vpop.f32.mrb[2].mxu1 }
 0x594   : > { %v2159_v51 = vpop.f32.mrb[3].mxu1 }
 0x59b   : > { %v1694_v52 = vpop.f32.mrb[4].mxu1 }
 0x59c   : > { %v999_v53 = vadd.f32 %v1694_v52, %v713_v21  ;;  %v993_v54 = vpop.f32.mrb[5].mxu1  ;;  %v1257_v52 = vld [vmem:[%s2338_s10 + $0x8] sm:$0xff] }
 0x59d   : > { %v994_v55 = vadd.f32 %v993_v54, %v713_v21  ;;  %v1258_v54 = vld [vmem:[%s2338_s10 + $0x10] sm:$0xff] }
 0x59e   : > { %v1005_v56 = vsel %vm807_vm3, %v999_v53, -inf }
 0x59f   : > { %1006 = vmax.xlane.f32.xlu1 %v1005_v56  ;;  %v1002_v57 = vsel %vm807_vm3, %v994_v55, -inf }
 0x5a0   : > { %1003 = vmax.xlane.f32.xlu0 %v1002_v57  ;;  %v1260_v57 = vld [vmem:[%s2338_s10 + $0x20] sm:$0xff] }
 0x62c   : > { %v1007_v58 = vpop.xlane.xlu1 %1006 }
 0x62d   : > { %v1009_v59 = vsub.f32 %v999_v53, %v1007_v58  ;;  %v1004_v60 = vpop.xlane.xlu0 %1003  ;;  %v1261_v58 = vld [vmem:[%s2338_s10 + $0x28] sm:$0xff] }
 0x62e   : > { %v1008_v61 = vsub.f32 %v994_v55, %v1004_v60  ;;  %v1259_v55 = vld [vmem:[%s2338_s10 + $0x18] sm:$0xff]  ;;  %v1262_v60 = vld [vmem:[%s2338_s10 + $0x30] sm:$0xff] }
 0x62f   : > { %v1012_v62 = vmul.f32 1.442695, %v1009_v59  ;;  %v1831_v56 = vpack.c.bf16 %v1259_v55, %v1258_v54  ;;  %v1835_v59 = vpack.c.bf16 %v1261_v58, %v1260_v57 }
 0x630   : > { %v1010_v63 = vmul.f32 1.442695, %v1008_v61  ;;  %v1263_v61 = vld [vmem:[%s2338_s10 + $0x38] sm:$0xff] }
 0x631   : > { %1914 = vpow2.f32 %v1012_v62  ;;  %v1839_v62 = vpack.c.bf16 %v1263_v61, %v1262_v60 }
 0x632   : > { %1916 = vpow2.f32 %v1010_v63  ;;  %v1370_v63 = vld [vmem:[%s2340_s12] sm:$0xff] }
 0x63b   : > { %v1915_v2 = vpop.eup %1914 }
 0x63c   : > { %v1017_v3 = vsel %vm807_vm3, %v1915_v2, 0.0  ;;  %v1917_v4 = vpop.eup %1916 }
 0x63d   : > { %1018 = vadd.xlane.f32.xlu0 %v1017_v3  ;;  %v1014_v5 = vsel %vm807_vm3, %v1917_v4, 0.0 }
 0x641   : > { %1015 = vadd.xlane.f32.xlu0 %v1014_v5 }
 0x657   : > { %1898 = vrot.lane.b32.xlu0 %v1897_v10, %s1944_s0  ;;  %v700_v10 = vld [vmem:[%s2334_s6 + $0x10] sm:$0xff] }
 0x658   : > { %v1815_v21 = vpack.c.bf16 %v701_v20, %v700_v10  ;;  %v1372_v20 = vld [vmem:[%s2340_s12 + $0x10] sm:$0xff] }
 0x6ca   : > { %v1019_v6 = vpop.xlane.xlu0 %1018 }
 0x6cb   : > { %1918 = vrcp.f32 %v1019_v6 }
 0x6ce   : > { %v1016_v9 = vpop.xlane.xlu0 %1015 }
 0x6cf   : > { %1920 = vrcp.f32 %v1016_v9 }
 0x6d2   : > { %v1899_v11 = vpop.permute.xlu0 %1898 }
 0x6d3   : > { %v1901_v12 = vunpack.i.h.bf16 %v1899_v11  ;;  %v1900_v13 = vunpack.i.l.bf16 %v1899_v11 }
 0x6d5   : > { %v1807_v14 = vpack.c.bf16 %v1901_v12, %v1900_v13  ;;  %v1919_v15 = vpop.eup %1918 }
 0x6d6   : > { %v1023_v18 = vmul.f32 %v1919_v15, %v1915_v2  ;;  %v1371_v2 = vld [vmem:[%s2340_s12 + $0x8] sm:$0xff] }
 0x6d7   : > { %1808 = vmatprep.subr.bf16.mxu0 %v1807_v14  ;;  %v1843_v3 = vpack.c.bf16 %v1371_v2, %v1370_v63  ;;  %v1613_v2 = vld [vmem:[%s2341_s13] ss:$0 sm:$0xff] }
 0x6d8   : > { %1810 = vmatpush3.bf16.msra.mxu0 %v1807_v14  ;;  %v1608_v14 = vld [vmem:[%s2336_s8] ss:$0 sm:$0xff] }
 0x6d9   : > { %v1921_v16 = vpop.eup %1920  ;;  %1812 = vmatprep.subr.bf16.mxu0 %v1811_v19  ;;  %1844 = vmatprep.subr.bf16.mxu1 %v1843_v3 }
 0x6da   : > { %v1022_v17 = vmul.f32 %v1921_v16, %v1917_v4  ;;  %1846 = vmatpush3.bf16.msra.mxu1 %v1843_v3  ;;  %v1609_v16 = vld [vmem:[%s2337_s9] ss:$0 sm:$0xff] }
 0x6dc   : > { %1699 = vmatprep.mubr.msk.f32.mxu0 %vm807_vm3, %v1022_v17 }
 0x6dd   : > { %1700 = vmatmul.mubr.msk.f32.vlgmr.msra.gmra.mrb[4].mxu0 %vm807_vm3, %v1023_v18 }
 0x6de   : > { %1814 = vmatpush3.bf16.msra.mxu0 %v1811_v19 }
 0x6df   : > { %1816 = vmatprep.subr.bf16.mxu0 %v1815_v21 }
 0x6e2   : > { %1818 = vmatpush3.bf16.msra.mxu0 %v1815_v21  ;;  %v1373_v21 = vld [vmem:[%s2340_s12 + $0x18] sm:$0xff] }
 0x6e3   : > { %1820 = vmatprep.subr.bf16.mxu0 %v1819_v24  ;;  %v1847_v22 = vpack.c.bf16 %v1373_v21, %v1372_v20 }
 0x6e5   : > { %1848 = vmatprep.subr.bf16.mxu1 %v1847_v22 }
 0x6e6   : > { %1822 = vmatpush3.bf16.msra.mxu0 %v1819_v24  ;;  %1850 = vmatpush3.bf16.msra.mxu1 %v1847_v22  ;;  %v1375_v24 = vld [vmem:[%s2340_s12 + $0x28] sm:$0xff] }
 0x6e7   : > { %1824 = vmatprep.subr.bf16.mxu0 %v1823_v27  ;;  %v1851_v25 = vpack.c.bf16 %v1375_v24, %v1374_v23 }
 0x6e9   : > { %1852 = vmatprep.subr.bf16.mxu1 %v1851_v25 }
 0x6ea   : > { %1826 = vmatpush3.bf16.msra.mxu0 %v1823_v27  ;;  %1854 = vmatpush3.bf16.msra.mxu1 %v1851_v25  ;;  %v1377_v27 = vld [vmem:[%s2340_s12 + $0x38] sm:$0xff] }
 0x7b0   : > { %v1701_v28 = vpop.f32.mrb[4].mxu0 }
 0x7b1   : > { %v1104_v29 = vpop.f32.mrb[5].mxu0 }
 0x7b2   : > { %1115 = vrot.lane.b32.xlu1 %v1104_v29, %s1945_s20  ;;  %v1378_v29 = vld [vmem:[%s2340_s12 + $0x40] sm:$0xff] }
 0x7b6   : > { %1117 = vrot.lane.b32.xlu1 %v1701_v28, %s1945_s20  ;;  %v1855_v28 = vpack.c.bf16 %v1377_v27, %v1376_v26  ;;  %v1614_v26 = vld [vmem:[%s2342_s14] ss:$0 sm:$0xff] }
 0x7b8   : > { %1856 = vmatprep.subr.bf16.mxu1 %v1855_v28 }
 0x7b9   : > { %1858 = vmatpush3.bf16.msra.mxu1 %v1855_v28 }
 0x824   : > { %v1116_v30 = vpop.permute.xlu1 %1115 }
 0x825   : > { %v1121_v31 = vsel %vm721_vm1, %v2159_v51, %v1116_v30  ;;  %v1256_v51 = vld [vmem:[%s2338_s10] sm:$0xff]  ;;  %v1379_v30 = vld [vmem:[%s2340_s12 + $0x48] sm:$0xff] }
 0x826   : > { %1718 = vmatprep.mubr.msk.f32.mxu0 %vm543_vm0, %v1121_v31  ;;  %v1827_v53 = vpack.c.bf16 %v1257_v52, %v1256_v51  ;;  %v1380_v31 = vld [vmem:[%s2340_s12 + $0x50] sm:$0xff] }
 0x828   : > { %v1118_v32 = vpop.permute.xlu1 %1117  ;;  %1828 = vmatprep.subr.bf16.mxu0 %v1827_v53 }
 0x829   : > { %v1122_v33 = vsel %vm721_vm1, %v2157_v50, %v1118_v32  ;;  %v1859_v32 = vpack.c.bf16 %v1379_v30, %v1378_v29  ;;  %v1615_v29 = vld [vmem:[%s2343_s15] ss:$0 sm:$0xff] }
 0x82a   : > { %1719 = vmatmul.mubr.msk.f32.vlgmr.msra.gmra.mrb[6].mxu0 %vm543_vm0, %v1122_v33  ;;  %v1381_v33 = vld [vmem:[%s2340_s12 + $0x58] sm:$0xff] }
 0x82b   : > { %1830 = vmatpush3.bf16.msra.mxu0 %v1827_v53  ;;  %1860 = vmatprep.subr.bf16.mxu1 %v1859_v32 }
 0x82c   : > { %1832 = vmatprep.subr.bf16.mxu0 %v1831_v56  ;;  %1862 = vmatpush3.bf16.msra.mxu1 %v1859_v32 }
 0x82f   : > { %1834 = vmatpush3.bf16.msra.mxu0 %v1831_v56 }
 0x830   : > { %1836 = vmatprep.subr.bf16.mxu0 %v1835_v59 }
 0x833   : > { %1838 = vmatpush3.bf16.msra.mxu0 %v1835_v59 }
 0x834   : > { %1840 = vmatprep.subr.bf16.mxu0 %v1839_v62 }
 0x837   : > { %1842 = vmatpush3.bf16.msra.mxu0 %v1839_v62 }
 0x8fd   : > { %v1720_v35 = vpop.f32.mrb[6].mxu0 }
 0x8fe   : > { %v1207_v36 = vadd.f32 %v1720_v35, %v1605_v34  ;;  %v1201_v37 = vpop.f32.mrb[7].mxu0  ;;  %v1382_v35 = vld [vmem:[%s2340_s12 + $0x60] sm:$0xff] }
 0x8ff   : > { %v1202_v38 = vadd.f32 %v1605_v34, %v1201_v37  ;;  %v1863_v34 = vpack.c.bf16 %v1381_v33, %v1380_v31 }
 0x900   : > { %v2207_v39 = vadd.f32 %v1207_v36, %v2049_v1  ;;  %v1383_v36 = vld [vmem:[%s2340_s12 + $0x68] sm:$0xff] }
 0x901   : > { %v2210_v40 = vadd.f32 %v1202_v38, %v2047_v0  ;;  %1864 = vmatprep.subr.bf16.mxu1 %v1863_v34  ;;  %v1867_v37 = vpack.c.bf16 %v1383_v36, %v1382_v35  ;;  %v1384_v38 = vld [vmem:[%s2340_s12 + $0x70] sm:$0xff] }
 0x902   : > { %v1217_v41 = vsel %vm543_vm0, %v2207_v39, 0.0  ;;  %1866 = vmatpush3.bf16.msra.mxu1 %v1863_v34 }
 0x903   : > { %1218 = vadd.xlane.f32.xlu0 %v1217_v41  ;;  %v1214_v42 = vsel %vm543_vm0, %v2210_v40, 0.0  ;;  %v1385_v41 = vld [vmem:[%s2340_s12 + $0x78] sm:$0xff]  ;;  %1868 = vmatprep.subr.bf16.mxu1 %v1867_v37 }
 0x904   : > { %1215 = vadd.xlane.f32.xlu1 %v1214_v42  ;;  %v1871_v42 = vpack.c.bf16 %v1385_v41, %v1384_v38 }
 0x906   : > { %1870 = vmatpush3.bf16.msra.mxu1 %v1867_v37 }
 0x907   : > { %1872 = vmatprep.subr.bf16.mxu1 %v1871_v42 }
 0x90a   : > { %1874 = vmatpush3.bf16.msra.mxu1 %v1871_v42 }
 0x990   : > { %v1219_v43 = vpop.xlane.xlu0 %1218 }
 0x991   : > { %v1221_v44 = vmul.f32 0.015625, %v1219_v43  ;;  %v1216_v45 = vpop.xlane.xlu1 %1215  ;;  %v1610_v43 = vld [vmem:[%s2339_s11] ss:$0 sm:$0xff] }
 0x992   : > { %v1220_v46 = vmul.f32 0.015625, %v1216_v45 }
 0x993   : > { %v1223_v47 = vsub.f32 %v2207_v39, %v1221_v44 }
 0x994   : > { %v1222_v1 = vsub.f32 %v2210_v40, %v1220_v46 }
 0x995   : > { %v1225_v49 = vmul.f32 %v1223_v47, %v1223_v47 }
 0x996   : > { %v1224_v48 = vmul.f32 %v1222_v1, %v1222_v1 }
 0x997   : > { %v1229_v50 = vsel %vm543_vm0, %v1225_v49, 0.0 }
 0x998   : > { %v1226_v0 = vsel %vm543_vm0, %v1224_v48, 0.0 }
 0x999   : > { %1227 = vadd.xlane.f32.xlu0 %v1226_v0 }
 0x99d   : > { %1230 = vadd.xlane.f32.xlu0 %v1229_v50 }
 0xa26   : > { %v1228_v4 = vpop.xlane.xlu0 %1227 }
 0xa27   : > { %v1232_v5 = vmul.f32 0.015625, %v1228_v4 }
 0xa29   : > { %v1234_v6 = vadd.f32 1e-05, %v1232_v5 }
 0xa2a   : > { %v1231_v9 = vpop.xlane.xlu0 %1230 }
 0xa2b   : > { %1922 = vrsqrt.f32 %v1234_v6  ;;  %v1233_v11 = vmul.f32 0.015625, %v1231_v9 }
 0xa2d   : > { %v1235_v12 = vadd.f32 1e-05, %v1233_v11 }
 0xa2f   : > { %1924 = vrsqrt.f32 %v1235_v12 }
 0xa35   : > { %v1923_v13 = vpop.eup %1922 }
 0xa36   : > { %v1238_v15 = vmul.f32 %v1923_v13, %v1222_v1 }
 0xa38   : > { %v1246_v17 = vmul.f32 %v1608_v14, %v1238_v15 }
 0xa39   : > { %v1925_v18 = vpop.eup %1924 }
 0xa3a   : > { %v1239_v7 = vmul.f32 %v1925_v18, %v1223_v47  ;;  %v1254_v8 = vadd.f32 %v1609_v16, %v1246_v17 }
 0xa3c   : > { %v1247_v10 = vmul.f32 %v1608_v14, %v1239_v7  ;;  %1737 = vmatprep.mubr.msk.f32.mxu0 %vm543_vm0, %v1254_v8 }
 0xa3e   : > { %v1255_v19 = vadd.f32 %v1609_v16, %v1247_v10 }
 0xa40   : > { %1738 = vmatmul.mubr.msk.f32.vlgmr.msra.gmra.mrb[8].mxu0 %vm543_vm0, %v1255_v19 }
 0xb13   : > { %v1739_v44 = vpop.f32.mrb[8].mxu0 }
 0xb14   : > { %v1349_v45 = vadd.f32 %v1739_v44, %v1610_v43  ;;  %v1343_v46 = vpop.f32.mrb[9].mxu0 }
 0xb15   : > { %v1344_v47 = vadd.f32 %v1610_v43, %v1343_v46 }
 0xb16   : > { %v1355_v1 = vmul.f32 0.044715, %v1349_v45  ;;  %v1353_v61 = vmul.f32 0.5, %v1349_v45 }
 0xb17   : > { %v1354_v48 = vmul.f32 0.044715, %v1344_v47  ;;  %v1352_v59 = vmul.f32 0.5, %v1344_v47 }
 0xb18   : > { %v1357_v0 = vmul.f32 %v1355_v1, %v1349_v45 }
 0xb19   : > { %v1356_v49 = vmul.f32 %v1354_v48, %v1344_v47 }
 0xb1a   : > { %v1359_v50 = vmul.f32 %v1357_v0, %v1349_v45 }
 0xb1b   : > { %v1358_v51 = vmul.f32 %v1356_v49, %v1344_v47 }
 0xb1c   : > { %v1361_v52 = vadd.f32 %v1359_v50, %v1349_v45 }
 0xb1d   : > { %v1360_v53 = vadd.f32 %v1358_v51, %v1344_v47 }
 0xb1e   : > { %v1363_v54 = vmul.f32 0.7978846, %v1361_v52 }
 0xb1f   : > { %v1362_v55 = vmul.f32 0.7978846, %v1360_v53 }
 0xb20   : > { %1926 = vtanh.f32 %v1363_v54 }
 0xb21   : > { %1928 = vtanh.f32 %v1362_v55 }
 0xb2a   : > { %v1927_v56 = vpop.eup %1926 }
 0xb2b   : > { %v1929_v57 = vpop.eup %1928  ;;  %v1367_v58 = vadd.f32 1.0, %v1927_v56 }
 0xb2c   : > { %v1366_v60 = vadd.f32 1.0, %v1929_v57 }
 0xb2d   : > { %v1369_v63 = vmul.f32 %v1367_v58, %v1353_v61 }
 0xb2e   : > { %v1368_v62 = vmul.f32 %v1366_v60, %v1352_v59 }
 0xb30   : > { %1772 = vmatprep.mubr.f32.mxu1 %v1368_v62 }
 0xb31   : > { %1773 = vmatmul.mubr.f32.vlgmr.msra.gmra.mrb[6].mxu1 %v1369_v63 }
 0xc04   : > { %v1774_v3 = vpop.f32.mrb[6].mxu1 }
 0xc05   : > { %v1465_v4 = vadd.f32 %v1774_v3, %v1613_v2  ;;  %v1459_v5 = vpop.f32.mrb[7].mxu1 }
 0xc06   : > { %v1460_v6 = vadd.f32 %v1613_v2, %v1459_v5 }
 0xc07   : > { %v1469_v9 = vadd.f32 %v1465_v4, %v2207_v39 }
 0xc08   : > { %v1468_v11 = vadd.f32 %v1460_v6, %v2210_v40 }
 0xc09   : > { %v1475_v12 = vsel %vm543_vm0, %v1469_v9, 0.0 }
 0xc0a   : > { %1476 = vadd.xlane.f32.xlu0 %v1475_v12  ;;  %v1472_v13 = vsel %vm543_vm0, %v1468_v11, 0.0 }
 0xc0b   : > { %1473 = vadd.xlane.f32.xlu1 %v1472_v13 }
 0xc97   : > { %v1477_v14 = vpop.xlane.xlu0 %1476 }
 0xc98   : > { %v1479_v15 = vmul.f32 0.015625, %v1477_v14  ;;  %v1474_v16 = vpop.xlane.xlu1 %1473 }
 0xc99   : > { %v1478_v17 = vmul.f32 0.015625, %v1474_v16 }
 0xc9a   : > { %v1481_v18 = vsub.f32 %v1469_v9, %v1479_v15 }
 0xc9b   : > { %v1480_v7 = vsub.f32 %v1468_v11, %v1478_v17 }
 0xc9c   : > { %v1483_v8 = vmul.f32 %v1481_v18, %v1481_v18 }
 0xc9d   : > { %v1482_v10 = vmul.f32 %v1480_v7, %v1480_v7 }
 0xc9e   : > { %v1487_v19 = vsel %vm543_vm0, %v1483_v8, 0.0 }
 0xc9f   : > { %1488 = vadd.xlane.f32.xlu0 %v1487_v19  ;;  %v1484_v39 = vsel %vm543_vm0, %v1482_v10, 0.0 }
 0xca0   : > { %1485 = vadd.xlane.f32.xlu1 %v1484_v39 }
 0xd2c   : > { %v1489_v40 = vpop.xlane.xlu0 %1488 }
 0xd2d   : > { %v1491_v20 = vmul.f32 0.015625, %v1489_v40  ;;  %v1486_v21 = vpop.xlane.xlu1 %1485 }
 0xd2e   : > { %v1490_v22 = vmul.f32 0.015625, %v1486_v21 }
 0xd2f   : > { %v1493_v23 = vadd.f32 1e-05, %v1491_v20 }
 0xd30   : > { %v1492_v24 = vadd.f32 1e-05, %v1490_v22 }
 0xd31   : > { %1930 = vrsqrt.f32 %v1493_v23 }
 0xd32   : > { %1932 = vrsqrt.f32 %v1492_v24 }
 0xd3b   : > { %v1931_v25 = vpop.eup %1930 }
 0xd3c   : > { %v1933_v27 = vpop.eup %1932  ;;  %v1497_v28 = vmul.f32 %v1931_v25, %v1481_v18 }
 0xd3d   : > { %v1496_v30 = vmul.f32 %v1933_v27, %v1480_v7 }
 0xd3e   : > { %v1505_v31 = vmul.f32 %v1614_v26, %v1497_v28 }
 0xd3f   : > { %v1504_v32 = vmul.f32 %v1614_v26, %v1496_v30 }
 0xd40   : > { %v1513_v33 = vadd.f32 %v1615_v29, %v1505_v31 }
 0xd41   : > { %v1512_v34 = vadd.f32 %v1615_v29, %v1504_v32 }
 0xd42   : > { %1515 = vst.msk [vmem:[%s535_s17 + $0x8] sm:$0xff] %vm543_vm0, %v1513_v33 }
 0xd43   : > { %1514 = vst.msk [vmem:[%s535_s17] sm:$0xff] %vm543_vm0, %v1512_v34 }
 0xd44 PF: > { %s26_s21 = sadd.s32 1, %s1940_s21  }
 0xd45   : > { %p23_p4 = scmp.ge.s32.totalorder %s26_s21, 4  }
 0xd47   :  { %25 = sbr.rel (!%p23_p4) target bundleno = 2 (0x2), region = 117 }

// kernel: forward.7
= control target key start
LH: loop header
LB: loop body
LE: loop exit
PB: predicated region body
PF: predicated region fallthrough
CT: control target
= control target key end

     0   :  { %s3298_s0 = inlined_call_operand.vmem [shape: f32[2,8,64], index: 0, kind: input, shape index: {}]   ;;  %s3299_s1 = inlined_call_operand.vmem [shape: f32[2,16,64], index: 1, kind: input, shape index: {}]   ;;  %s3300_s2 = inlined_call_operand.vmem [shape: f32[2,1,16], index: 2, kind: input, shape index: {}]   ;;  %s3301_s3 = inlined_call_operand.vmem [shape: f32[1,64], index: 3, kind: input, shape index: {}]   ;;  %s3302_s4 = inlined_call_operand.vmem [shape: f32[1,64], index: 4, kind: input, shape index: {}]   ;;  %s3303_s5 = inlined_call_operand.vmem [shape: f32[64,192], index: 5, kind: input, shape index: {}]   ;;  %s3304_s6 = inlined_call_operand.vmem [shape: f32[1,192], index: 6, kind: input, shape index: {}]   ;;  %s3305_s7 = inlined_call_operand.vmem [shape: f32[64,64], index: 7, kind: input, shape index: {}]   ;;  %s3306_s8 = inlined_call_operand.vmem [shape: f32[1,64], index: 8, kind: input, shape index: {}]   ;;  %s3307_s9 = inlined_call_operand.vmem [shape: f32[1,64], index: 9, kind: input, shape index: {}]   ;;  %s3308_s10 = inlined_call_operand.vmem [shape: f32[1,64], index: 10, kind: input, shape index: {}]   ;;  %s3309_s11 = inlined_call_operand.vmem [shape: f32[64,64], index: 11, kind: input, shape index: {}]   ;;  %s3310_s12 = inlined_call_operand.vmem [shape: f32[1,64], index: 12, kind: input, shape index: {}]   ;;  %s3311_s13 = inlined_call_operand.vmem [shape: f32[64,128], index: 13, kind: input, shape index: {}]   ;;  %s3312_s14 = inlined_call_operand.vmem [shape: f32[1,128], index: 14, kind: input, shape index: {}]   ;;  %s3313_s15 = inlined_call_operand.vmem [shape: f32[64,64], index: 15, kind: input, shape index: {}]   ;;  %s3314_s16 = inlined_call_operand.vmem [shape: f32[1,64], index: 16, kind: input, shape index: {}]   ;;  %s3315_s17 = inlined_call_operand.vmem [shape: f32[1,64], index: 17, kind: input, shape index: {}]   ;;  %s3316_s18 = inlined_call_operand.vmem [shape: f32[1,64], index: 18, kind: input, shape index: {}]   ;;  %s3317_s19 = inlined_call_operand.vmem [shape: f32[64,128], index: 19, kind: input, shape index: {}]   ;;  %s3318_s20 = inlined_call_operand.vmem [shape: f32[1,128], index: 20, kind: input, shape index: {}]   ;;  %s3319_s21 = inlined_call_operand.vmem [shape: f32[128,64], index: 21, kind: input, shape index: {}]   ;;  %s3320_s22 = inlined_call_operand.vmem [shape: f32[1,64], index: 22, kind: input, shape index: {}]   ;;  %s3321_s23 = inlined_call_operand.vmem [shape: f32[2,8,64], index: 23, kind: output, shape index: {}]  }
   0x1   :  { %3327 = sst [smem:[#allocation2_spill]] %s3298_s0 }
   0x2   :  { %3328 = sst [smem:[#allocation3_spill]] %s3299_s1 }
   0x3   :  { %3329 = sst [smem:[#allocation4_spill]] %s3300_s2 }
   0x4   :  { %3330 = sst [smem:[#allocation5_spill]] %s3301_s3 }
   0x5   :  { %3331 = sst [smem:[#allocation6_spill]] %s3302_s4  ;;  %s2874_s4 = smov 0  }
   0x6   :  { %3332 = sst [smem:[#allocation7_spill]] %s3303_s5 }
   0x7   :  { %3333 = sst [smem:[#allocation8_spill]] %s3304_s6 }
   0x8   :  { %3334 = sst [smem:[#allocation9_spill]] %s3305_s7 }
   0x9 LB: > { %s2261_s30 = sadd.s32 4294967295, %s2745_s4   ;;  %p2265_p0 = scmp.ge.s32.totalorder %s2745_s4, 1  ;;  %s2745_s4 = sphi %s2874_s4, %s33_s4  }
   0xa   : > { %p654_p1 = scmp.lt.s32.totalorder %s2745_s4, 3 }
   0xc   : > { %p655_p2 = pnand %p2265_p0, %p654_p1 }
   0xd   : > { %p724_p3 = scmp.lt.s32.totalorder (!%p655_p2), %s2261_s30, 1  ;;  %vm754_vm0 = vcmask (!%p655_p2), 523264   ;;  %s3335_s1 = sld [smem:[#allocation2_spill]] (!%p655_p2)  ;;  %v2747_v20 = vmov (!%p655_p2), 0.0   ;;  %v743_v41 = vlaneseq (!%p655_p2)  ;;  %vm2748_vm1 = vmmov (!%p655_p2), 0  }
   0xe   : > { %658 = sbr.rel (%p655_p2) target bundleno = 5183 (0x143f), region = 112  ;;  %s3336_s27 = sld [smem:[#allocation7_spill]] (!%p655_p2)  ;;  %878 = vmatprep.mubr.f32.mxu1 (!%p655_p2), %v2747_v20  ;;  %2425 = vmatprep.mubr.msk.f32.mxu0 (!%p655_p2), %vm2748_vm1, %v2747_v20  ;;  %vm898_vm2 = vcmask (!%p655_p2), 261120   ;;  %v2751_v55 = vmov (!%p655_p2), -1e+09   ;;  %vm974_vm4 = vcmask (!%p655_p2), 64512  }
   0xf   : > { %s3337_s6 = sld [smem:[#allocation5_spill]] (!%p655_p2)  ;;  %s3338_s29 = sld [smem:[#allocation6_spill]] (!%p655_p2)  ;;  %v2953_v42 = vshrl.u32 (!%p655_p2), %v743_v41, 7  ;;  %v746_v54 = vand.u32 (!%p655_p2), 127, %v743_v41  ;;  %v2279_v41 = vld [vmem:[%s3306_s8] ss:$0 sm:$0xff] (!%p655_p2)  ;;  %vm3109_vm5 = vmpackc.low (!%p655_p2), %vm898_vm2, %vm898_vm2 }
  0x10   : > { %s3339_s25 = sld [smem:[#allocation8_spill]] (!%p655_p2)  ;;  %s3325_s5 = smov (!%p655_p2), 32   ;;  %vm1618_vm6 = vcmask (!%p655_p2), 130048  }
  0x11   : > { %v803_v43 = vsub.s32 (!%p655_p2), 0, %v2953_v42  ;;  %v807_v49 = vsub.s32 (!%p655_p2), 1, %v2953_v42  ;;  %vm747_vm3 = vcmp.ge.s32.totalorder (!%p655_p2), %v2953_v42, %v746_v54  ;;  %s3340_s7 = sld [smem:[#allocation9_spill]] (!%p655_p2) }
  0x12   : > { %v748_v56 = vsel (!%p655_p2), %vm747_vm3, 0.0, %v2751_v55 }
  0x14   : > { %v784_v7 = vld [vmem:[%s3336_s27 + $0x8] sm:$0xff] (!%p655_p2)  ;;  %v786_v8 = vld [vmem:[%s3336_s27 + $0x18] sm:$0xff] (!%p655_p2)  ;;  %v783_v10 = vld [vmem:[%s3336_s27] sm:$0xff] (!%p655_p2) }
  0x15   : > { %s3348_s30 = smov (!%p724_p3, %s2261_s30), 1  ;;  %v2567_v9 = vpack.c.bf16 %v786_v8, %v784_v7  ;;  %v785_v11 = vld [vmem:[%s3336_s27 + $0x10] sm:$0xff]  ;;  %v788_v13 = vld [vmem:[%s3336_s27 + $0x28] sm:$0xff]  ;;  %v790_v14 = vld [vmem:[%s3336_s27 + $0x38] sm:$0xff] }
  0x16   : > { %s3324_s24 = sshll.u32 %s3348_s30, 3  ;;  %v2569_v12 = vpack.c.bf16 %v785_v11, %v783_v10  ;;  %v787_v15 = vld [vmem:[%s3336_s27 + $0x20] sm:$0xff]  ;;  %v2571_v16 = vpack.c.bf16 %v790_v14, %v788_v13  ;;  %v789_v17 = vld [vmem:[%s3336_s27 + $0x30] sm:$0xff]  ;;  %v792_v18 = vld [vmem:[%s3336_s27 + $0x48] sm:$0xff]  ;;  %s2305_s2 = sshll.u32 %s3348_s30, 4 }
  0x17   : > { %s727_s26 = scalar_lea.vmem %s3335_s1, %s3324_s24  ;;  %2568 = vmatprep.subr.bf16.mxu1 %v2567_v9  ;;  %v794_v19 = vld [vmem:[%s3336_s27 + $0x58] sm:$0xff]  ;;  %v2573_v21 = vpack.c.bf16 %v789_v17, %v787_v15  ;;  %v791_v23 = vld [vmem:[%s3336_s27 + $0x40] sm:$0xff]  ;;  %v793_v24 = vld [vmem:[%s3336_s27 + $0x50] sm:$0xff]  ;;  %s2750_s1 = smov 64  }
  0x18   : > { %v2890_v0 = vld [vmem:[%s727_s26] sm:$0xff]  ;;  %2570 = vmatpush1.bf16.msra.mxu1 %v2569_v12  ;;  %v2575_v22 = vpack.c.bf16 %v794_v19, %v792_v18  ;;  %v796_v25 = vld [vmem:[%s3336_s27 + $0x68] sm:$0xff]  ;;  %v798_v26 = vld [vmem:[%s3336_s27 + $0x78] sm:$0xff]  ;;  %v2577_v27 = vpack.c.bf16 %v793_v24, %v791_v23  ;;  %s2752_s26 = smov 96  }
  0x19   : > { %v755_v1 = vsel %vm754_vm0, %v2890_v0, 0.0  ;;  %2572 = vmatprep.subr.bf16.mxu1 %v2571_v16  ;;  %v2579_v28 = vpack.c.bf16 %v798_v26, %v796_v25  ;;  %v795_v29 = vld [vmem:[%s3336_s27 + $0x60] sm:$0xff]  ;;  %v797_v30 = vld [vmem:[%s3336_s27 + $0x70] sm:$0xff]  ;;  %v886_v25 = vld [vmem:[%s3340_s7 + $0x8] sm:$0xff] }
  0x1a   : > { %756 = vadd.xlane.f32.xlu0 %v755_v1  ;;  %v2581_v31 = vpack.c.bf16 %v797_v30, %v795_v29  ;;  %v2270_v36 = vld [vmem:[%s3337_s6] ss:$0 sm:$0xff]  ;;  %v887_v26 = vld [vmem:[%s3340_s7 + $0x10] sm:$0xff]  ;;  %v888_v29 = vld [vmem:[%s3340_s7 + $0x18] sm:$0xff] }
  0x1b   : > { %v2271_v38 = vld [vmem:[%s3338_s29] ss:$0 sm:$0xff]  ;;  %v2587_v30 = vpack.c.bf16 %v888_v29, %v887_v26  ;;  %s3341_s29 = sld [smem:[#allocation3_spill]] }
  0x1c   : > { %2574 = vmatpush1.bf16.msra.mxu1 %v2573_v21  ;;  %v799_v44 = vld [vmem:[%s3339_s25] sm:$0x3] }
  0x1d   : > { %2576 = vmatprep.subr.bf16.mxu1 %v2575_v22  ;;  %v804_v45 = vrot.slane %v799_v44, %v803_v43  ;;  %v808_v50 = vrot.slane %v799_v44, %v807_v49  ;;  %v885_v24 = vld [vmem:[%s3340_s7] sm:$0xff] }
  0x1e   : > { %v1427_v49 = vld [vmem:[%s3311_s13] sm:$0xff] }
  0x1f   : > { %v2285_v26 = vld [vmem:[%s3312_s14] ss:$0 sm:$0xff] }
  0x20   : > { %2578 = vmatpush1.bf16.msra.mxu1 %v2577_v27  ;;  %v2753_v27 = vmov 0.0|0.0  }
  0x21   : > { %2580 = vmatprep.subr.bf16.mxu1 %v2579_v28  ;;  %2583 = vmatprep.subr.bf16.mxu0 %v2753_v27  ;;  %v2584_v28 = vpack.c.bf16 %v886_v25, %v885_v24  ;;  %s732_s24 = scalar_lea.vmem %s3341_s29, %s2305_s2 }
  0x23   : > { %2585 = vmatpush3.bf16.msra.mxu0 %v2584_v28 }
  0x24   : > { %2582 = vmatpush1.bf16.msra.mxu1 %v2581_v31  ;;  %2586 = vmatprep.subr.bf16.mxu0 %v2753_v27  ;;  %v889_v31 = vld [vmem:[%s3340_s7 + $0x20] sm:$0xff] }
  0x25   : > { %2389 = vmatprep.subr.mxu1 %v2747_v20 }
  0x27   : > { %2588 = vmatpush3.bf16.msra.mxu0 %v2587_v30 }
  0x28   : > { %2589 = vmatprep.subr.bf16.mxu0 %v2753_v27 }
  0xa7   : > { %v757_v2 = vpop.xlane.xlu0 %756 }
  0xa8   : > { %v759_v3 = vmul.f32 0.015625, %v757_v2 }
  0xaa   : > { %v760_v4 = vsub.f32 %v2890_v0, %v759_v3 }
  0xac   : > { %v761_v5 = vmul.f32 %v760_v4, %v760_v4 }
  0xae   : > { %v762_v6 = vsel %vm754_vm0, %v761_v5, 0.0 }
  0xaf   : > { %763 = vadd.xlane.f32.xlu0 %v762_v6 }
 0x13c   : > { %v764_v32 = vpop.xlane.xlu0 %763 }
 0x13d   : > { %v765_v33 = vmul.f32 0.015625, %v764_v32  ;;  %v890_v32 = vld [vmem:[%s3340_s7 + $0x28] sm:$0xff] }
 0x13f   : > { %v766_v34 = vadd.f32 1e-05, %v765_v33  ;;  %v2590_v33 = vpack.c.bf16 %v890_v32, %v889_v31  ;;  %v1530_v32 = vld [vmem:[%s3313_s15 + $0x38] sm:$0xff] }
 0x141   : > { %2715 = vrsqrt.f32 %v766_v34  ;;  %v891_v34 = vld [vmem:[%s3340_s7 + $0x30] sm:$0xff]  ;;  %2591 = vmatpush3.bf16.msra.mxu0 %v2590_v33 }
 0x142   : > { %2592 = vmatprep.subr.bf16.mxu0 %v2753_v27 }
 0x14b   : > { %v2716_v35 = vpop.eup %2715 }
 0x14c   : > { %v768_v37 = vmul.f32 %v2716_v35, %v760_v4  ;;  %v892_v35 = vld [vmem:[%s3340_s7 + $0x38] sm:$0xff] }
 0x14e   : > { %v775_v39 = vmul.f32 %v2270_v36, %v768_v37  ;;  %v2593_v36 = vpack.c.bf16 %v892_v35, %v891_v34  ;;  %v2283_v35 = vld [vmem:[%s3310_s12] ss:$0 sm:$0xff] }
 0x150   : > { %v782_v40 = vadd.f32 %v2271_v38, %v775_v39  ;;  %2594 = vmatpush3.bf16.msra.mxu0 %v2593_v36 }
 0x152   : > { %2272 = vmatmul.mubr.msk.f32.vlgmr.msra.gmra.mrb[0].mxu1 %vm754_vm0, %v782_v40 }
 0x153   : > { %2391 = vmatprep.mubr.msk.f32.mxu1 %vm2748_vm1, %v2747_v20 }
 0x225   : > { %v880_v46 = vpop.f32.mrb[0].mxu1 }
 0x226   : > { %v881_v47 = vadd.f32 %v880_v46, %v804_v45  ;;  %v882_v48 = vpop.f32.mrb[1].mxu1 }
 0x227   : > { %v883_v53 = vadd.f32 %v882_v48, %v808_v50  ;;  %v1428_v50 = vld [vmem:[%s3311_s13 + $0x8] sm:$0xff] }
 0x228   : > { %1061 = vrot.lane.b32.xlu0 %v881_v47, %s3325_s5  ;;  %896 = vrot.lane.b32.xlu1 %v881_v47, %s2750_s1  ;;  %v894_v52 = vmul.f32 0.17677669, %v881_v47 }
 0x29a   : > { %v897_v51 = vpop.permute.xlu1 %896  ;;  %v1062_v3 = vpop.permute.xlu0 %1061 }
 0x29b   : > { %2390 = vmatpush3.xpose.msk.msra.mxu1 %vm898_vm2, %v897_v51  ;;  %v2607_v51 = vpack.c.bf16 %v1428_v50, %v1427_v49 }
 0x29c   : > { %2394 = vmatprep.subr.mxu1 %v2747_v20 }
 0x29d   : > { %2608 = vmatprep.subr.bf16.mxu0 %v2607_v51 }
 0x29e   : > { %2392 = vmatmul.mubr.msk.f32.vlgmr.msra.gmra.mrb[2].mxu1 %vm898_vm2, %v894_v52 }
 0x29f   : > { %2395 = vmatpush3.msra.mxu1 %v883_v53  ;;  %2396 = vmatprep.mubr.msk.f32.mxu1 %vm2748_vm1, %v2747_v20 }
 0x2a0   : > { %2399 = vmatprep.subr.mxu1 %v2747_v20 }
 0x371   : > { %v970_v57 = vpop.f32.mrb[2].mxu1 }
 0x372   : > { %v971_v58 = vadd.f32 %v970_v57, %v748_v56  ;;  %v2393_v59 = vpop.f32.mrb[3].mxu1  ;;  %v1430_v57 = vld [vmem:[%s3311_s13 + $0x18] sm:$0xff] }
 0x373   : > { %v1431_v59 = vld [vmem:[%s3311_s13 + $0x20] sm:$0xff] }
 0x374   : > { %v975_v60 = vsel %vm974_vm4, %v971_v58, -inf }
 0x375   : > { %976 = vmax.xlane.f32.xlu1 %v975_v60  ;;  %v1432_v60 = vld [vmem:[%s3311_s13 + $0x28] sm:$0xff] }
 0x402   : > { %v977_v61 = vpop.xlane.xlu1 %976 }
 0x403   : > { %v978_v62 = vsub.f32 %v971_v58, %v977_v61  ;;  %v2615_v61 = vpack.c.bf16 %v1432_v60, %v1431_v59 }
 0x405   : > { %v979_v63 = vmul.f32 1.442695, %v978_v62  ;;  %v1339_v62 = vld [vmem:[%s3309_s11] sm:$0xff] }
 0x407   : > { %2717 = vpow2.f32 %v979_v63  ;;  %v1340_v63 = vld [vmem:[%s3309_s11 + $0x8] sm:$0xff] }
 0x411   : > { %v2718_v1 = vpop.eup %2717 }
 0x412   : > { %v981_v2 = vsel %vm974_vm4, %v2718_v1, 0.0 }
 0x413   : > { %982 = vadd.xlane.f32.xlu0 %v981_v2  ;;  %v1433_v2 = vld [vmem:[%s3311_s13 + $0x30] sm:$0xff] }
 0x429   : > { %1059 = vrot.lane.b32.xlu0 %v894_v52, %s2752_s26 }
 0x4a0   : > { %v983_v4 = vpop.xlane.xlu0 %982 }
 0x4a1   : > { %2719 = vrcp.f32 %v983_v4 }
 0x4a4   : > { %v1060_v7 = vpop.permute.xlu0 %1059 }
 0x4ab   : > { %v2720_v5 = vpop.eup %2719 }
 0x4ac   : > { %v985_v6 = vmul.f32 %v2720_v5, %v2718_v1  ;;  %v2596_v1 = vpack.c.bf16 %v1340_v63, %v1339_v62  ;;  %v1341_v5 = vld [vmem:[%s3309_s11 + $0x10] sm:$0xff] }
 0x4ae   : > { %2397 = vmatmul.mubr.msk.f32.vlgmr.msra.gmra.mrb[4].mxu1 %vm974_vm4, %v985_v6  ;;  %v1342_v6 = vld [vmem:[%s3309_s11 + $0x18] sm:$0xff] }
 0x4af   : > { %2400 = vmatpush3.xpose.msk.msra.mxu1 %vm898_vm2, %v1062_v3  ;;  %2401 = vmatprep.mubr.msk.f32.mxu1 %vm2748_vm1, %v2747_v20  ;;  %v1434_v3 = vld [vmem:[%s3311_s13 + $0x38] sm:$0xff] }
 0x4b0   : > { %2404 = vmatprep.subr.mxu1 %v2747_v20  ;;  %v2619_v4 = vpack.c.bf16 %v1434_v3, %v1433_v2 }
 0x4b2   : > { %2402 = vmatmul.mubr.msk.f32.vlgmr.msra.gmra.mrb[6].mxu1 %vm898_vm2, %v1060_v7  ;;  %v2599_v7 = vpack.c.bf16 %v1342_v6, %v1341_v5 }
 0x4b3   : > { %2406 = vmatprep.mubr.msk.f32.mxu1 %vm2748_vm1, %v2747_v20 }
 0x581   : > { %v1055_v8 = vpop.f32.mrb[4].mxu1 }
 0x582   : > { %v2398_v9 = vpop.f32.mrb[5].mxu1 }
 0x583   : > { %v742_v9 = vld [vmem:[%s732_s24 + $0x8] sm:$0xff] }
 0x585   : > { %v1133_v10 = vpop.f32.mrb[6].mxu1 }
 0x586   : > { %v1134_v11 = vadd.f32 %v1133_v10, %v748_v56  ;;  %v2403_v12 = vpop.f32.mrb[7].mxu1  ;;  %v1429_v56 = vld [vmem:[%s3311_s13 + $0x10] sm:$0xff]  ;;  %v1343_v10 = vld [vmem:[%s3309_s11 + $0x20] sm:$0xff] }
 0x587   : > { %v2611_v58 = vpack.c.bf16 %v1430_v57, %v1429_v56 }
 0x588   : > { %v1137_v13 = vsel %vm974_vm4, %v1134_v11, -inf }
 0x589   : > { %1138 = vmax.xlane.f32.xlu0 %v1137_v13  ;;  %v1345_v13 = vld [vmem:[%s3309_s11 + $0x30] sm:$0xff] }
 0x616   : > { %v1139_v14 = vpop.xlane.xlu0 %1138 }
 0x617   : > { %v1140_v15 = vsub.f32 %v1134_v11, %v1139_v14  ;;  %v1344_v11 = vld [vmem:[%s3309_s11 + $0x28] sm:$0xff]  ;;  %v1346_v14 = vld [vmem:[%s3309_s11 + $0x38] sm:$0xff] }
 0x618   : > { %v2602_v12 = vpack.c.bf16 %v1344_v11, %v1343_v10 }
 0x619   : > { %v1141_v16 = vmul.f32 1.442695, %v1140_v15  ;;  %v2605_v15 = vpack.c.bf16 %v1346_v14, %v1345_v13 }
 0x61b   : > { %2721 = vpow2.f32 %v1141_v16 }
 0x625   : > { %v2722_v17 = vpop.eup %2721 }
 0x626   : > { %v1143_v18 = vsel %vm974_vm4, %v2722_v17, 0.0 }
 0x627   : > { %1144 = vadd.xlane.f32.xlu1 %v1143_v18 }
 0x638   : > { %1149 = vrot.lane.b32.xlu1 %v883_v53, %s2752_s26 }
 0x6b4   : > { %v1145_v19 = vpop.xlane.xlu1 %1144 }
 0x6b5   : > { %2723 = vrcp.f32 %v1145_v19 }
 0x6b8   : > { %v1150_v21 = vpop.permute.xlu1 %1149 }
 0x6b9   : > { %2405 = vmatpush3.msra.mxu1 %v1150_v21  ;;  %v2281_v21 = vld [vmem:[%s3307_s9] ss:$0 sm:$0xff] }
 0x6ba   : > { %2595 = vmatprep.subr.bf16.mxu1 %v2753_v27 }
 0x6bf   : > { %v2724_v22 = vpop.eup %2723 }
 0x6c0   : > { %v1147_v23 = vmul.f32 %v2724_v22, %v2722_v17 }
 0x6c2   : > { %2407 = vmatmul.mubr.msk.f32.vlgmr.msra.gmra.mrb[8].mxu1 %vm974_vm4, %v1147_v23  ;;  %v2282_v23 = vld [vmem:[%s3308_s10] ss:$0 sm:$0xff] }
 0x6c3   : > { %2444 = vmatprep.mubr.msk.f32.mxu1 %vm2748_vm1, %v2747_v20  ;;  %2597 = vmatpush3.bf16.msra.mxu1 %v2596_v1 }
 0x6c4   : > { %2598 = vmatprep.subr.bf16.mxu1 %v2753_v27 }
 0x6c7   : > { %2600 = vmatpush3.bf16.msra.mxu1 %v2599_v7 }
 0x6c8   : > { %2601 = vmatprep.subr.bf16.mxu1 %v2753_v27 }
 0x6cb   : > { %2603 = vmatpush3.bf16.msra.mxu1 %v2602_v12 }
 0x6cc   : > { %2604 = vmatprep.subr.bf16.mxu1 %v2753_v27 }
 0x6cf   : > { %2606 = vmatpush3.bf16.msra.mxu1 %v2605_v15 }
 0x6d0   : > { %2623 = vmatprep.subr.bf16.mxu1 %v2753_v27 }
 0x795   : > { %v1221_v37 = vpop.f32.mrb[8].mxu1 }
 0x796   : > { %1226 = vrot.lane.b32.xlu1 %v1221_v37, %s3325_s5  ;;  %v2408_v38 = vpop.f32.mrb[9].mxu1  ;;  %s3344_s5 = sld [smem:[#allocation4_spill]] }
 0x79c   : > { %s735_s3 = scalar_lea.vmem %s3344_s5, %s3348_s30  ;;  %s3346_s5 = sshll.u32 %s3348_s30, 3 }
 0x79d   : > { %s739_s0 = scalar_lea.vmem %s3321_s23, %s3346_s5 }
 0x808   : > { %v1227_v39 = vpop.permute.xlu1 %1226 }
 0x809   : > { %v1229_v40 = vsel %vm898_vm2, %v1055_v8, %v1227_v39  ;;  %v741_v8 = vld [vmem:[%s732_s24] sm:$0xff] }
 0x80a   : > { %2426 = vmatmul.mubr.msk.f32.vlgmr.msra.gmra.mrb[0].mxu0 %vm754_vm0, %v1229_v40  ;;  %v749_v40 = vld [vmem:[%s735_s3] sm:$0x1] }
 0x80b   : > { %2610 = vmatpush3.bf16.msra.mxu0 %v2607_v51  ;;  %2463 = vmatprep.mubr.msk.f32.mxu0 %vm754_vm0, %v741_v8 }
 0x80c   : > { %2612 = vmatprep.subr.bf16.mxu0 %v2611_v58 }
 0x80f   : > { %2614 = vmatpush3.bf16.msra.mxu0 %v2611_v58 }
 0x810   : > { %2616 = vmatprep.subr.bf16.mxu0 %v2615_v61 }
 0x813   : > { %2618 = vmatpush3.bf16.msra.mxu0 %v2615_v61 }
 0x814   : > { %2620 = vmatprep.subr.bf16.mxu0 %v2619_v4 }
 0x817   : > { %2622 = vmatpush3.bf16.msra.mxu0 %v2619_v4 }
 0x818   : > { %2634 = vmatprep.subr.bf16.mxu0 %v2753_v27 }
 0x81a   : > { %2464 = vmatmul.mubr.msk.f32.vlgmr.msra.gmra.mrb[2].mxu0 %vm754_vm0, %v742_v9 }
 0x81b   : > { %2491 = vmatprep.mubr.msk.f32.mxu0 %vm2748_vm1, %v2747_v20 }
 0x8dd   : > { %v1305_v44 = vpop.f32.mrb[0].mxu0 }
 0x8de   : > { %v1306_v45 = vadd.f32 %v2279_v41, %v1305_v44  ;;  %v2427_v46 = vpop.f32.mrb[1].mxu0  ;;  %v750_v41 = vsub.f32 1.0, %v749_v40 }
 0x8e0   : > { %v3028_v47 = vadd.f32 %v1306_v45, %v2890_v0  ;;  %v751_v44 = vmul.f32 -1e+09, %v750_v41 }
 0x8e2   : > { %v1312_v48 = vsel %vm754_vm0, %v3028_v47, 0.0  ;;  %v1537_v45 = vrot.slane %v751_v44, %v803_v43 }
 0x8e3   : > { %1313 = vadd.xlane.f32.xlu1 %v1312_v48 }
 0x8ed   : > { %v2465_v28 = vpop.f32.mrb[2].mxu0 }
 0x8ee   : > { %v1520_v29 = vadd.f32 %v2465_v28, %v2285_v26  ;;  %v1514_v30 = vpop.f32.mrb[3].mxu0  ;;  %v1527_v28 = vld [vmem:[%s3313_s15 + $0x20] sm:$0xff] }
 0x8ef   : > { %v1515_v31 = vadd.f32 %v2285_v26, %v1514_v30 }
 0x8f1   : > { %v2624_v33 = vpack.c.bf16 %v1520_v29, %v1515_v31  ;;  %v2705_v34 = vpack.i.bf16 %v1520_v29, %v1515_v31  ;;  %v1528_v29 = vld [vmem:[%s3313_s15 + $0x28] sm:$0xff]  ;;  %v1529_v31 = vld [vmem:[%s3313_s15 + $0x30] sm:$0xff] }
 0x8f2   : > { %v2644_v30 = vpack.c.bf16 %v1528_v29, %v1527_v28  ;;  %v2106_v28 = vld [vmem:[%s3319_s21 + $0x70] sm:$0xff]  ;;  %v2107_v29 = vld [vmem:[%s3319_s21 + $0x78] sm:$0xff] }
 0x8f4   : > { %2706 = vrot.lane.b32.xlu1 %v2705_v34, %s2752_s26 }
 0x970   : > { %v1314_v52 = vpop.xlane.xlu1 %1313 }
 0x971   : > { %v1315_v53 = vmul.f32 0.015625, %v1314_v52 }
 0x973   : > { %v1316_v0 = vsub.f32 %v3028_v47, %v1315_v53 }
 0x974   : > { %v2707_v58 = vpop.permute.xlu1 %2706 }
 0x975   : > { %v1317_v54 = vmul.f32 %v1316_v0, %v1316_v0  ;;  %v2709_v60 = vunpack.i.h.bf16 %v2707_v58  ;;  %v2708_v61 = vunpack.i.l.bf16 %v2707_v58 }
 0x977   : > { %v1318_v55 = vsel %vm754_vm0, %v1317_v54, 0.0  ;;  %v2631_v63 = vpack.c.bf16 %v2709_v60, %v2708_v61  ;;  %v2093_v60 = vld [vmem:[%s3319_s21 + $0x8] sm:$0xff] }
 0x978   : > { %1319 = vadd.xlane.f32.xlu0 %v1318_v55 }
 0xa05   : > { %v1320_v16 = vpop.xlane.xlu0 %1319 }
 0xa06   : > { %v1321_v17 = vmul.f32 0.015625, %v1320_v16 }
 0xa08   : > { %v1322_v18 = vadd.f32 1e-05, %v1321_v17 }
 0xa0a   : > { %2725 = vrsqrt.f32 %v1322_v18 }
 0xa14   : > { %v2726_v19 = vpop.eup %2725 }
 0xa15   : > { %v1324_v22 = vmul.f32 %v2726_v19, %v1316_v0 }
 0xa17   : > { %v1331_v24 = vmul.f32 %v2281_v21, %v1324_v22  ;;  %v1523_v21 = vld [vmem:[%s3313_s15] sm:$0xff]  ;;  %v1524_v22 = vld [vmem:[%s3313_s15 + $0x8] sm:$0xff] }
 0xa19   : > { %v1338_v25 = vadd.f32 %v2282_v23, %v1331_v24  ;;  %v1525_v23 = vld [vmem:[%s3313_s15 + $0x10] sm:$0xff]  ;;  %v2638_v24 = vpack.c.bf16 %v1524_v22, %v1523_v21  ;;  %v2103_v22 = vld [vmem:[%s3319_s21 + $0x58] sm:$0xff] }
 0xa1a   : > { %v2102_v21 = vld [vmem:[%s3319_s21 + $0x50] sm:$0xff] }
 0xa1b   : > { %2445 = vmatmul.mubr.msk.f32.vlgmr.msra.gmra.mrb[10].mxu1 %vm754_vm0, %v1338_v25  ;;  %v1526_v25 = vld [vmem:[%s3313_s15 + $0x18] sm:$0xff] }
 0xa1c   : > { %2470 = vmatprep.mubr.msk.f32.mxu1 %vm2748_vm1, %v2747_v20  ;;  %2626 = vmatpush3.bf16.xpose.msk.msra.mxu1 %vm3109_vm5, %v2624_v33  ;;  %v2641_v26 = vpack.c.bf16 %v1526_v25, %v1525_v23  ;;  %v2647_v33 = vpack.c.bf16 %v1530_v32, %v1529_v31  ;;  %v2677_v23 = vpack.c.bf16 %v2103_v22, %v2102_v21  ;;  %v2105_v25 = vld [vmem:[%s3319_s21 + $0x68] sm:$0xff]  ;;  %v2300_v31 = vld [vmem:[%s3318_s20] ss:$0 sm:$0xff] }
 0xa1d   : > { %2627 = vmatprep.subr.bf16.mxu1 %v2753_v27 }
 0xaee   : > { %v1423_v36 = vpop.f32.mrb[10].mxu1 }
 0xaef   : > { %v1424_v37 = vadd.f32 %v2283_v35, %v1423_v36  ;;  %v2446_v38 = vpop.f32.mrb[11].mxu1 }
 0xaf0   : > { %v2296_v38 = vld [vmem:[%s3314_s16] ss:$0 sm:$0xff] }
 0xaf1   : > { %v1532_v39 = vmul.f32 0.17677669, %v1424_v37 }
 0xaf3   : > { %2471 = vmatmul.mubr.msk.f32.vlgmr.msra.gmra.mrb[12].mxu1 %vm898_vm2, %v1532_v39 }
 0xaf4   : > { %2477 = vmatprep.mubr.msk.f32.mxu1 %vm2748_vm1, %v2747_v20 }
 0xbc6   : > { %v1614_v46 = vpop.f32.mrb[12].mxu1 }
 0xbc7   : > { %v1615_v48 = vadd.f32 %v1614_v46, %v1537_v45  ;;  %v2472_v49 = vpop.f32.mrb[13].mxu1 }
 0xbc9   : > { %v1619_v50 = vsel %vm1618_vm6, %v1615_v48, -inf }
 0xbca   : > { %1620 = vmax.xlane.f32.xlu0 %v1619_v50 }
 0xc57   : > { %v1621_v51 = vpop.xlane.xlu0 %1620 }
 0xc58   : > { %v1622_v52 = vsub.f32 %v1615_v48, %v1621_v51  ;;  %v1995_v51 = vld [vmem:[%s3317_s19] sm:$0xff] }
 0xc5a   : > { %v1623_v53 = vmul.f32 1.442695, %v1622_v52 }
 0xc5c   : > { %2727 = vpow2.f32 %v1623_v53  ;;  %v1997_v53 = vld [vmem:[%s3317_s19 + $0x10] sm:$0xff] }
 0xc66   : > { %v2728_v0 = vpop.eup %2727 }
 0xc67   : > { %v1625_v54 = vsel %vm1618_vm6, %v2728_v0, 0.0 }
 0xc68   : > { %1626 = vadd.xlane.f32.xlu0 %v1625_v54 }
 0xc7e   : > { %2701 = vrot.lane.b32.xlu0 %v2705_v34, %s2750_s1  ;;  %s3345_s1 = smov 32  }
 0xc82   : > { %1709 = vrot.lane.b32.xlu0 %v1532_v39, %s2752_s26 }
 0xcf5   : > { %v1627_v42 = vpop.xlane.xlu0 %1626 }
 0xcf6   : > { %2729 = vrcp.f32 %v1627_v42  ;;  %v1999_v42 = vld [vmem:[%s3317_s19 + $0x20] sm:$0xff] }
 0xcf9   : > { %v2702_v43 = vpop.permute.xlu0 %2701 }
 0xcfa   : > { %v2704_v55 = vunpack.i.h.bf16 %v2702_v43  ;;  %v2703_v56 = vunpack.i.l.bf16 %v2702_v43  ;;  %v2000_v43 = vld [vmem:[%s3317_s19 + $0x28] sm:$0xff] }
 0xcfc   : > { %v2628_v57 = vpack.c.bf16 %v2704_v55, %v2703_v56  ;;  %v2656_v55 = vpack.c.bf16 %v2000_v43, %v1999_v42  ;;  %v2001_v56 = vld [vmem:[%s3317_s19 + $0x30] sm:$0xff] }
 0xcfd   : > { %v1710_v1 = vpop.permute.xlu0 %1709 }
 0xcfe   : > { %2629 = vmatpush3.bf16.msra.mxu1 %v2628_v57  ;;  %v2002_v57 = vld [vmem:[%s3317_s19 + $0x38] sm:$0xff] }
 0xcff   : > { %2630 = vmatprep.subr.bf16.mxu1 %v2753_v27  ;;  %v2659_v58 = vpack.c.bf16 %v2002_v57, %v2001_v56 }
 0xd00   : > { %v2730_v59 = vpop.eup %2729 }
 0xd01   : > { %v1629_v62 = vmul.f32 %v2730_v59, %v2728_v0  ;;  %v1998_v0 = vld [vmem:[%s3317_s19 + $0x18] sm:$0xff]  ;;  %v2092_v59 = vld [vmem:[%s3319_s21] sm:$0xff] }
 0xd02   : > { %v2653_v54 = vpack.c.bf16 %v1998_v0, %v1997_v53  ;;  %v2662_v61 = vpack.c.bf16 %v2093_v60, %v2092_v59 }
 0xd03   : > { %2478 = vmatmul.mubr.msk.f32.vlgmr.msra.gmra.mrb[14].mxu1 %vm1618_vm6, %v1629_v62 }
 0xd04   : > { %2484 = vmatprep.mubr.msk.f32.mxu1 %vm2748_vm1, %v2747_v20 }
 0xd07   : > { %2633 = vmatpush3.bf16.xpose.msk.msra.mxu1 %vm3109_vm5, %v2631_v63 }
 0xd08   : > { %2649 = vmatprep.subr.bf16.mxu1 %v2753_v27 }
 0xd0e   : > { %2485 = vmatmul.mubr.msk.f32.vlgmr.msra.gmra.mrb[16].mxu1 %vm898_vm2, %v1710_v1 }
 0xd0f   : > { %2529 = vmatprep.mubr.msk.f32.mxu1 %vm2748_vm1, %v2747_v20 }
 0xdd6   : > { %v1705_v2 = vpop.f32.mrb[14].mxu1 }
 0xdd7   : > { %v2479_v3 = vpop.f32.mrb[15].mxu1 }
 0xdd8   : > { %v2298_v3 = vld [vmem:[%s3315_s17] ss:$0 sm:$0xff] }
 0xde1   : > { %v1787_v4 = vpop.f32.mrb[16].mxu1 }
 0xde2   : > { %v1788_v5 = vadd.f32 %v1787_v4, %v1537_v45  ;;  %v2486_v6 = vpop.f32.mrb[17].mxu1 }
 0xde4   : > { %v1791_v7 = vsel %vm1618_vm6, %v1788_v5, -inf }
 0xde5   : > { %1792 = vmax.xlane.f32.xlu0 %v1791_v7 }
 0xdfb   : > { %2711 = vrot.lane.b32.xlu0 %v2705_v34, %s3345_s1 }
 0xe72   : > { %v1793_v8 = vpop.xlane.xlu0 %1792 }
 0xe73   : > { %v1794_v9 = vsub.f32 %v1788_v5, %v1793_v8  ;;  %v2299_v5 = vld [vmem:[%s3316_s18] ss:$0 sm:$0xff]  ;;  %v2094_v8 = vld [vmem:[%s3319_s21 + $0x10] sm:$0xff] }
 0xe75   : > { %v1795_v10 = vmul.f32 1.442695, %v1794_v9  ;;  %v2095_v9 = vld [vmem:[%s3319_s21 + $0x18] sm:$0xff] }
 0xe76   : > { %v2712_v11 = vpop.permute.xlu0 %2711 }
 0xe77   : > { %2731 = vpow2.f32 %v1795_v10  ;;  %v2714_v12 = vunpack.i.h.bf16 %v2712_v11  ;;  %v2713_v13 = vunpack.i.l.bf16 %v2712_v11  ;;  %v2665_v10 = vpack.c.bf16 %v2095_v9, %v2094_v8  ;;  %v2096_v11 = vld [vmem:[%s3319_s21 + $0x20] sm:$0xff] }
 0xe79   : > { %v2635_v14 = vpack.c.bf16 %v2714_v12, %v2713_v13  ;;  %v2097_v12 = vld [vmem:[%s3319_s21 + $0x28] sm:$0xff] }
 0xe7a   : > { %v2668_v13 = vpack.c.bf16 %v2097_v12, %v2096_v11 }
 0xe7b   : > { %2636 = vmatpush3.bf16.msra.mxu0 %v2635_v14  ;;  %v2098_v14 = vld [vmem:[%s3319_s21 + $0x30] sm:$0xff] }
 0xe7c   : > { %2637 = vmatprep.subr.bf16.mxu0 %v2753_v27 }
 0xe81   : > { %v2732_v15 = vpop.eup %2731 }
 0xe82   : > { %v1797_v16 = vsel %vm1618_vm6, %v2732_v15, 0.0 }
 0xe83   : > { %1798 = vadd.xlane.f32.xlu1 %v1797_v16 }
 0xf10   : > { %v1799_v17 = vpop.xlane.xlu1 %1798 }
 0xf11   : > { %2733 = vrcp.f32 %v1799_v17  ;;  %v2100_v17 = vld [vmem:[%s3319_s21 + $0x40] sm:$0xff] }
 0xf1b   : > { %v2734_v18 = vpop.eup %2733 }
 0xf1c   : > { %v1801_v19 = vmul.f32 %v2734_v18, %v2732_v15  ;;  %v2099_v15 = vld [vmem:[%s3319_s21 + $0x38] sm:$0xff]  ;;  %v2101_v18 = vld [vmem:[%s3319_s21 + $0x48] sm:$0xff] }
 0xf1d   : > { %v2671_v16 = vpack.c.bf16 %v2099_v15, %v2098_v14 }
 0xf1e   : > { %2492 = vmatmul.mubr.msk.f32.vlgmr.msra.gmra.mrb[4].mxu0 %vm1618_vm6, %v1801_v19  ;;  %v2674_v19 = vpack.c.bf16 %v2101_v18, %v2100_v17 }
 0xf1f   : > { %2510 = vmatprep.mubr.msk.f32.mxu0 %vm2748_vm1, %v2747_v20  ;;  %2639 = vmatpush3.bf16.msra.mxu0 %v2638_v24  ;;  %v2104_v24 = vld [vmem:[%s3319_s21 + $0x60] sm:$0xff] }
 0xf20   : > { %2640 = vmatprep.subr.bf16.mxu0 %v2753_v27 }
 0xf23   : > { %2642 = vmatpush3.bf16.msra.mxu0 %v2641_v26  ;;  %v2680_v26 = vpack.c.bf16 %v2105_v25, %v2104_v24 }
 0xf24   : > { %2643 = vmatprep.subr.bf16.mxu0 %v2753_v27 }
 0xf27   : > { %2645 = vmatpush3.bf16.msra.mxu0 %v2644_v30  ;;  %v2683_v30 = vpack.c.bf16 %v2107_v29, %v2106_v28 }
 0xf28   : > { %2646 = vmatprep.subr.bf16.mxu0 %v2753_v27 }
 0xf2b   : > { %2648 = vmatpush3.bf16.msra.mxu0 %v2647_v33 }
 0xf2c   : > { %2661 = vmatprep.subr.bf16.mxu0 %v2753_v27 }
 0xff1   : > { %v1877_v34 = vpop.f32.mrb[4].mxu0 }
 0xff2   : > { %1882 = vrot.lane.b32.xlu1 %v1877_v34, %s3345_s1  ;;  %v2493_v35 = vpop.f32.mrb[5].mxu0 }
0x1064   : > { %v1883_v36 = vpop.permute.xlu1 %1882 }
0x1065   : > { %v1885_v37 = vsel %vm898_vm2, %v1705_v2, %v1883_v36 }
0x1066   : > { %2511 = vmatmul.mubr.msk.f32.vlgmr.msra.gmra.mrb[6].mxu0 %vm754_vm0, %v1885_v37 }
0x1067   : > { %2564 = vmatprep.mubr.msk.f32.mxu0 %vm2748_vm1, %v2747_v20  ;;  %2663 = vmatpush3.bf16.msra.mxu0 %v2662_v61 }
0x1068   : > { %2664 = vmatprep.subr.bf16.mxu0 %v2753_v27 }
0x106b   : > { %2666 = vmatpush3.bf16.msra.mxu0 %v2665_v10 }
0x106c   : > { %2667 = vmatprep.subr.bf16.mxu0 %v2753_v27 }
0x106f   : > { %2669 = vmatpush3.bf16.msra.mxu0 %v2668_v13 }
0x1070   : > { %2670 = vmatprep.subr.bf16.mxu0 %v2753_v27 }
0x1073   : > { %2672 = vmatpush3.bf16.msra.mxu0 %v2671_v16 }
0x1074   : > { %2673 = vmatprep.subr.bf16.mxu0 %v2753_v27 }
0x1077   : > { %2675 = vmatpush3.bf16.msra.mxu0 %v2674_v19 }
0x1078   : > { %2676 = vmatprep.subr.bf16.mxu0 %v2753_v27 }
0x107b   : > { %2678 = vmatpush3.bf16.msra.mxu0 %v2677_v23 }
0x107c   : > { %2679 = vmatprep.subr.bf16.mxu0 %v2753_v27 }
0x107f   : > { %2681 = vmatpush3.bf16.msra.mxu0 %v2680_v26 }
0x1080   : > { %2682 = vmatprep.subr.bf16.mxu0 %v2753_v27 }
0x1083   : > { %2684 = vmatpush3.bf16.msra.mxu0 %v2683_v30 }
0x1139   : > { %v1961_v39 = vpop.f32.mrb[6].mxu0 }
0x113a   : > { %v1962_v40 = vadd.f32 %v2296_v38, %v1961_v39  ;;  %v2512_v41 = vpop.f32.mrb[7].mxu0 }
0x113c   : > { %v3187_v44 = vadd.f32 %v1962_v40, %v3028_v47  ;;  %v1996_v47 = vld [vmem:[%s3317_s19 + $0x8] sm:$0xff] }
0x113d   : > { %v2650_v52 = vpack.c.bf16 %v1996_v47, %v1995_v51 }
0x113e   : > { %v1968_v45 = vsel %vm754_vm0, %v3187_v44, 0.0 }
0x113f   : > { %1969 = vadd.xlane.f32.xlu0 %v1968_v45  ;;  %2651 = vmatpush3.bf16.msra.mxu1 %v2650_v52 }
0x1140   : > { %2652 = vmatprep.subr.bf16.mxu1 %v2753_v27 }
0x1143   : > { %2654 = vmatpush3.bf16.msra.mxu1 %v2653_v54 }
0x1144   : > { %2655 = vmatprep.subr.bf16.mxu1 %v2753_v27 }
0x1147   : > { %2657 = vmatpush3.bf16.msra.mxu1 %v2656_v55 }
0x1148   : > { %2658 = vmatprep.subr.bf16.mxu1 %v2753_v27  ;;  %v2302_v27 = vld [vmem:[%s3320_s22] ss:$0 sm:$0xff] }
0x114b   : > { %2660 = vmatpush3.bf16.msra.mxu1 %v2659_v58 }
0x11cc   : > { %v1970_v46 = vpop.xlane.xlu0 %1969 }
0x11cd   : > { %v1971_v48 = vmul.f32 0.015625, %v1970_v46 }
0x11cf   : > { %v1972_v49 = vsub.f32 %v3187_v44, %v1971_v48 }
0x11d1   : > { %v1973_v50 = vmul.f32 %v1972_v49, %v1972_v49 }
0x11d3   : > { %v1974_v20 = vsel %vm754_vm0, %v1973_v50, 0.0 }
0x11d4   : > { %1975 = vadd.xlane.f32.xlu1 %v1974_v20 }
0x1261   : > { %v1976_v62 = vpop.xlane.xlu1 %1975 }
0x1262   : > { %v1977_v63 = vmul.f32 0.015625, %v1976_v62 }
0x1264   : > { %v1978_v1 = vadd.f32 1e-05, %v1977_v63 }
0x1266   : > { %2735 = vrsqrt.f32 %v1978_v1 }
0x1270   : > { %v2736_v2 = vpop.eup %2735 }
0x1271   : > { %v1980_v4 = vmul.f32 %v2736_v2, %v1972_v49 }
0x1273   : > { %v1987_v6 = vmul.f32 %v2298_v3, %v1980_v4 }
0x1275   : > { %v1994_v7 = vadd.f32 %v2299_v5, %v1987_v6 }
0x1277   : > { %2530 = vmatmul.mubr.msk.f32.vlgmr.msra.gmra.mrb[18].mxu1 %vm754_vm0, %v1994_v7 }
0x134a   : > { %v2079_v32 = vpop.f32.mrb[18].mxu1 }
0x134b   : > { %v2080_v33 = vadd.f32 %v2300_v31, %v2079_v32  ;;  %v2531_v34 = vpop.f32.mrb[19].mxu1 }
0x134d   : > { %v2084_v35 = vmul.f32 0.044715, %v2080_v33  ;;  %v2083_v41 = vmul.f32 0.5, %v2080_v33 }
0x134f   : > { %v2085_v36 = vmul.f32 %v2084_v35, %v2080_v33 }
0x1351   : > { %v2086_v37 = vmul.f32 %v2085_v36, %v2080_v33 }
0x1353   : > { %v2087_v38 = vadd.f32 %v2086_v37, %v2080_v33 }
0x1355   : > { %v2088_v39 = vmul.f32 0.7978846, %v2087_v38 }
0x1357   : > { %2737 = vtanh.f32 %v2088_v39 }
0x1361   : > { %v2738_v40 = vpop.eup %2737 }
0x1362   : > { %v2090_v45 = vadd.f32 1.0, %v2738_v40 }
0x1364   : > { %v2091_v46 = vmul.f32 %v2090_v45, %v2083_v41 }
0x1366   : > { %2565 = vmatmul.mubr.f32.vlgmr.msra.gmra.mrb[8].mxu0 %v2091_v46 }
0x1439   : > { %v2181_v48 = vpop.f32.mrb[8].mxu0 }
0x143a   : > { %v2182_v49 = vadd.f32 %v2302_v27, %v2181_v48  ;;  %v2566_v50 = vpop.f32.mrb[9].mxu0 }
0x143c   : > { %v2185_v20 = vadd.f32 %v2182_v49, %v3187_v44 }
0x143e   : > { %2186 = vst.msk [vmem:[%s739_s0] sm:$0xff] %vm754_vm0, %v2185_v20 }
0x143f PF: > { %s33_s4 = sadd.s32 1, %s2745_s4  }
0x1440   : > { %p30_p4 = scmp.ge.s32.totalorder %s33_s4, 4  }
0x1442   :  { %32 = sbr.rel (!%p30_p4) target bundleno = 9 (0x9), region = 148 }

</bundles_post_ra>
